<compile_context>
chip_gen: v5e
topology: v5e:2x2
jax: 0.10.0
libtpu: 0.0.40
codegen_flags: <defaults>
</compile_context>

<pallas_src>
import functools

import jax
import jax.numpy as jnp
from jax import lax
from jax.experimental import pallas as pl
from jax.experimental.pallas import tpu as pltpu

SEQ = 20  # hard-coded `sequence_length` inside AutoEncoderRNN.forward


def _lstm_cell_ref(x_t, h, c, wih, whh, b, hid):
    """Reference PyTorch LSTM cell: gate order (i, f, g, o) — f32, unfused."""
    gates = (jnp.dot(x_t, wih, preferred_element_type=jnp.float32)
             + jnp.dot(h, whh, preferred_element_type=jnp.float32)
             + b)
    i_g = jax.nn.sigmoid(gates[:, 0 * hid:1 * hid])
    f_g = jax.nn.sigmoid(gates[:, 1 * hid:2 * hid])
    g_g = jnp.tanh(gates[:, 2 * hid:3 * hid])
    o_g = jax.nn.sigmoid(gates[:, 3 * hid:4 * hid])
    c_new = f_g * c + i_g * g_g
    h_new = o_g * jnp.tanh(c_new)
    return h_new, c_new


def _binary_tanh(x):
    # hard_sigmoid -> round (half-to-even, same as torch.round) -> {-1, +1}
    y = jnp.clip((x + 1.0) * 0.5, 0.0, 1.0)
    return 2.0 * jnp.round(y) - 1.0


def autoencoder_kernel(x_ref,
                       wih_e_ref, whh_e_ref, be_ref,
                       fcw_ref, fcb_ref,
                       linw_ref, linb_ref,
                       wih_d_ref, whh_d_ref, bd_ref,
                       out_ref, bin_ref,
                       xg_ref,
                       *, hidden_size, input_size, batch):
    H, I, B = hidden_size, input_size, batch

    x2d = x_ref[...]          # (SEQ*B, I)  time-major rows [t0b0..t0bB-1, t1b0, ...]
    wih_e = wih_e_ref[...]    # (I, 4H)
    whh_e = whh_e_ref[...]    # (H, 4H)
    b_e = be_ref[...]         # (1, 4H)
    fc_w = fcw_ref[...]       # (H, I)
    fc_b = fcb_ref[...]       # (1, I)
    lin_w = linw_ref[...]     # (I, H)
    lin_b = linb_ref[...]     # (1, H)
    wih_d = wih_d_ref[...]    # (H, 4I)
    whh_d = whh_d_ref[...]    # (I, 4I)
    b_d = bd_ref[...]         # (1, 4I)

    # ---- Encoder: 1-layer LSTM, h0 = c0 = 0 -------------------------------
    # (1) hoist the input-to-hidden matmul + bias: one (SEQ*B, I) @ (I, 4H).
    xg_ref[...] = (jnp.dot(x2d, wih_e, preferred_element_type=jnp.float32)
                   + b_e)

    def enc_step(t, carry):
        h, c = carry
        row = pl.multiple_of(t * B, B)
        xg_t = xg_ref[pl.ds(row, B), :]                       # (B, 4H)
        # Encoder stays f32: the binary threshold downstream needs f32 parity.
        gates = xg_t + jnp.dot(h, whh_e, preferred_element_type=jnp.float32)
        gs = jax.nn.sigmoid(gates)                            # full-tile EUP
        gt = jnp.tanh(gates)                                  # full-tile EUP
        c_new = gs[:, H:2 * H] * c + gs[:, 0:H] * gt[:, 2 * H:3 * H]
        h_new = gs[:, 3 * H:4 * H] * jnp.tanh(c_new)
        return h_new, c_new

    h0 = jnp.zeros((B, H), jnp.float32)
    c0 = jnp.zeros((B, H), jnp.float32)
    h_e, c_e = lax.fori_loop(0, SEQ, enc_step, (h0, c0), unroll=True)

    # ---- fc: single stacked matmul; reuse fc(h_e) for the binary input ----
    hc = jnp.concatenate([h_e, c_e], axis=0)                  # (2B, H)
    hc_fc = jnp.dot(hc, fc_w, preferred_element_type=jnp.float32) + fc_b
    h_dec = hc_fc[:B]                                         # == fc(out[-1])
    c_dec = hc_fc[B:]
    binary = _binary_tanh(h_dec)                              # f32 threshold
    bin_ref[...] = binary

    # ---- Decoder: fold Linear into the LSTM for steps 1..SEQ-1 ------------
    w_fused = (jnp.dot(lin_w, wih_d, preferred_element_type=jnp.float32)
               + whh_d).astype(jnp.bfloat16)                  # (I, 4I)
    b_fused = jnp.broadcast_to(
        jnp.dot(lin_b, wih_d, preferred_element_type=jnp.float32) + b_d,
        (B, 4 * I))                                           # hoisted broadcast
    wih_d_bf = wih_d.astype(jnp.bfloat16)
    whh_d_bf = whh_d.astype(jnp.bfloat16)
    lin_w_bf = lin_w.astype(jnp.bfloat16)

    def gate_apply(gates, c):
        gs = jax.nn.sigmoid(gates)
        gt = jnp.tanh(gates)
        c_new = gs[:, I:2 * I] * c + gs[:, 0:I] * gt[:, 2 * I:3 * I]
        h_new = gs[:, 3 * I:4 * I] * jnp.tanh(c_new)
        return h_new, c_new

    # step 0: decoder input is `binary` (!= carried h) -> unfused path.
    lin0 = (jnp.dot(binary.astype(jnp.bfloat16), lin_w_bf,
                    preferred_element_type=jnp.float32) + lin_b)
    gates0 = (jnp.dot(lin0.astype(jnp.bfloat16), wih_d_bf,
                      preferred_element_type=jnp.float32)
              + jnp.dot(h_dec.astype(jnp.bfloat16), whh_d_bf,
                        preferred_element_type=jnp.float32)
              + b_d)
    h1, c1 = gate_apply(gates0, c_dec)
    out_ref[SEQ - 1] = h1

    # steps 1..SEQ-1: inp == h, so a single fused matmul per step.
    def dec_step(s, carry):
        h, c = carry
        gates = jnp.dot(h.astype(jnp.bfloat16), w_fused,
                        preferred_element_type=jnp.float32) + b_fused
        h_new, c_new = gate_apply(gates, c)
        out_ref[SEQ - 1 - s] = h_new
        return h_new, c_new

    lax.fori_loop(1, SEQ, dec_step, (h1, c1), unroll=True)


def autoencoder_forward(x, p):
    seq, B, I = x.shape
    H = p["whh_e"].shape[0]
    assert seq == SEQ

    x2d = x.reshape(SEQ * B, I)   # time-major flatten (done once in the wrapper)

    kernel = functools.partial(autoencoder_kernel,
                               hidden_size=H, input_size=I, batch=B)
    vmem = lambda: pl.BlockSpec(memory_space=pltpu.MemorySpace.VMEM)

    args = (x2d, p["wih_e"], p["whh_e"], p["b_e"],
            p["fc_w"], p["fc_b"], p["lin_w"], p["lin_b"],
            p["wih_d"], p["whh_d"], p["b_d"])

    out, binary = pl.pallas_call(
        kernel,
        out_shape=(jax.ShapeDtypeStruct((SEQ, B, I), jnp.float32),
                   jax.ShapeDtypeStruct((B, I), jnp.float32)),
        in_specs=[vmem() for _ in args],
        out_specs=(vmem(), vmem()),
        scratch_shapes=[pltpu.VMEM((SEQ * B, 4 * H), jnp.float32)],
    )(*args)
    return out, binary


def reference_forward(x, p):
    """Pure-JAX f32 reference with the original (unfused) math."""
    seq, B, I = x.shape
    H = p["whh_e"].shape[0]
    h = jnp.zeros((B, H), jnp.float32)
    c = jnp.zeros((B, H), jnp.float32)
    for t in range(seq):
        h, c = _lstm_cell_ref(x[t], h, c, p["wih_e"], p["whh_e"], p["b_e"], H)
    fc = lambda z: z @ p["fc_w"] + p["fc_b"]
    h_d, c_d = fc(h), fc(c)
    binary = _binary_tanh(fc(h))
    inp = binary
    outs = [None] * seq
    for i in range(seq - 1, -1, -1):
        lin = inp @ p["lin_w"] + p["lin_b"]
        h_d, c_d = _lstm_cell_ref(lin, h_d, c_d,
                                  p["wih_d"], p["whh_d"], p["b_d"], I)
        inp = h_d
        outs[i] = h_d
    return jnp.stack(outs, axis=0), binary


def init_params(key, input_size, hidden_size):
    I, H = input_size, hidden_size
    ks = jax.random.split(key, 9)
    scale = lambda fan_in: 1.0 / jnp.sqrt(jnp.float32(fan_in))
    # Encoder LSTM (input I -> hidden H); combined bias = b_ih + b_hh
    wih_e = jax.random.normal(ks[0], (I, 4 * H), jnp.float32) * scale(I)
    whh_e = jax.random.normal(ks[1], (H, 4 * H), jnp.float32) * scale(H)
    b_e = jax.random.normal(ks[2], (1, 4 * H), jnp.float32) * 0.05
    # fc: Linear(H -> I)
    fc_w = jax.random.normal(ks[3], (H, I), jnp.float32) * scale(H)
    fc_b = jax.random.normal(ks[4], (1, I), jnp.float32) * 0.05
    # decoder.linear: Linear(I -> H)
    lin_w = jax.random.normal(ks[5], (I, H), jnp.float32) * scale(I)
    lin_b = jax.random.normal(ks[6], (1, H), jnp.float32) * 0.05
    # Decoder LSTM (input H -> hidden I)
    wih_d = jax.random.normal(ks[7], (H, 4 * I), jnp.float32) * scale(H)
    whh_d = jax.random.normal(ks[8], (I, 4 * I), jnp.float32) * scale(I)
    b_d = jnp.zeros((1, 4 * I), jnp.float32)
    return dict(wih_e=wih_e, whh_e=whh_e, b_e=b_e,
                fc_w=fc_w, fc_b=fc_b, lin_w=lin_w, lin_b=lin_b,
                wih_d=wih_d, whh_d=whh_d, b_d=b_d)


if __name__ == "__main__":
    key = jax.random.PRNGKey(0)
    k_x, k_p = jax.random.split(key)

    batch, input_size, hidden_size = 8, 16, 32
    x = jax.random.normal(k_x, (SEQ, batch, input_size), jnp.float32)
    params = init_params(k_p, input_size, hidden_size)

    out, binary = autoencoder_forward(x, params)
    out, binary = jax.block_until_ready((out, binary))

    ref_out, ref_bin = reference_forward(x, params)
    assert out.shape == x.shape and binary.shape == (batch, input_size)
    # Encoder + fc + threshold are f32 in the kernel -> exact {-1,+1} parity.
    assert jnp.allclose(binary, ref_bin, atol=1e-5)
    # Decoder matmuls run in bf16 (f32 accumulate) + weight fusion -> small drift.
    assert jnp.allclose(out, ref_out, atol=5e-2, rtol=5e-2)

    print("KERNEL_OK")
</pallas_src>

<mosaic_0001>
module attributes {stable_mosaic.version = 11 : i64} {
  func.func @autoencoder_kernel(%arg0: memref<160x16xf32, #tpu.memory_space<vmem>>, %arg1: memref<16x128xf32, #tpu.memory_space<vmem>>, %arg2: memref<32x128xf32, #tpu.memory_space<vmem>>, %arg3: memref<1x128xf32, #tpu.memory_space<vmem>>, %arg4: memref<32x16xf32, #tpu.memory_space<vmem>>, %arg5: memref<1x16xf32, #tpu.memory_space<vmem>>, %arg6: memref<16x32xf32, #tpu.memory_space<vmem>>, %arg7: memref<1x32xf32, #tpu.memory_space<vmem>>, %arg8: memref<32x64xf32, #tpu.memory_space<vmem>>, %arg9: memref<16x64xf32, #tpu.memory_space<vmem>>, %arg10: memref<1x64xf32, #tpu.memory_space<vmem>>, %arg11: memref<20x8x16xf32, #tpu.memory_space<vmem>>, %arg12: memref<8x16xf32, #tpu.memory_space<vmem>>, %arg13: memref<160x128xf32, #tpu.memory_space<vmem>>) attributes {dimension_semantics = [], scalar_prefetch = 0 : i64, scratch_operands = 1 : i64, tpu.core_type = #tpu.core_type<tc>} {
    %c0 = arith.constant 0 : index
    %c0_0 = arith.constant 0 : index
    %0 = vector.load %arg0[%c0, %c0_0] : memref<160x16xf32, #tpu.memory_space<vmem>>, vector<160x16xf32>
    %c0_1 = arith.constant 0 : index
    %c0_2 = arith.constant 0 : index
    %1 = vector.load %arg1[%c0_1, %c0_2] : memref<16x128xf32, #tpu.memory_space<vmem>>, vector<16x128xf32>
    %c0_3 = arith.constant 0 : index
    %c0_4 = arith.constant 0 : index
    %2 = vector.load %arg2[%c0_3, %c0_4] : memref<32x128xf32, #tpu.memory_space<vmem>>, vector<32x128xf32>
    %c0_5 = arith.constant 0 : index
    %c0_6 = arith.constant 0 : index
    %3 = vector.load %arg3[%c0_5, %c0_6] : memref<1x128xf32, #tpu.memory_space<vmem>>, vector<1x128xf32>
    %c0_7 = arith.constant 0 : index
    %c0_8 = arith.constant 0 : index
    %4 = vector.load %arg4[%c0_7, %c0_8] : memref<32x16xf32, #tpu.memory_space<vmem>>, vector<32x16xf32>
    %c0_9 = arith.constant 0 : index
    %c0_10 = arith.constant 0 : index
    %5 = vector.load %arg5[%c0_9, %c0_10] : memref<1x16xf32, #tpu.memory_space<vmem>>, vector<1x16xf32>
    %c0_11 = arith.constant 0 : index
    %c0_12 = arith.constant 0 : index
    %6 = vector.load %arg6[%c0_11, %c0_12] : memref<16x32xf32, #tpu.memory_space<vmem>>, vector<16x32xf32>
    %c0_13 = arith.constant 0 : index
    %c0_14 = arith.constant 0 : index
    %7 = vector.load %arg7[%c0_13, %c0_14] : memref<1x32xf32, #tpu.memory_space<vmem>>, vector<1x32xf32>
    %c0_15 = arith.constant 0 : index
    %c0_16 = arith.constant 0 : index
    %8 = vector.load %arg8[%c0_15, %c0_16] : memref<32x64xf32, #tpu.memory_space<vmem>>, vector<32x64xf32>
    %c0_17 = arith.constant 0 : index
    %c0_18 = arith.constant 0 : index
    %9 = vector.load %arg9[%c0_17, %c0_18] : memref<16x64xf32, #tpu.memory_space<vmem>>, vector<16x64xf32>
    %c0_19 = arith.constant 0 : index
    %c0_20 = arith.constant 0 : index
    %10 = vector.load %arg10[%c0_19, %c0_20] : memref<1x64xf32, #tpu.memory_space<vmem>>, vector<1x64xf32>
    %cst = arith.constant dense<0.000000e+00> : vector<160x128xf32>
    %11 = tpu.matmul %0, %1, %cst {dimension_numbers = #tpu.dot_dimension_numbers<[1], [0], [0], [1], [0, 0, 1, 1], [], []>} : vector<160x16xf32>, vector<16x128xf32>, vector<160x128xf32> -> vector<160x128xf32>
    %12 = vector.broadcast %3 : vector<1x128xf32> to vector<160x128xf32>
    %13 = arith.addf %11, %12 : vector<160x128xf32>
    %c0_21 = arith.constant 0 : index
    %c0_22 = arith.constant 0 : index
    %14 = vector.load %arg13[%c0_21, %c0_22] : memref<160x128xf32, #tpu.memory_space<vmem>>, vector<160x128xf32>
    tpu.vector_store %arg13[%c0_21, %c0_22], %13 {strides = array<i32>} : memref<160x128xf32, #tpu.memory_space<vmem>>, vector<160x128xf32>,
    %cst_23 = arith.constant 0.000000e+00 : f32
    %15 = vector.broadcast %cst_23 : f32 to vector<8x32xf32>
    %cst_24 = arith.constant 0.000000e+00 : f32
    %16 = vector.broadcast %cst_24 : f32 to vector<8x32xf32>
    %c0_i32 = arith.constant 0 : i32
    %c8_i32 = arith.constant 8 : i32
    %17 = arith.muli %c0_i32, %c8_i32 : i32
    %18 = tpu.assume_multiple %17, 8 : i32
    %19 = arith.index_cast %18 : i32 to index
    %c0_25 = arith.constant 0 : index
    %20 = vector.load %arg13[%19, %c0_25] : memref<160x128xf32, #tpu.memory_space<vmem>>, vector<8x128xf32>
    %cst_26 = arith.constant dense<0.000000e+00> : vector<8x128xf32>
    %21 = tpu.matmul %15, %2, %cst_26 {dimension_numbers = #tpu.dot_dimension_numbers<[1], [0], [0], [1], [0, 0, 1, 1], [], []>} : vector<8x32xf32>, vector<32x128xf32>, vector<8x128xf32> -> vector<8x128xf32>
    %22 = arith.addf %20, %21 : vector<8x128xf32>
    %23 = arith.negf %22 : vector<8x128xf32>
    %24 = math.exp %23 : vector<8x128xf32>
    %cst_27 = arith.constant 1.000000e+00 : f32
    %25 = vector.broadcast %cst_27 : f32 to vector<8x128xf32>
    %26 = arith.addf %25, %24 : vector<8x128xf32>
    %27 = arith.divf %25, %26 : vector<8x128xf32>
    %28 = math.tanh %22 : vector<8x128xf32>
    %29 = vector.extract_strided_slice %27 {offsets = [0, 32], sizes = [8, 32], strides = [1, 1]} : vector<8x128xf32> to vector<8x32xf32>
    %30 = arith.mulf %29, %16 : vector<8x32xf32>
    %31 = vector.extract_strided_slice %27 {offsets = [0, 0], sizes = [8, 32], strides = [1, 1]} : vector<8x128xf32> to vector<8x32xf32>
    %32 = vector.extract_strided_slice %28 {offsets = [0, 64], sizes = [8, 32], strides = [1, 1]} : vector<8x128xf32> to vector<8x32xf32>
    %33 = arith.mulf %31, %32 : vector<8x32xf32>
    %34 = arith.addf %30, %33 : vector<8x32xf32>
    %35 = vector.extract_strided_slice %27 {offsets = [0, 96], sizes = [8, 32], strides = [1, 1]} : vector<8x128xf32> to vector<8x32xf32>
    %36 = math.tanh %34 : vector<8x32xf32>
    %37 = arith.mulf %35, %36 : vector<8x32xf32>
    %c1_i32 = arith.constant 1 : i32
    %c8_i32_28 = arith.constant 8 : i32
    %38 = arith.muli %c1_i32, %c8_i32_28 : i32
    %39 = tpu.assume_multiple %38, 8 : i32
    %40 = arith.index_cast %39 : i32 to index
    %c0_29 = arith.constant 0 : index
    %41 = vector.load %arg13[%40, %c0_29] : memref<160x128xf32, #tpu.memory_space<vmem>>, vector<8x128xf32>
    %cst_30 = arith.constant dense<0.000000e+00> : vector<8x128xf32>
    %42 = tpu.matmul %37, %2, %cst_30 {dimension_numbers = #tpu.dot_dimension_numbers<[1], [0], [0], [1], [0, 0, 1, 1], [], []>} : vector<8x32xf32>, vector<32x128xf32>, vector<8x128xf32> -> vector<8x128xf32>
    %43 = arith.addf %41, %42 : vector<8x128xf32>
    %44 = arith.negf %43 : vector<8x128xf32>
    %45 = math.exp %44 : vector<8x128xf32>
    %cst_31 = arith.constant 1.000000e+00 : f32
    %46 = vector.broadcast %cst_31 : f32 to vector<8x128xf32>
    %47 = arith.addf %46, %45 : vector<8x128xf32>
    %48 = arith.divf %46, %47 : vector<8x128xf32>
    %49 = math.tanh %43 : vector<8x128xf32>
    %50 = vector.extract_strided_slice %48 {offsets = [0, 32], sizes = [8, 32], strides = [1, 1]} : vector<8x128xf32> to vector<8x32xf32>
    %51 = arith.mulf %50, %34 : vector<8x32xf32>
    %52 = vector.extract_strided_slice %48 {offsets = [0, 0], sizes = [8, 32], strides = [1, 1]} : vector<8x128xf32> to vector<8x32xf32>
    %53 = vector.extract_strided_slice %49 {offsets = [0, 64], sizes = [8, 32], strides = [1, 1]} : vector<8x128xf32> to vector<8x32xf32>
    %54 = arith.mulf %52, %53 : vector<8x32xf32>
    %55 = arith.addf %51, %54 : vector<8x32xf32>
    %56 = vector.extract_strided_slice %48 {offsets = [0, 96], sizes = [8, 32], strides = [1, 1]} : vector<8x128xf32> to vector<8x32xf32>
    %57 = math.tanh %55 : vector<8x32xf32>
    %58 = arith.mulf %56, %57 : vector<8x32xf32>
    %c2_i32 = arith.constant 2 : i32
    %c8_i32_32 = arith.constant 8 : i32
    %59 = arith.muli %c2_i32, %c8_i32_32 : i32
    %60 = tpu.assume_multiple %59, 8 : i32
    %61 = arith.index_cast %60 : i32 to index
    %c0_33 = arith.constant 0 : index
    %62 = vector.load %arg13[%61, %c0_33] : memref<160x128xf32, #tpu.memory_space<vmem>>, vector<8x128xf32>
    %cst_34 = arith.constant dense<0.000000e+00> : vector<8x128xf32>
    %63 = tpu.matmul %58, %2, %cst_34 {dimension_numbers = #tpu.dot_dimension_numbers<[1], [0], [0], [1], [0, 0, 1, 1], [], []>} : vector<8x32xf32>, vector<32x128xf32>, vector<8x128xf32> -> vector<8x128xf32>
    %64 = arith.addf %62, %63 : vector<8x128xf32>
    %65 = arith.negf %64 : vector<8x128xf32>
    %66 = math.exp %65 : vector<8x128xf32>
    %cst_35 = arith.constant 1.000000e+00 : f32
    %67 = vector.broadcast %cst_35 : f32 to vector<8x128xf32>
    %68 = arith.addf %67, %66 : vector<8x128xf32>
    %69 = arith.divf %67, %68 : vector<8x128xf32>
    %70 = math.tanh %64 : vector<8x128xf32>
    %71 = vector.extract_strided_slice %69 {offsets = [0, 32], sizes = [8, 32], strides = [1, 1]} : vector<8x128xf32> to vector<8x32xf32>
    %72 = arith.mulf %71, %55 : vector<8x32xf32>
    %73 = vector.extract_strided_slice %69 {offsets = [0, 0], sizes = [8, 32], strides = [1, 1]} : vector<8x128xf32> to vector<8x32xf32>
    %74 = vector.extract_strided_slice %70 {offsets = [0, 64], sizes = [8, 32], strides = [1, 1]} : vector<8x128xf32> to vector<8x32xf32>
    %75 = arith.mulf %73, %74 : vector<8x32xf32>
    %76 = arith.addf %72, %75 : vector<8x32xf32>
    %77 = vector.extract_strided_slice %69 {offsets = [0, 96], sizes = [8, 32], strides = [1, 1]} : vector<8x128xf32> to vector<8x32xf32>
    %78 = math.tanh %76 : vector<8x32xf32>
    %79 = arith.mulf %77, %78 : vector<8x32xf32>
    %c3_i32 = arith.constant 3 : i32
    %c8_i32_36 = arith.constant 8 : i32
    %80 = arith.muli %c3_i32, %c8_i32_36 : i32
    %81 = tpu.assume_multiple %80, 8 : i32
    %82 = arith.index_cast %81 : i32 to index
    %c0_37 = arith.constant 0 : index
    %83 = vector.load %arg13[%82, %c0_37] : memref<160x128xf32, #tpu.memory_space<vmem>>, vector<8x128xf32>
    %cst_38 = arith.constant dense<0.000000e+00> : vector<8x128xf32>
    %84 = tpu.matmul %79, %2, %cst_38 {dimension_numbers = #tpu.dot_dimension_numbers<[1], [0], [0], [1], [0, 0, 1, 1], [], []>} : vector<8x32xf32>, vector<32x128xf32>, vector<8x128xf32> -> vector<8x128xf32>
    %85 = arith.addf %83, %84 : vector<8x128xf32>
    %86 = arith.negf %85 : vector<8x128xf32>
    %87 = math.exp %86 : vector<8x128xf32>
    %cst_39 = arith.constant 1.000000e+00 : f32
    %88 = vector.broadcast %cst_39 : f32 to vector<8x128xf32>
    %89 = arith.addf %88, %87 : vector<8x128xf32>
    %90 = arith.divf %88, %89 : vector<8x128xf32>
    %91 = math.tanh %85 : vector<8x128xf32>
    %92 = vector.extract_strided_slice %90 {offsets = [0, 32], sizes = [8, 32], strides = [1, 1]} : vector<8x128xf32> to vector<8x32xf32>
    %93 = arith.mulf %92, %76 : vector<8x32xf32>
    %94 = vector.extract_strided_slice %90 {offsets = [0, 0], sizes = [8, 32], strides = [1, 1]} : vector<8x128xf32> to vector<8x32xf32>
    %95 = vector.extract_strided_slice %91 {offsets = [0, 64], sizes = [8, 32], strides = [1, 1]} : vector<8x128xf32> to vector<8x32xf32>
    %96 = arith.mulf %94, %95 : vector<8x32xf32>
    %97 = arith.addf %93, %96 : vector<8x32xf32>
    %98 = vector.extract_strided_slice %90 {offsets = [0, 96], sizes = [8, 32], strides = [1, 1]} : vector<8x128xf32> to vector<8x32xf32>
    %99 = math.tanh %97 : vector<8x32xf32>
    %100 = arith.mulf %98, %99 : vector<8x32xf32>
    %c4_i32 = arith.constant 4 : i32
    %c8_i32_40 = arith.constant 8 : i32
    %101 = arith.muli %c4_i32, %c8_i32_40 : i32
    %102 = tpu.assume_multiple %101, 8 : i32
    %103 = arith.index_cast %102 : i32 to index
    %c0_41 = arith.constant 0 : index
    %104 = vector.load %arg13[%103, %c0_41] : memref<160x128xf32, #tpu.memory_space<vmem>>, vector<8x128xf32>
    %cst_42 = arith.constant dense<0.000000e+00> : vector<8x128xf32>
    %105 = tpu.matmul %100, %2, %cst_42 {dimension_numbers = #tpu.dot_dimension_numbers<[1], [0], [0], [1], [0, 0, 1, 1], [], []>} : vector<8x32xf32>, vector<32x128xf32>, vector<8x128xf32> -> vector<8x128xf32>
    %106 = arith.addf %104, %105 : vector<8x128xf32>
    %107 = arith.negf %106 : vector<8x128xf32>
    %108 = math.exp %107 : vector<8x128xf32>
    %cst_43 = arith.constant 1.000000e+00 : f32
    %109 = vector.broadcast %cst_43 : f32 to vector<8x128xf32>
    %110 = arith.addf %109, %108 : vector<8x128xf32>
    %111 = arith.divf %109, %110 : vector<8x128xf32>
    %112 = math.tanh %106 : vector<8x128xf32>
    %113 = vector.extract_strided_slice %111 {offsets = [0, 32], sizes = [8, 32], strides = [1, 1]} : vector<8x128xf32> to vector<8x32xf32>
    %114 = arith.mulf %113, %97 : vector<8x32xf32>
    %115 = vector.extract_strided_slice %111 {offsets = [0, 0], sizes = [8, 32], strides = [1, 1]} : vector<8x128xf32> to vector<8x32xf32>
    %116 = vector.extract_strided_slice %112 {offsets = [0, 64], sizes = [8, 32], strides = [1, 1]} : vector<8x128xf32> to vector<8x32xf32>
    %117 = arith.mulf %115, %116 : vector<8x32xf32>
    %118 = arith.addf %114, %117 : vector<8x32xf32>
    %119 = vector.extract_strided_slice %111 {offsets = [0, 96], sizes = [8, 32], strides = [1, 1]} : vector<8x128xf32> to vector<8x32xf32>
    %120 = math.tanh %118 : vector<8x32xf32>
    %121 = arith.mulf %119, %120 : vector<8x32xf32>
    %c5_i32 = arith.constant 5 : i32
    %c8_i32_44 = arith.constant 8 : i32
    %122 = arith.muli %c5_i32, %c8_i32_44 : i32
    %123 = tpu.assume_multiple %122, 8 : i32
    %124 = arith.index_cast %123 : i32 to index
    %c0_45 = arith.constant 0 : index
    %125 = vector.load %arg13[%124, %c0_45] : memref<160x128xf32, #tpu.memory_space<vmem>>, vector<8x128xf32>
    %cst_46 = arith.constant dense<0.000000e+00> : vector<8x128xf32>
    %126 = tpu.matmul %121, %2, %cst_46 {dimension_numbers = #tpu.dot_dimension_numbers<[1], [0], [0], [1], [0, 0, 1, 1], [], []>} : vector<8x32xf32>, vector<32x128xf32>, vector<8x128xf32> -> vector<8x128xf32>
    %127 = arith.addf %125, %126 : vector<8x128xf32>
    %128 = arith.negf %127 : vector<8x128xf32>
    %129 = math.exp %128 : vector<8x128xf32>
    %cst_47 = arith.constant 1.000000e+00 : f32
    %130 = vector.broadcast %cst_47 : f32 to vector<8x128xf32>
    %131 = arith.addf %130, %129 : vector<8x128xf32>
    %132 = arith.divf %130, %131 : vector<8x128xf32>
    %133 = math.tanh %127 : vector<8x128xf32>
    %134 = vector.extract_strided_slice %132 {offsets = [0, 32], sizes = [8, 32], strides = [1, 1]} : vector<8x128xf32> to vector<8x32xf32>
    %135 = arith.mulf %134, %118 : vector<8x32xf32>
    %136 = vector.extract_strided_slice %132 {offsets = [0, 0], sizes = [8, 32], strides = [1, 1]} : vector<8x128xf32> to vector<8x32xf32>
    %137 = vector.extract_strided_slice %133 {offsets = [0, 64], sizes = [8, 32], strides = [1, 1]} : vector<8x128xf32> to vector<8x32xf32>
    %138 = arith.mulf %136, %137 : vector<8x32xf32>
    %139 = arith.addf %135, %138 : vector<8x32xf32>
    %140 = vector.extract_strided_slice %132 {offsets = [0, 96], sizes = [8, 32], strides = [1, 1]} : vector<8x128xf32> to vector<8x32xf32>
    %141 = math.tanh %139 : vector<8x32xf32>
    %142 = arith.mulf %140, %141 : vector<8x32xf32>
    %c6_i32 = arith.constant 6 : i32
    %c8_i32_48 = arith.constant 8 : i32
    %143 = arith.muli %c6_i32, %c8_i32_48 : i32
    %144 = tpu.assume_multiple %143, 8 : i32
    %145 = arith.index_cast %144 : i32 to index
    %c0_49 = arith.constant 0 : index
    %146 = vector.load %arg13[%145, %c0_49] : memref<160x128xf32, #tpu.memory_space<vmem>>, vector<8x128xf32>
    %cst_50 = arith.constant dense<0.000000e+00> : vector<8x128xf32>
    %147 = tpu.matmul %142, %2, %cst_50 {dimension_numbers = #tpu.dot_dimension_numbers<[1], [0], [0], [1], [0, 0, 1, 1], [], []>} : vector<8x32xf32>, vector<32x128xf32>, vector<8x128xf32> -> vector<8x128xf32>
    %148 = arith.addf %146, %147 : vector<8x128xf32>
    %149 = arith.negf %148 : vector<8x128xf32>
    %150 = math.exp %149 : vector<8x128xf32>
    %cst_51 = arith.constant 1.000000e+00 : f32
    %151 = vector.broadcast %cst_51 : f32 to vector<8x128xf32>
    %152 = arith.addf %151, %150 : vector<8x128xf32>
    %153 = arith.divf %151, %152 : vector<8x128xf32>
    %154 = math.tanh %148 : vector<8x128xf32>
    %155 = vector.extract_strided_slice %153 {offsets = [0, 32], sizes = [8, 32], strides = [1, 1]} : vector<8x128xf32> to vector<8x32xf32>
    %156 = arith.mulf %155, %139 : vector<8x32xf32>
    %157 = vector.extract_strided_slice %153 {offsets = [0, 0], sizes = [8, 32], strides = [1, 1]} : vector<8x128xf32> to vector<8x32xf32>
    %158 = vector.extract_strided_slice %154 {offsets = [0, 64], sizes = [8, 32], strides = [1, 1]} : vector<8x128xf32> to vector<8x32xf32>
    %159 = arith.mulf %157, %158 : vector<8x32xf32>
    %160 = arith.addf %156, %159 : vector<8x32xf32>
    %161 = vector.extract_strided_slice %153 {offsets = [0, 96], sizes = [8, 32], strides = [1, 1]} : vector<8x128xf32> to vector<8x32xf32>
    %162 = math.tanh %160 : vector<8x32xf32>
    %163 = arith.mulf %161, %162 : vector<8x32xf32>
    %c7_i32 = arith.constant 7 : i32
    %c8_i32_52 = arith.constant 8 : i32
    %164 = arith.muli %c7_i32, %c8_i32_52 : i32
    %165 = tpu.assume_multiple %164, 8 : i32
    %166 = arith.index_cast %165 : i32 to index
    %c0_53 = arith.constant 0 : index
    %167 = vector.load %arg13[%166, %c0_53] : memref<160x128xf32, #tpu.memory_space<vmem>>, vector<8x128xf32>
    %cst_54 = arith.constant dense<0.000000e+00> : vector<8x128xf32>
    %168 = tpu.matmul %163, %2, %cst_54 {dimension_numbers = #tpu.dot_dimension_numbers<[1], [0], [0], [1], [0, 0, 1, 1], [], []>} : vector<8x32xf32>, vector<32x128xf32>, vector<8x128xf32> -> vector<8x128xf32>
    %169 = arith.addf %167, %168 : vector<8x128xf32>
    %170 = arith.negf %169 : vector<8x128xf32>
    %171 = math.exp %170 : vector<8x128xf32>
    %cst_55 = arith.constant 1.000000e+00 : f32
    %172 = vector.broadcast %cst_55 : f32 to vector<8x128xf32>
    %173 = arith.addf %172, %171 : vector<8x128xf32>
    %174 = arith.divf %172, %173 : vector<8x128xf32>
    %175 = math.tanh %169 : vector<8x128xf32>
    %176 = vector.extract_strided_slice %174 {offsets = [0, 32], sizes = [8, 32], strides = [1, 1]} : vector<8x128xf32> to vector<8x32xf32>
    %177 = arith.mulf %176, %160 : vector<8x32xf32>
    %178 = vector.extract_strided_slice %174 {offsets = [0, 0], sizes = [8, 32], strides = [1, 1]} : vector<8x128xf32> to vector<8x32xf32>
    %179 = vector.extract_strided_slice %175 {offsets = [0, 64], sizes = [8, 32], strides = [1, 1]} : vector<8x128xf32> to vector<8x32xf32>
    %180 = arith.mulf %178, %179 : vector<8x32xf32>
    %181 = arith.addf %177, %180 : vector<8x32xf32>
    %182 = vector.extract_strided_slice %174 {offsets = [0, 96], sizes = [8, 32], strides = [1, 1]} : vector<8x128xf32> to vector<8x32xf32>
    %183 = math.tanh %181 : vector<8x32xf32>
    %184 = arith.mulf %182, %183 : vector<8x32xf32>
    %c8_i32_56 = arith.constant 8 : i32
    %c8_i32_57 = arith.constant 8 : i32
    %185 = arith.muli %c8_i32_56, %c8_i32_57 : i32
    %186 = tpu.assume_multiple %185, 8 : i32
    %187 = arith.index_cast %186 : i32 to index
    %c0_58 = arith.constant 0 : index
    %188 = vector.load %arg13[%187, %c0_58] : memref<160x128xf32, #tpu.memory_space<vmem>>, vector<8x128xf32>
    %cst_59 = arith.constant dense<0.000000e+00> : vector<8x128xf32>
    %189 = tpu.matmul %184, %2, %cst_59 {dimension_numbers = #tpu.dot_dimension_numbers<[1], [0], [0], [1], [0, 0, 1, 1], [], []>} : vector<8x32xf32>, vector<32x128xf32>, vector<8x128xf32> -> vector<8x128xf32>
    %190 = arith.addf %188, %189 : vector<8x128xf32>
    %191 = arith.negf %190 : vector<8x128xf32>
    %192 = math.exp %191 : vector<8x128xf32>
    %cst_60 = arith.constant 1.000000e+00 : f32
    %193 = vector.broadcast %cst_60 : f32 to vector<8x128xf32>
    %194 = arith.addf %193, %192 : vector<8x128xf32>
    %195 = arith.divf %193, %194 : vector<8x128xf32>
    %196 = math.tanh %190 : vector<8x128xf32>
    %197 = vector.extract_strided_slice %195 {offsets = [0, 32], sizes = [8, 32], strides = [1, 1]} : vector<8x128xf32> to vector<8x32xf32>
    %198 = arith.mulf %197, %181 : vector<8x32xf32>
    %199 = vector.extract_strided_slice %195 {offsets = [0, 0], sizes = [8, 32], strides = [1, 1]} : vector<8x128xf32> to vector<8x32xf32>
    %200 = vector.extract_strided_slice %196 {offsets = [0, 64], sizes = [8, 32], strides = [1, 1]} : vector<8x128xf32> to vector<8x32xf32>
    %201 = arith.mulf %199, %200 : vector<8x32xf32>
    %202 = arith.addf %198, %201 : vector<8x32xf32>
    %203 = vector.extract_strided_slice %195 {offsets = [0, 96], sizes = [8, 32], strides = [1, 1]} : vector<8x128xf32> to vector<8x32xf32>
    %204 = math.tanh %202 : vector<8x32xf32>
    %205 = arith.mulf %203, %204 : vector<8x32xf32>
    %c9_i32 = arith.constant 9 : i32
    %c8_i32_61 = arith.constant 8 : i32
    %206 = arith.muli %c9_i32, %c8_i32_61 : i32
    %207 = tpu.assume_multiple %206, 8 : i32
    %208 = arith.index_cast %207 : i32 to index
    %c0_62 = arith.constant 0 : index
    %209 = vector.load %arg13[%208, %c0_62] : memref<160x128xf32, #tpu.memory_space<vmem>>, vector<8x128xf32>
    %cst_63 = arith.constant dense<0.000000e+00> : vector<8x128xf32>
    %210 = tpu.matmul %205, %2, %cst_63 {dimension_numbers = #tpu.dot_dimension_numbers<[1], [0], [0], [1], [0, 0, 1, 1], [], []>} : vector<8x32xf32>, vector<32x128xf32>, vector<8x128xf32> -> vector<8x128xf32>
    %211 = arith.addf %209, %210 : vector<8x128xf32>
    %212 = arith.negf %211 : vector<8x128xf32>
    %213 = math.exp %212 : vector<8x128xf32>
    %cst_64 = arith.constant 1.000000e+00 : f32
    %214 = vector.broadcast %cst_64 : f32 to vector<8x128xf32>
    %215 = arith.addf %214, %213 : vector<8x128xf32>
    %216 = arith.divf %214, %215 : vector<8x128xf32>
    %217 = math.tanh %211 : vector<8x128xf32>
    %218 = vector.extract_strided_slice %216 {offsets = [0, 32], sizes = [8, 32], strides = [1, 1]} : vector<8x128xf32> to vector<8x32xf32>
    %219 = arith.mulf %218, %202 : vector<8x32xf32>
    %220 = vector.extract_strided_slice %216 {offsets = [0, 0], sizes = [8, 32], strides = [1, 1]} : vector<8x128xf32> to vector<8x32xf32>
    %221 = vector.extract_strided_slice %217 {offsets = [0, 64], sizes = [8, 32], strides = [1, 1]} : vector<8x128xf32> to vector<8x32xf32>
    %222 = arith.mulf %220, %221 : vector<8x32xf32>
    %223 = arith.addf %219, %222 : vector<8x32xf32>
    %224 = vector.extract_strided_slice %216 {offsets = [0, 96], sizes = [8, 32], strides = [1, 1]} : vector<8x128xf32> to vector<8x32xf32>
    %225 = math.tanh %223 : vector<8x32xf32>
    %226 = arith.mulf %224, %225 : vector<8x32xf32>
    %c10_i32 = arith.constant 10 : i32
    %c8_i32_65 = arith.constant 8 : i32
    %227 = arith.muli %c10_i32, %c8_i32_65 : i32
    %228 = tpu.assume_multiple %227, 8 : i32
    %229 = arith.index_cast %228 : i32 to index
    %c0_66 = arith.constant 0 : index
    %230 = vector.load %arg13[%229, %c0_66] : memref<160x128xf32, #tpu.memory_space<vmem>>, vector<8x128xf32>
    %cst_67 = arith.constant dense<0.000000e+00> : vector<8x128xf32>
    %231 = tpu.matmul %226, %2, %cst_67 {dimension_numbers = #tpu.dot_dimension_numbers<[1], [0], [0], [1], [0, 0, 1, 1], [], []>} : vector<8x32xf32>, vector<32x128xf32>, vector<8x128xf32> -> vector<8x128xf32>
    %232 = arith.addf %230, %231 : vector<8x128xf32>
    %233 = arith.negf %232 : vector<8x128xf32>
    %234 = math.exp %233 : vector<8x128xf32>
    %cst_68 = arith.constant 1.000000e+00 : f32
    %235 = vector.broadcast %cst_68 : f32 to vector<8x128xf32>
    %236 = arith.addf %235, %234 : vector<8x128xf32>
    %237 = arith.divf %235, %236 : vector<8x128xf32>
    %238 = math.tanh %232 : vector<8x128xf32>
    %239 = vector.extract_strided_slice %237 {offsets = [0, 32], sizes = [8, 32], strides = [1, 1]} : vector<8x128xf32> to vector<8x32xf32>
    %240 = arith.mulf %239, %223 : vector<8x32xf32>
    %241 = vector.extract_strided_slice %237 {offsets = [0, 0], sizes = [8, 32], strides = [1, 1]} : vector<8x128xf32> to vector<8x32xf32>
    %242 = vector.extract_strided_slice %238 {offsets = [0, 64], sizes = [8, 32], strides = [1, 1]} : vector<8x128xf32> to vector<8x32xf32>
    %243 = arith.mulf %241, %242 : vector<8x32xf32>
    %244 = arith.addf %240, %243 : vector<8x32xf32>
    %245 = vector.extract_strided_slice %237 {offsets = [0, 96], sizes = [8, 32], strides = [1, 1]} : vector<8x128xf32> to vector<8x32xf32>
    %246 = math.tanh %244 : vector<8x32xf32>
    %247 = arith.mulf %245, %246 : vector<8x32xf32>
    %c11_i32 = arith.constant 11 : i32
    %c8_i32_69 = arith.constant 8 : i32
    %248 = arith.muli %c11_i32, %c8_i32_69 : i32
    %249 = tpu.assume_multiple %248, 8 : i32
    %250 = arith.index_cast %249 : i32 to index
    %c0_70 = arith.constant 0 : index
    %251 = vector.load %arg13[%250, %c0_70] : memref<160x128xf32, #tpu.memory_space<vmem>>, vector<8x128xf32>
    %cst_71 = arith.constant dense<0.000000e+00> : vector<8x128xf32>
    %252 = tpu.matmul %247, %2, %cst_71 {dimension_numbers = #tpu.dot_dimension_numbers<[1], [0], [0], [1], [0, 0, 1, 1], [], []>} : vector<8x32xf32>, vector<32x128xf32>, vector<8x128xf32> -> vector<8x128xf32>
    %253 = arith.addf %251, %252 : vector<8x128xf32>
    %254 = arith.negf %253 : vector<8x128xf32>
    %255 = math.exp %254 : vector<8x128xf32>
    %cst_72 = arith.constant 1.000000e+00 : f32
    %256 = vector.broadcast %cst_72 : f32 to vector<8x128xf32>
    %257 = arith.addf %256, %255 : vector<8x128xf32>
    %258 = arith.divf %256, %257 : vector<8x128xf32>
    %259 = math.tanh %253 : vector<8x128xf32>
    %260 = vector.extract_strided_slice %258 {offsets = [0, 32], sizes = [8, 32], strides = [1, 1]} : vector<8x128xf32> to vector<8x32xf32>
    %261 = arith.mulf %260, %244 : vector<8x32xf32>
    %262 = vector.extract_strided_slice %258 {offsets = [0, 0], sizes = [8, 32], strides = [1, 1]} : vector<8x128xf32> to vector<8x32xf32>
    %263 = vector.extract_strided_slice %259 {offsets = [0, 64], sizes = [8, 32], strides = [1, 1]} : vector<8x128xf32> to vector<8x32xf32>
    %264 = arith.mulf %262, %263 : vector<8x32xf32>
    %265 = arith.addf %261, %264 : vector<8x32xf32>
    %266 = vector.extract_strided_slice %258 {offsets = [0, 96], sizes = [8, 32], strides = [1, 1]} : vector<8x128xf32> to vector<8x32xf32>
    %267 = math.tanh %265 : vector<8x32xf32>
    %268 = arith.mulf %266, %267 : vector<8x32xf32>
    %c12_i32 = arith.constant 12 : i32
    %c8_i32_73 = arith.constant 8 : i32
    %269 = arith.muli %c12_i32, %c8_i32_73 : i32
    %270 = tpu.assume_multiple %269, 8 : i32
    %271 = arith.index_cast %270 : i32 to index
    %c0_74 = arith.constant 0 : index
    %272 = vector.load %arg13[%271, %c0_74] : memref<160x128xf32, #tpu.memory_space<vmem>>, vector<8x128xf32>
    %cst_75 = arith.constant dense<0.000000e+00> : vector<8x128xf32>
    %273 = tpu.matmul %268, %2, %cst_75 {dimension_numbers = #tpu.dot_dimension_numbers<[1], [0], [0], [1], [0, 0, 1, 1], [], []>} : vector<8x32xf32>, vector<32x128xf32>, vector<8x128xf32> -> vector<8x128xf32>
    %274 = arith.addf %272, %273 : vector<8x128xf32>
    %275 = arith.negf %274 : vector<8x128xf32>
    %276 = math.exp %275 : vector<8x128xf32>
    %cst_76 = arith.constant 1.000000e+00 : f32
    %277 = vector.broadcast %cst_76 : f32 to vector<8x128xf32>
    %278 = arith.addf %277, %276 : vector<8x128xf32>
    %279 = arith.divf %277, %278 : vector<8x128xf32>
    %280 = math.tanh %274 : vector<8x128xf32>
    %281 = vector.extract_strided_slice %279 {offsets = [0, 32], sizes = [8, 32], strides = [1, 1]} : vector<8x128xf32> to vector<8x32xf32>
    %282 = arith.mulf %281, %265 : vector<8x32xf32>
    %283 = vector.extract_strided_slice %279 {offsets = [0, 0], sizes = [8, 32], strides = [1, 1]} : vector<8x128xf32> to vector<8x32xf32>
    %284 = vector.extract_strided_slice %280 {offsets = [0, 64], sizes = [8, 32], strides = [1, 1]} : vector<8x128xf32> to vector<8x32xf32>
    %285 = arith.mulf %283, %284 : vector<8x32xf32>
    %286 = arith.addf %282, %285 : vector<8x32xf32>
    %287 = vector.extract_strided_slice %279 {offsets = [0, 96], sizes = [8, 32], strides = [1, 1]} : vector<8x128xf32> to vector<8x32xf32>
    %288 = math.tanh %286 : vector<8x32xf32>
    %289 = arith.mulf %287, %288 : vector<8x32xf32>
    %c13_i32 = arith.constant 13 : i32
    %c8_i32_77 = arith.constant 8 : i32
    %290 = arith.muli %c13_i32, %c8_i32_77 : i32
    %291 = tpu.assume_multiple %290, 8 : i32
    %292 = arith.index_cast %291 : i32 to index
    %c0_78 = arith.constant 0 : index
    %293 = vector.load %arg13[%292, %c0_78] : memref<160x128xf32, #tpu.memory_space<vmem>>, vector<8x128xf32>
    %cst_79 = arith.constant dense<0.000000e+00> : vector<8x128xf32>
    %294 = tpu.matmul %289, %2, %cst_79 {dimension_numbers = #tpu.dot_dimension_numbers<[1], [0], [0], [1], [0, 0, 1, 1], [], []>} : vector<8x32xf32>, vector<32x128xf32>, vector<8x128xf32> -> vector<8x128xf32>
    %295 = arith.addf %293, %294 : vector<8x128xf32>
    %296 = arith.negf %295 : vector<8x128xf32>
    %297 = math.exp %296 : vector<8x128xf32>
    %cst_80 = arith.constant 1.000000e+00 : f32
    %298 = vector.broadcast %cst_80 : f32 to vector<8x128xf32>
    %299 = arith.addf %298, %297 : vector<8x128xf32>
    %300 = arith.divf %298, %299 : vector<8x128xf32>
    %301 = math.tanh %295 : vector<8x128xf32>
    %302 = vector.extract_strided_slice %300 {offsets = [0, 32], sizes = [8, 32], strides = [1, 1]} : vector<8x128xf32> to vector<8x32xf32>
    %303 = arith.mulf %302, %286 : vector<8x32xf32>
    %304 = vector.extract_strided_slice %300 {offsets = [0, 0], sizes = [8, 32], strides = [1, 1]} : vector<8x128xf32> to vector<8x32xf32>
    %305 = vector.extract_strided_slice %301 {offsets = [0, 64], sizes = [8, 32], strides = [1, 1]} : vector<8x128xf32> to vector<8x32xf32>
    %306 = arith.mulf %304, %305 : vector<8x32xf32>
    %307 = arith.addf %303, %306 : vector<8x32xf32>
    %308 = vector.extract_strided_slice %300 {offsets = [0, 96], sizes = [8, 32], strides = [1, 1]} : vector<8x128xf32> to vector<8x32xf32>
    %309 = math.tanh %307 : vector<8x32xf32>
    %310 = arith.mulf %308, %309 : vector<8x32xf32>
    %c14_i32 = arith.constant 14 : i32
    %c8_i32_81 = arith.constant 8 : i32
    %311 = arith.muli %c14_i32, %c8_i32_81 : i32
    %312 = tpu.assume_multiple %311, 8 : i32
    %313 = arith.index_cast %312 : i32 to index
    %c0_82 = arith.constant 0 : index
    %314 = vector.load %arg13[%313, %c0_82] : memref<160x128xf32, #tpu.memory_space<vmem>>, vector<8x128xf32>
    %cst_83 = arith.constant dense<0.000000e+00> : vector<8x128xf32>
    %315 = tpu.matmul %310, %2, %cst_83 {dimension_numbers = #tpu.dot_dimension_numbers<[1], [0], [0], [1], [0, 0, 1, 1], [], []>} : vector<8x32xf32>, vector<32x128xf32>, vector<8x128xf32> -> vector<8x128xf32>
    %316 = arith.addf %314, %315 : vector<8x128xf32>
    %317 = arith.negf %316 : vector<8x128xf32>
    %318 = math.exp %317 : vector<8x128xf32>
    %cst_84 = arith.constant 1.000000e+00 : f32
    %319 = vector.broadcast %cst_84 : f32 to vector<8x128xf32>
    %320 = arith.addf %319, %318 : vector<8x128xf32>
    %321 = arith.divf %319, %320 : vector<8x128xf32>
    %322 = math.tanh %316 : vector<8x128xf32>
    %323 = vector.extract_strided_slice %321 {offsets = [0, 32], sizes = [8, 32], strides = [1, 1]} : vector<8x128xf32> to vector<8x32xf32>
    %324 = arith.mulf %323, %307 : vector<8x32xf32>
    %325 = vector.extract_strided_slice %321 {offsets = [0, 0], sizes = [8, 32], strides = [1, 1]} : vector<8x128xf32> to vector<8x32xf32>
    %326 = vector.extract_strided_slice %322 {offsets = [0, 64], sizes = [8, 32], strides = [1, 1]} : vector<8x128xf32> to vector<8x32xf32>
    %327 = arith.mulf %325, %326 : vector<8x32xf32>
    %328 = arith.addf %324, %327 : vector<8x32xf32>
    %329 = vector.extract_strided_slice %321 {offsets = [0, 96], sizes = [8, 32], strides = [1, 1]} : vector<8x128xf32> to vector<8x32xf32>
    %330 = math.tanh %328 : vector<8x32xf32>
    %331 = arith.mulf %329, %330 : vector<8x32xf32>
    %c15_i32 = arith.constant 15 : i32
    %c8_i32_85 = arith.constant 8 : i32
    %332 = arith.muli %c15_i32, %c8_i32_85 : i32
    %333 = tpu.assume_multiple %332, 8 : i32
    %334 = arith.index_cast %333 : i32 to index
    %c0_86 = arith.constant 0 : index
    %335 = vector.load %arg13[%334, %c0_86] : memref<160x128xf32, #tpu.memory_space<vmem>>, vector<8x128xf32>
    %cst_87 = arith.constant dense<0.000000e+00> : vector<8x128xf32>
    %336 = tpu.matmul %331, %2, %cst_87 {dimension_numbers = #tpu.dot_dimension_numbers<[1], [0], [0], [1], [0, 0, 1, 1], [], []>} : vector<8x32xf32>, vector<32x128xf32>, vector<8x128xf32> -> vector<8x128xf32>
    %337 = arith.addf %335, %336 : vector<8x128xf32>
    %338 = arith.negf %337 : vector<8x128xf32>
    %339 = math.exp %338 : vector<8x128xf32>
    %cst_88 = arith.constant 1.000000e+00 : f32
    %340 = vector.broadcast %cst_88 : f32 to vector<8x128xf32>
    %341 = arith.addf %340, %339 : vector<8x128xf32>
    %342 = arith.divf %340, %341 : vector<8x128xf32>
    %343 = math.tanh %337 : vector<8x128xf32>
    %344 = vector.extract_strided_slice %342 {offsets = [0, 32], sizes = [8, 32], strides = [1, 1]} : vector<8x128xf32> to vector<8x32xf32>
    %345 = arith.mulf %344, %328 : vector<8x32xf32>
    %346 = vector.extract_strided_slice %342 {offsets = [0, 0], sizes = [8, 32], strides = [1, 1]} : vector<8x128xf32> to vector<8x32xf32>
    %347 = vector.extract_strided_slice %343 {offsets = [0, 64], sizes = [8, 32], strides = [1, 1]} : vector<8x128xf32> to vector<8x32xf32>
    %348 = arith.mulf %346, %347 : vector<8x32xf32>
    %349 = arith.addf %345, %348 : vector<8x32xf32>
    %350 = vector.extract_strided_slice %342 {offsets = [0, 96], sizes = [8, 32], strides = [1, 1]} : vector<8x128xf32> to vector<8x32xf32>
    %351 = math.tanh %349 : vector<8x32xf32>
    %352 = arith.mulf %350, %351 : vector<8x32xf32>
    %c16_i32 = arith.constant 16 : i32
    %c8_i32_89 = arith.constant 8 : i32
    %353 = arith.muli %c16_i32, %c8_i32_89 : i32
    %354 = tpu.assume_multiple %353, 8 : i32
    %355 = arith.index_cast %354 : i32 to index
    %c0_90 = arith.constant 0 : index
    %356 = vector.load %arg13[%355, %c0_90] : memref<160x128xf32, #tpu.memory_space<vmem>>, vector<8x128xf32>
    %cst_91 = arith.constant dense<0.000000e+00> : vector<8x128xf32>
    %357 = tpu.matmul %352, %2, %cst_91 {dimension_numbers = #tpu.dot_dimension_numbers<[1], [0], [0], [1], [0, 0, 1, 1], [], []>} : vector<8x32xf32>, vector<32x128xf32>, vector<8x128xf32> -> vector<8x128xf32>
    %358 = arith.addf %356, %357 : vector<8x128xf32>
    %359 = arith.negf %358 : vector<8x128xf32>
    %360 = math.exp %359 : vector<8x128xf32>
    %cst_92 = arith.constant 1.000000e+00 : f32
    %361 = vector.broadcast %cst_92 : f32 to vector<8x128xf32>
    %362 = arith.addf %361, %360 : vector<8x128xf32>
    %363 = arith.divf %361, %362 : vector<8x128xf32>
    %364 = math.tanh %358 : vector<8x128xf32>
    %365 = vector.extract_strided_slice %363 {offsets = [0, 32], sizes = [8, 32], strides = [1, 1]} : vector<8x128xf32> to vector<8x32xf32>
    %366 = arith.mulf %365, %349 : vector<8x32xf32>
    %367 = vector.extract_strided_slice %363 {offsets = [0, 0], sizes = [8, 32], strides = [1, 1]} : vector<8x128xf32> to vector<8x32xf32>
    %368 = vector.extract_strided_slice %364 {offsets = [0, 64], sizes = [8, 32], strides = [1, 1]} : vector<8x128xf32> to vector<8x32xf32>
    %369 = arith.mulf %367, %368 : vector<8x32xf32>
    %370 = arith.addf %366, %369 : vector<8x32xf32>
    %371 = vector.extract_strided_slice %363 {offsets = [0, 96], sizes = [8, 32], strides = [1, 1]} : vector<8x128xf32> to vector<8x32xf32>
    %372 = math.tanh %370 : vector<8x32xf32>
    %373 = arith.mulf %371, %372 : vector<8x32xf32>
    %c17_i32 = arith.constant 17 : i32
    %c8_i32_93 = arith.constant 8 : i32
    %374 = arith.muli %c17_i32, %c8_i32_93 : i32
    %375 = tpu.assume_multiple %374, 8 : i32
    %376 = arith.index_cast %375 : i32 to index
    %c0_94 = arith.constant 0 : index
    %377 = vector.load %arg13[%376, %c0_94] : memref<160x128xf32, #tpu.memory_space<vmem>>, vector<8x128xf32>
    %cst_95 = arith.constant dense<0.000000e+00> : vector<8x128xf32>
    %378 = tpu.matmul %373, %2, %cst_95 {dimension_numbers = #tpu.dot_dimension_numbers<[1], [0], [0], [1], [0, 0, 1, 1], [], []>} : vector<8x32xf32>, vector<32x128xf32>, vector<8x128xf32> -> vector<8x128xf32>
    %379 = arith.addf %377, %378 : vector<8x128xf32>
    %380 = arith.negf %379 : vector<8x128xf32>
    %381 = math.exp %380 : vector<8x128xf32>
    %cst_96 = arith.constant 1.000000e+00 : f32
    %382 = vector.broadcast %cst_96 : f32 to vector<8x128xf32>
    %383 = arith.addf %382, %381 : vector<8x128xf32>
    %384 = arith.divf %382, %383 : vector<8x128xf32>
    %385 = math.tanh %379 : vector<8x128xf32>
    %386 = vector.extract_strided_slice %384 {offsets = [0, 32], sizes = [8, 32], strides = [1, 1]} : vector<8x128xf32> to vector<8x32xf32>
    %387 = arith.mulf %386, %370 : vector<8x32xf32>
    %388 = vector.extract_strided_slice %384 {offsets = [0, 0], sizes = [8, 32], strides = [1, 1]} : vector<8x128xf32> to vector<8x32xf32>
    %389 = vector.extract_strided_slice %385 {offsets = [0, 64], sizes = [8, 32], strides = [1, 1]} : vector<8x128xf32> to vector<8x32xf32>
    %390 = arith.mulf %388, %389 : vector<8x32xf32>
    %391 = arith.addf %387, %390 : vector<8x32xf32>
    %392 = vector.extract_strided_slice %384 {offsets = [0, 96], sizes = [8, 32], strides = [1, 1]} : vector<8x128xf32> to vector<8x32xf32>
    %393 = math.tanh %391 : vector<8x32xf32>
    %394 = arith.mulf %392, %393 : vector<8x32xf32>
    %c18_i32 = arith.constant 18 : i32
    %c8_i32_97 = arith.constant 8 : i32
    %395 = arith.muli %c18_i32, %c8_i32_97 : i32
    %396 = tpu.assume_multiple %395, 8 : i32
    %397 = arith.index_cast %396 : i32 to index
    %c0_98 = arith.constant 0 : index
    %398 = vector.load %arg13[%397, %c0_98] : memref<160x128xf32, #tpu.memory_space<vmem>>, vector<8x128xf32>
    %cst_99 = arith.constant dense<0.000000e+00> : vector<8x128xf32>
    %399 = tpu.matmul %394, %2, %cst_99 {dimension_numbers = #tpu.dot_dimension_numbers<[1], [0], [0], [1], [0, 0, 1, 1], [], []>} : vector<8x32xf32>, vector<32x128xf32>, vector<8x128xf32> -> vector<8x128xf32>
    %400 = arith.addf %398, %399 : vector<8x128xf32>
    %401 = arith.negf %400 : vector<8x128xf32>
    %402 = math.exp %401 : vector<8x128xf32>
    %cst_100 = arith.constant 1.000000e+00 : f32
    %403 = vector.broadcast %cst_100 : f32 to vector<8x128xf32>
    %404 = arith.addf %403, %402 : vector<8x128xf32>
    %405 = arith.divf %403, %404 : vector<8x128xf32>
    %406 = math.tanh %400 : vector<8x128xf32>
    %407 = vector.extract_strided_slice %405 {offsets = [0, 32], sizes = [8, 32], strides = [1, 1]} : vector<8x128xf32> to vector<8x32xf32>
    %408 = arith.mulf %407, %391 : vector<8x32xf32>
    %409 = vector.extract_strided_slice %405 {offsets = [0, 0], sizes = [8, 32], strides = [1, 1]} : vector<8x128xf32> to vector<8x32xf32>
    %410 = vector.extract_strided_slice %406 {offsets = [0, 64], sizes = [8, 32], strides = [1, 1]} : vector<8x128xf32> to vector<8x32xf32>
    %411 = arith.mulf %409, %410 : vector<8x32xf32>
    %412 = arith.addf %408, %411 : vector<8x32xf32>
    %413 = vector.extract_strided_slice %405 {offsets = [0, 96], sizes = [8, 32], strides = [1, 1]} : vector<8x128xf32> to vector<8x32xf32>
    %414 = math.tanh %412 : vector<8x32xf32>
    %415 = arith.mulf %413, %414 : vector<8x32xf32>
    %c19_i32 = arith.constant 19 : i32
    %c8_i32_101 = arith.constant 8 : i32
    %416 = arith.muli %c19_i32, %c8_i32_101 : i32
    %417 = tpu.assume_multiple %416, 8 : i32
    %418 = arith.index_cast %417 : i32 to index
    %c0_102 = arith.constant 0 : index
    %419 = vector.load %arg13[%418, %c0_102] : memref<160x128xf32, #tpu.memory_space<vmem>>, vector<8x128xf32>
    %cst_103 = arith.constant dense<0.000000e+00> : vector<8x128xf32>
    %420 = tpu.matmul %415, %2, %cst_103 {dimension_numbers = #tpu.dot_dimension_numbers<[1], [0], [0], [1], [0, 0, 1, 1], [], []>} : vector<8x32xf32>, vector<32x128xf32>, vector<8x128xf32> -> vector<8x128xf32>
    %421 = arith.addf %419, %420 : vector<8x128xf32>
    %422 = arith.negf %421 : vector<8x128xf32>
    %423 = math.exp %422 : vector<8x128xf32>
    %cst_104 = arith.constant 1.000000e+00 : f32
    %424 = vector.broadcast %cst_104 : f32 to vector<8x128xf32>
    %425 = arith.addf %424, %423 : vector<8x128xf32>
    %426 = arith.divf %424, %425 : vector<8x128xf32>
    %427 = math.tanh %421 : vector<8x128xf32>
    %428 = vector.extract_strided_slice %426 {offsets = [0, 32], sizes = [8, 32], strides = [1, 1]} : vector<8x128xf32> to vector<8x32xf32>
    %429 = arith.mulf %428, %412 : vector<8x32xf32>
    %430 = vector.extract_strided_slice %426 {offsets = [0, 0], sizes = [8, 32], strides = [1, 1]} : vector<8x128xf32> to vector<8x32xf32>
    %431 = vector.extract_strided_slice %427 {offsets = [0, 64], sizes = [8, 32], strides = [1, 1]} : vector<8x128xf32> to vector<8x32xf32>
    %432 = arith.mulf %430, %431 : vector<8x32xf32>
    %433 = arith.addf %429, %432 : vector<8x32xf32>
    %434 = vector.extract_strided_slice %426 {offsets = [0, 96], sizes = [8, 32], strides = [1, 1]} : vector<8x128xf32> to vector<8x32xf32>
    %435 = math.tanh %433 : vector<8x32xf32>
    %436 = arith.mulf %434, %435 : vector<8x32xf32>
    %c20_i32 = arith.constant 20 : i32
    %437 = tpu.concatenate %436, %433 in 0 : vector<8x32xf32>, vector<8x32xf32> -> vector<16x32xf32>
    %cst_105 = arith.constant dense<0.000000e+00> : vector<16x16xf32>
    %438 = tpu.matmul %437, %4, %cst_105 {dimension_numbers = #tpu.dot_dimension_numbers<[1], [0], [0], [1], [0, 0, 1, 1], [], []>} : vector<16x32xf32>, vector<32x16xf32>, vector<16x16xf32> -> vector<16x16xf32>
    %439 = vector.broadcast %5 : vector<1x16xf32> to vector<16x16xf32>
    %440 = arith.addf %438, %439 : vector<16x16xf32>
    %441 = vector.extract_strided_slice %440 {offsets = [0, 0], sizes = [8, 16], strides = [1, 1]} : vector<16x16xf32> to vector<8x16xf32>
    %442 = vector.extract_strided_slice %440 {offsets = [8, 0], sizes = [8, 16], strides = [1, 1]} : vector<16x16xf32> to vector<8x16xf32>
    %cst_106 = arith.constant 1.000000e+00 : f32
    %443 = vector.broadcast %cst_106 : f32 to vector<8x16xf32>
    %444 = arith.addf %441, %443 : vector<8x16xf32>
    %cst_107 = arith.constant 5.000000e-01 : f32
    %445 = vector.broadcast %cst_107 : f32 to vector<8x16xf32>
    %446 = arith.mulf %444, %445 : vector<8x16xf32>
    %cst_108 = arith.constant 0.000000e+00 : f32
    %cst_109 = arith.constant 1.000000e+00 : f32
    %447 = vector.broadcast %cst_108 : f32 to vector<8x16xf32>
    %448 = arith.maximumf %447, %446 : vector<8x16xf32>
    %449 = vector.broadcast %cst_109 : f32 to vector<8x16xf32>
    %450 = arith.minimumf %449, %448 : vector<8x16xf32>
    %451 = math.roundeven %450 : vector<8x16xf32>
    %cst_110 = arith.constant 2.000000e+00 : f32
    %452 = vector.broadcast %cst_110 : f32 to vector<8x16xf32>
    %453 = arith.mulf %452, %451 : vector<8x16xf32>
    %cst_111 = arith.constant 1.000000e+00 : f32
    %454 = vector.broadcast %cst_111 : f32 to vector<8x16xf32>
    %455 = arith.subf %453, %454 : vector<8x16xf32>
    %c0_112 = arith.constant 0 : index
    %c0_113 = arith.constant 0 : index
    %456 = vector.load %arg12[%c0_112, %c0_113] : memref<8x16xf32, #tpu.memory_space<vmem>>, vector<8x16xf32>
    tpu.vector_store %arg12[%c0_112, %c0_113], %455 {strides = array<i32>} : memref<8x16xf32, #tpu.memory_space<vmem>>, vector<8x16xf32>,
    %cst_114 = arith.constant dense<0.000000e+00> : vector<16x64xf32>
    %457 = tpu.matmul %6, %8, %cst_114 {dimension_numbers = #tpu.dot_dimension_numbers<[1], [0], [0], [1], [0, 0, 1, 1], [], []>} : vector<16x32xf32>, vector<32x64xf32>, vector<16x64xf32> -> vector<16x64xf32>
    %458 = arith.addf %457, %9 : vector<16x64xf32>
    %459 = arith.truncf %458 : vector<16x64xf32> to vector<16x64xbf16>
    %cst_115 = arith.constant dense<0.000000e+00> : vector<1x64xf32>
    %460 = tpu.matmul %7, %8, %cst_115 {dimension_numbers = #tpu.dot_dimension_numbers<[1], [0], [0], [1], [0, 0, 1, 1], [], []>} : vector<1x32xf32>, vector<32x64xf32>, vector<1x64xf32> -> vector<1x64xf32>
    %461 = arith.addf %460, %10 : vector<1x64xf32>
    %462 = vector.shape_cast %461 : vector<1x64xf32> to vector<1x64xf32>
    %463 = vector.broadcast %462 : vector<1x64xf32> to vector<8x64xf32>
    %464 = arith.truncf %8 : vector<32x64xf32> to vector<32x64xbf16>
    %465 = arith.truncf %9 : vector<16x64xf32> to vector<16x64xbf16>
    %466 = arith.truncf %6 : vector<16x32xf32> to vector<16x32xbf16>
    %467 = arith.truncf %455 : vector<8x16xf32> to vector<8x16xbf16>
    %cst_116 = arith.constant dense<0.000000e+00> : vector<8x32xf32>
    %468 = tpu.matmul %467, %466, %cst_116 {dimension_numbers = #tpu.dot_dimension_numbers<[1], [0], [0], [1], [0, 0, 1, 1], [], []>} : vector<8x16xbf16>, vector<16x32xbf16>, vector<8x32xf32> -> vector<8x32xf32>
    %469 = vector.broadcast %7 : vector<1x32xf32> to vector<8x32xf32>
    %470 = arith.addf %468, %469 : vector<8x32xf32>
    %471 = arith.truncf %470 : vector<8x32xf32> to vector<8x32xbf16>
    %cst_117 = arith.constant dense<0.000000e+00> : vector<8x64xf32>
    %472 = tpu.matmul %471, %464, %cst_117 {dimension_numbers = #tpu.dot_dimension_numbers<[1], [0], [0], [1], [0, 0, 1, 1], [], []>} : vector<8x32xbf16>, vector<32x64xbf16>, vector<8x64xf32> -> vector<8x64xf32>
    %473 = arith.truncf %441 : vector<8x16xf32> to vector<8x16xbf16>
    %cst_118 = arith.constant dense<0.000000e+00> : vector<8x64xf32>
    %474 = tpu.matmul %473, %465, %cst_118 {dimension_numbers = #tpu.dot_dimension_numbers<[1], [0], [0], [1], [0, 0, 1, 1], [], []>} : vector<8x16xbf16>, vector<16x64xbf16>, vector<8x64xf32> -> vector<8x64xf32>
    %475 = arith.addf %472, %474 : vector<8x64xf32>
    %476 = vector.broadcast %10 : vector<1x64xf32> to vector<8x64xf32>
    %477 = arith.addf %475, %476 : vector<8x64xf32>
    %478 = arith.negf %477 : vector<8x64xf32>
    %479 = math.exp %478 : vector<8x64xf32>
    %cst_119 = arith.constant 1.000000e+00 : f32
    %480 = vector.broadcast %cst_119 : f32 to vector<8x64xf32>
    %481 = arith.addf %480, %479 : vector<8x64xf32>
    %482 = arith.divf %480, %481 : vector<8x64xf32>
    %483 = math.tanh %477 : vector<8x64xf32>
    %484 = vector.extract_strided_slice %482 {offsets = [0, 16], sizes = [8, 16], strides = [1, 1]} : vector<8x64xf32> to vector<8x16xf32>
    %485 = arith.mulf %484, %442 : vector<8x16xf32>
    %486 = vector.extract_strided_slice %482 {offsets = [0, 0], sizes = [8, 16], strides = [1, 1]} : vector<8x64xf32> to vector<8x16xf32>
    %487 = vector.extract_strided_slice %483 {offsets = [0, 32], sizes = [8, 16], strides = [1, 1]} : vector<8x64xf32> to vector<8x16xf32>
    %488 = arith.mulf %486, %487 : vector<8x16xf32>
    %489 = arith.addf %485, %488 : vector<8x16xf32>
    %490 = vector.extract_strided_slice %482 {offsets = [0, 48], sizes = [8, 16], strides = [1, 1]} : vector<8x64xf32> to vector<8x16xf32>
    %491 = math.tanh %489 : vector<8x16xf32>
    %492 = arith.mulf %490, %491 : vector<8x16xf32>
    %c19 = arith.constant 19 : index
    %c0_120 = arith.constant 0 : index
    %c0_121 = arith.constant 0 : index
    %493 = vector.load %arg11[%c19, %c0_120, %c0_121] : memref<20x8x16xf32, #tpu.memory_space<vmem>>, vector<1x8x16xf32>
    %494 = vector.shape_cast %493 : vector<1x8x16xf32> to vector<8x16xf32>
    %495 = vector.shape_cast %492 : vector<8x16xf32> to vector<1x8x16xf32>
    tpu.vector_store %arg11[%c19, %c0_120, %c0_121], %495 {strides = array<i32>} : memref<20x8x16xf32, #tpu.memory_space<vmem>>, vector<1x8x16xf32>,
    %c1_i32_122 = arith.constant 1 : i32
    %496 = arith.truncf %492 : vector<8x16xf32> to vector<8x16xbf16>
    %cst_123 = arith.constant dense<0.000000e+00> : vector<8x64xf32>
    %497 = tpu.matmul %496, %459, %cst_123 {dimension_numbers = #tpu.dot_dimension_numbers<[1], [0], [0], [1], [0, 0, 1, 1], [], []>} : vector<8x16xbf16>, vector<16x64xbf16>, vector<8x64xf32> -> vector<8x64xf32>
    %498 = arith.addf %497, %463 : vector<8x64xf32>
    %499 = arith.negf %498 : vector<8x64xf32>
    %500 = math.exp %499 : vector<8x64xf32>
    %cst_124 = arith.constant 1.000000e+00 : f32
    %501 = vector.broadcast %cst_124 : f32 to vector<8x64xf32>
    %502 = arith.addf %501, %500 : vector<8x64xf32>
    %503 = arith.divf %501, %502 : vector<8x64xf32>
    %504 = math.tanh %498 : vector<8x64xf32>
    %505 = vector.extract_strided_slice %503 {offsets = [0, 16], sizes = [8, 16], strides = [1, 1]} : vector<8x64xf32> to vector<8x16xf32>
    %506 = arith.mulf %505, %489 : vector<8x16xf32>
    %507 = vector.extract_strided_slice %503 {offsets = [0, 0], sizes = [8, 16], strides = [1, 1]} : vector<8x64xf32> to vector<8x16xf32>
    %508 = vector.extract_strided_slice %504 {offsets = [0, 32], sizes = [8, 16], strides = [1, 1]} : vector<8x64xf32> to vector<8x16xf32>
    %509 = arith.mulf %507, %508 : vector<8x16xf32>
    %510 = arith.addf %506, %509 : vector<8x16xf32>
    %511 = vector.extract_strided_slice %503 {offsets = [0, 48], sizes = [8, 16], strides = [1, 1]} : vector<8x64xf32> to vector<8x16xf32>
    %512 = math.tanh %510 : vector<8x16xf32>
    %513 = arith.mulf %511, %512 : vector<8x16xf32>
    %c19_i32_125 = arith.constant 19 : i32
    %514 = arith.subi %c19_i32_125, %c1_i32_122 : i32
    %515 = arith.index_cast %514 : i32 to index
    %c0_126 = arith.constant 0 : index
    %c0_127 = arith.constant 0 : index
    %516 = vector.load %arg11[%515, %c0_126, %c0_127] : memref<20x8x16xf32, #tpu.memory_space<vmem>>, vector<1x8x16xf32>
    %517 = vector.shape_cast %516 : vector<1x8x16xf32> to vector<8x16xf32>
    %518 = vector.shape_cast %513 : vector<8x16xf32> to vector<1x8x16xf32>
    tpu.vector_store %arg11[%515, %c0_126, %c0_127], %518 {strides = array<i32>} : memref<20x8x16xf32, #tpu.memory_space<vmem>>, vector<1x8x16xf32>,
    %c2_i32_128 = arith.constant 2 : i32
    %519 = arith.truncf %513 : vector<8x16xf32> to vector<8x16xbf16>
    %cst_129 = arith.constant dense<0.000000e+00> : vector<8x64xf32>
    %520 = tpu.matmul %519, %459, %cst_129 {dimension_numbers = #tpu.dot_dimension_numbers<[1], [0], [0], [1], [0, 0, 1, 1], [], []>} : vector<8x16xbf16>, vector<16x64xbf16>, vector<8x64xf32> -> vector<8x64xf32>
    %521 = arith.addf %520, %463 : vector<8x64xf32>
    %522 = arith.negf %521 : vector<8x64xf32>
    %523 = math.exp %522 : vector<8x64xf32>
    %cst_130 = arith.constant 1.000000e+00 : f32
    %524 = vector.broadcast %cst_130 : f32 to vector<8x64xf32>
    %525 = arith.addf %524, %523 : vector<8x64xf32>
    %526 = arith.divf %524, %525 : vector<8x64xf32>
    %527 = math.tanh %521 : vector<8x64xf32>
    %528 = vector.extract_strided_slice %526 {offsets = [0, 16], sizes = [8, 16], strides = [1, 1]} : vector<8x64xf32> to vector<8x16xf32>
    %529 = arith.mulf %528, %510 : vector<8x16xf32>
    %530 = vector.extract_strided_slice %526 {offsets = [0, 0], sizes = [8, 16], strides = [1, 1]} : vector<8x64xf32> to vector<8x16xf32>
    %531 = vector.extract_strided_slice %527 {offsets = [0, 32], sizes = [8, 16], strides = [1, 1]} : vector<8x64xf32> to vector<8x16xf32>
    %532 = arith.mulf %530, %531 : vector<8x16xf32>
    %533 = arith.addf %529, %532 : vector<8x16xf32>
    %534 = vector.extract_strided_slice %526 {offsets = [0, 48], sizes = [8, 16], strides = [1, 1]} : vector<8x64xf32> to vector<8x16xf32>
    %535 = math.tanh %533 : vector<8x16xf32>
    %536 = arith.mulf %534, %535 : vector<8x16xf32>
    %c19_i32_131 = arith.constant 19 : i32
    %537 = arith.subi %c19_i32_131, %c2_i32_128 : i32
    %538 = arith.index_cast %537 : i32 to index
    %c0_132 = arith.constant 0 : index
    %c0_133 = arith.constant 0 : index
    %539 = vector.load %arg11[%538, %c0_132, %c0_133] : memref<20x8x16xf32, #tpu.memory_space<vmem>>, vector<1x8x16xf32>
    %540 = vector.shape_cast %539 : vector<1x8x16xf32> to vector<8x16xf32>
    %541 = vector.shape_cast %536 : vector<8x16xf32> to vector<1x8x16xf32>
    tpu.vector_store %arg11[%538, %c0_132, %c0_133], %541 {strides = array<i32>} : memref<20x8x16xf32, #tpu.memory_space<vmem>>, vector<1x8x16xf32>,
    %c3_i32_134 = arith.constant 3 : i32
    %542 = arith.truncf %536 : vector<8x16xf32> to vector<8x16xbf16>
    %cst_135 = arith.constant dense<0.000000e+00> : vector<8x64xf32>
    %543 = tpu.matmul %542, %459, %cst_135 {dimension_numbers = #tpu.dot_dimension_numbers<[1], [0], [0], [1], [0, 0, 1, 1], [], []>} : vector<8x16xbf16>, vector<16x64xbf16>, vector<8x64xf32> -> vector<8x64xf32>
    %544 = arith.addf %543, %463 : vector<8x64xf32>
    %545 = arith.negf %544 : vector<8x64xf32>
    %546 = math.exp %545 : vector<8x64xf32>
    %cst_136 = arith.constant 1.000000e+00 : f32
    %547 = vector.broadcast %cst_136 : f32 to vector<8x64xf32>
    %548 = arith.addf %547, %546 : vector<8x64xf32>
    %549 = arith.divf %547, %548 : vector<8x64xf32>
    %550 = math.tanh %544 : vector<8x64xf32>
    %551 = vector.extract_strided_slice %549 {offsets = [0, 16], sizes = [8, 16], strides = [1, 1]} : vector<8x64xf32> to vector<8x16xf32>
    %552 = arith.mulf %551, %533 : vector<8x16xf32>
    %553 = vector.extract_strided_slice %549 {offsets = [0, 0], sizes = [8, 16], strides = [1, 1]} : vector<8x64xf32> to vector<8x16xf32>
    %554 = vector.extract_strided_slice %550 {offsets = [0, 32], sizes = [8, 16], strides = [1, 1]} : vector<8x64xf32> to vector<8x16xf32>
    %555 = arith.mulf %553, %554 : vector<8x16xf32>
    %556 = arith.addf %552, %555 : vector<8x16xf32>
    %557 = vector.extract_strided_slice %549 {offsets = [0, 48], sizes = [8, 16], strides = [1, 1]} : vector<8x64xf32> to vector<8x16xf32>
    %558 = math.tanh %556 : vector<8x16xf32>
    %559 = arith.mulf %557, %558 : vector<8x16xf32>
    %c19_i32_137 = arith.constant 19 : i32
    %560 = arith.subi %c19_i32_137, %c3_i32_134 : i32
    %561 = arith.index_cast %560 : i32 to index
    %c0_138 = arith.constant 0 : index
    %c0_139 = arith.constant 0 : index
    %562 = vector.load %arg11[%561, %c0_138, %c0_139] : memref<20x8x16xf32, #tpu.memory_space<vmem>>, vector<1x8x16xf32>
    %563 = vector.shape_cast %562 : vector<1x8x16xf32> to vector<8x16xf32>
    %564 = vector.shape_cast %559 : vector<8x16xf32> to vector<1x8x16xf32>
    tpu.vector_store %arg11[%561, %c0_138, %c0_139], %564 {strides = array<i32>} : memref<20x8x16xf32, #tpu.memory_space<vmem>>, vector<1x8x16xf32>,
    %c4_i32_140 = arith.constant 4 : i32
    %565 = arith.truncf %559 : vector<8x16xf32> to vector<8x16xbf16>
    %cst_141 = arith.constant dense<0.000000e+00> : vector<8x64xf32>
    %566 = tpu.matmul %565, %459, %cst_141 {dimension_numbers = #tpu.dot_dimension_numbers<[1], [0], [0], [1], [0, 0, 1, 1], [], []>} : vector<8x16xbf16>, vector<16x64xbf16>, vector<8x64xf32> -> vector<8x64xf32>
    %567 = arith.addf %566, %463 : vector<8x64xf32>
    %568 = arith.negf %567 : vector<8x64xf32>
    %569 = math.exp %568 : vector<8x64xf32>
    %cst_142 = arith.constant 1.000000e+00 : f32
    %570 = vector.broadcast %cst_142 : f32 to vector<8x64xf32>
    %571 = arith.addf %570, %569 : vector<8x64xf32>
    %572 = arith.divf %570, %571 : vector<8x64xf32>
    %573 = math.tanh %567 : vector<8x64xf32>
    %574 = vector.extract_strided_slice %572 {offsets = [0, 16], sizes = [8, 16], strides = [1, 1]} : vector<8x64xf32> to vector<8x16xf32>
    %575 = arith.mulf %574, %556 : vector<8x16xf32>
    %576 = vector.extract_strided_slice %572 {offsets = [0, 0], sizes = [8, 16], strides = [1, 1]} : vector<8x64xf32> to vector<8x16xf32>
    %577 = vector.extract_strided_slice %573 {offsets = [0, 32], sizes = [8, 16], strides = [1, 1]} : vector<8x64xf32> to vector<8x16xf32>
    %578 = arith.mulf %576, %577 : vector<8x16xf32>
    %579 = arith.addf %575, %578 : vector<8x16xf32>
    %580 = vector.extract_strided_slice %572 {offsets = [0, 48], sizes = [8, 16], strides = [1, 1]} : vector<8x64xf32> to vector<8x16xf32>
    %581 = math.tanh %579 : vector<8x16xf32>
    %582 = arith.mulf %580, %581 : vector<8x16xf32>
    %c19_i32_143 = arith.constant 19 : i32
    %583 = arith.subi %c19_i32_143, %c4_i32_140 : i32
    %584 = arith.index_cast %583 : i32 to index
    %c0_144 = arith.constant 0 : index
    %c0_145 = arith.constant 0 : index
    %585 = vector.load %arg11[%584, %c0_144, %c0_145] : memref<20x8x16xf32, #tpu.memory_space<vmem>>, vector<1x8x16xf32>
    %586 = vector.shape_cast %585 : vector<1x8x16xf32> to vector<8x16xf32>
    %587 = vector.shape_cast %582 : vector<8x16xf32> to vector<1x8x16xf32>
    tpu.vector_store %arg11[%584, %c0_144, %c0_145], %587 {strides = array<i32>} : memref<20x8x16xf32, #tpu.memory_space<vmem>>, vector<1x8x16xf32>,
    %c5_i32_146 = arith.constant 5 : i32
    %588 = arith.truncf %582 : vector<8x16xf32> to vector<8x16xbf16>
    %cst_147 = arith.constant dense<0.000000e+00> : vector<8x64xf32>
    %589 = tpu.matmul %588, %459, %cst_147 {dimension_numbers = #tpu.dot_dimension_numbers<[1], [0], [0], [1], [0, 0, 1, 1], [], []>} : vector<8x16xbf16>, vector<16x64xbf16>, vector<8x64xf32> -> vector<8x64xf32>
    %590 = arith.addf %589, %463 : vector<8x64xf32>
    %591 = arith.negf %590 : vector<8x64xf32>
    %592 = math.exp %591 : vector<8x64xf32>
    %cst_148 = arith.constant 1.000000e+00 : f32
    %593 = vector.broadcast %cst_148 : f32 to vector<8x64xf32>
    %594 = arith.addf %593, %592 : vector<8x64xf32>
    %595 = arith.divf %593, %594 : vector<8x64xf32>
    %596 = math.tanh %590 : vector<8x64xf32>
    %597 = vector.extract_strided_slice %595 {offsets = [0, 16], sizes = [8, 16], strides = [1, 1]} : vector<8x64xf32> to vector<8x16xf32>
    %598 = arith.mulf %597, %579 : vector<8x16xf32>
    %599 = vector.extract_strided_slice %595 {offsets = [0, 0], sizes = [8, 16], strides = [1, 1]} : vector<8x64xf32> to vector<8x16xf32>
    %600 = vector.extract_strided_slice %596 {offsets = [0, 32], sizes = [8, 16], strides = [1, 1]} : vector<8x64xf32> to vector<8x16xf32>
    %601 = arith.mulf %599, %600 : vector<8x16xf32>
    %602 = arith.addf %598, %601 : vector<8x16xf32>
    %603 = vector.extract_strided_slice %595 {offsets = [0, 48], sizes = [8, 16], strides = [1, 1]} : vector<8x64xf32> to vector<8x16xf32>
    %604 = math.tanh %602 : vector<8x16xf32>
    %605 = arith.mulf %603, %604 : vector<8x16xf32>
    %c19_i32_149 = arith.constant 19 : i32
    %606 = arith.subi %c19_i32_149, %c5_i32_146 : i32
    %607 = arith.index_cast %606 : i32 to index
    %c0_150 = arith.constant 0 : index
    %c0_151 = arith.constant 0 : index
    %608 = vector.load %arg11[%607, %c0_150, %c0_151] : memref<20x8x16xf32, #tpu.memory_space<vmem>>, vector<1x8x16xf32>
    %609 = vector.shape_cast %608 : vector<1x8x16xf32> to vector<8x16xf32>
    %610 = vector.shape_cast %605 : vector<8x16xf32> to vector<1x8x16xf32>
    tpu.vector_store %arg11[%607, %c0_150, %c0_151], %610 {strides = array<i32>} : memref<20x8x16xf32, #tpu.memory_space<vmem>>, vector<1x8x16xf32>,
    %c6_i32_152 = arith.constant 6 : i32
    %611 = arith.truncf %605 : vector<8x16xf32> to vector<8x16xbf16>
    %cst_153 = arith.constant dense<0.000000e+00> : vector<8x64xf32>
    %612 = tpu.matmul %611, %459, %cst_153 {dimension_numbers = #tpu.dot_dimension_numbers<[1], [0], [0], [1], [0, 0, 1, 1], [], []>} : vector<8x16xbf16>, vector<16x64xbf16>, vector<8x64xf32> -> vector<8x64xf32>
    %613 = arith.addf %612, %463 : vector<8x64xf32>
    %614 = arith.negf %613 : vector<8x64xf32>
    %615 = math.exp %614 : vector<8x64xf32>
    %cst_154 = arith.constant 1.000000e+00 : f32
    %616 = vector.broadcast %cst_154 : f32 to vector<8x64xf32>
    %617 = arith.addf %616, %615 : vector<8x64xf32>
    %618 = arith.divf %616, %617 : vector<8x64xf32>
    %619 = math.tanh %613 : vector<8x64xf32>
    %620 = vector.extract_strided_slice %618 {offsets = [0, 16], sizes = [8, 16], strides = [1, 1]} : vector<8x64xf32> to vector<8x16xf32>
    %621 = arith.mulf %620, %602 : vector<8x16xf32>
    %622 = vector.extract_strided_slice %618 {offsets = [0, 0], sizes = [8, 16], strides = [1, 1]} : vector<8x64xf32> to vector<8x16xf32>
    %623 = vector.extract_strided_slice %619 {offsets = [0, 32], sizes = [8, 16], strides = [1, 1]} : vector<8x64xf32> to vector<8x16xf32>
    %624 = arith.mulf %622, %623 : vector<8x16xf32>
    %625 = arith.addf %621, %624 : vector<8x16xf32>
    %626 = vector.extract_strided_slice %618 {offsets = [0, 48], sizes = [8, 16], strides = [1, 1]} : vector<8x64xf32> to vector<8x16xf32>
    %627 = math.tanh %625 : vector<8x16xf32>
    %628 = arith.mulf %626, %627 : vector<8x16xf32>
    %c19_i32_155 = arith.constant 19 : i32
    %629 = arith.subi %c19_i32_155, %c6_i32_152 : i32
    %630 = arith.index_cast %629 : i32 to index
    %c0_156 = arith.constant 0 : index
    %c0_157 = arith.constant 0 : index
    %631 = vector.load %arg11[%630, %c0_156, %c0_157] : memref<20x8x16xf32, #tpu.memory_space<vmem>>, vector<1x8x16xf32>
    %632 = vector.shape_cast %631 : vector<1x8x16xf32> to vector<8x16xf32>
    %633 = vector.shape_cast %628 : vector<8x16xf32> to vector<1x8x16xf32>
    tpu.vector_store %arg11[%630, %c0_156, %c0_157], %633 {strides = array<i32>} : memref<20x8x16xf32, #tpu.memory_space<vmem>>, vector<1x8x16xf32>,
    %c7_i32_158 = arith.constant 7 : i32
    %634 = arith.truncf %628 : vector<8x16xf32> to vector<8x16xbf16>
    %cst_159 = arith.constant dense<0.000000e+00> : vector<8x64xf32>
    %635 = tpu.matmul %634, %459, %cst_159 {dimension_numbers = #tpu.dot_dimension_numbers<[1], [0], [0], [1], [0, 0, 1, 1], [], []>} : vector<8x16xbf16>, vector<16x64xbf16>, vector<8x64xf32> -> vector<8x64xf32>
    %636 = arith.addf %635, %463 : vector<8x64xf32>
    %637 = arith.negf %636 : vector<8x64xf32>
    %638 = math.exp %637 : vector<8x64xf32>
    %cst_160 = arith.constant 1.000000e+00 : f32
    %639 = vector.broadcast %cst_160 : f32 to vector<8x64xf32>
    %640 = arith.addf %639, %638 : vector<8x64xf32>
    %641 = arith.divf %639, %640 : vector<8x64xf32>
    %642 = math.tanh %636 : vector<8x64xf32>
    %643 = vector.extract_strided_slice %641 {offsets = [0, 16], sizes = [8, 16], strides = [1, 1]} : vector<8x64xf32> to vector<8x16xf32>
    %644 = arith.mulf %643, %625 : vector<8x16xf32>
    %645 = vector.extract_strided_slice %641 {offsets = [0, 0], sizes = [8, 16], strides = [1, 1]} : vector<8x64xf32> to vector<8x16xf32>
    %646 = vector.extract_strided_slice %642 {offsets = [0, 32], sizes = [8, 16], strides = [1, 1]} : vector<8x64xf32> to vector<8x16xf32>
    %647 = arith.mulf %645, %646 : vector<8x16xf32>
    %648 = arith.addf %644, %647 : vector<8x16xf32>
    %649 = vector.extract_strided_slice %641 {offsets = [0, 48], sizes = [8, 16], strides = [1, 1]} : vector<8x64xf32> to vector<8x16xf32>
    %650 = math.tanh %648 : vector<8x16xf32>
    %651 = arith.mulf %649, %650 : vector<8x16xf32>
    %c19_i32_161 = arith.constant 19 : i32
    %652 = arith.subi %c19_i32_161, %c7_i32_158 : i32
    %653 = arith.index_cast %652 : i32 to index
    %c0_162 = arith.constant 0 : index
    %c0_163 = arith.constant 0 : index
    %654 = vector.load %arg11[%653, %c0_162, %c0_163] : memref<20x8x16xf32, #tpu.memory_space<vmem>>, vector<1x8x16xf32>
    %655 = vector.shape_cast %654 : vector<1x8x16xf32> to vector<8x16xf32>
    %656 = vector.shape_cast %651 : vector<8x16xf32> to vector<1x8x16xf32>
    tpu.vector_store %arg11[%653, %c0_162, %c0_163], %656 {strides = array<i32>} : memref<20x8x16xf32, #tpu.memory_space<vmem>>, vector<1x8x16xf32>,
    %c8_i32_164 = arith.constant 8 : i32
    %657 = arith.truncf %651 : vector<8x16xf32> to vector<8x16xbf16>
    %cst_165 = arith.constant dense<0.000000e+00> : vector<8x64xf32>
    %658 = tpu.matmul %657, %459, %cst_165 {dimension_numbers = #tpu.dot_dimension_numbers<[1], [0], [0], [1], [0, 0, 1, 1], [], []>} : vector<8x16xbf16>, vector<16x64xbf16>, vector<8x64xf32> -> vector<8x64xf32>
    %659 = arith.addf %658, %463 : vector<8x64xf32>
    %660 = arith.negf %659 : vector<8x64xf32>
    %661 = math.exp %660 : vector<8x64xf32>
    %cst_166 = arith.constant 1.000000e+00 : f32
    %662 = vector.broadcast %cst_166 : f32 to vector<8x64xf32>
    %663 = arith.addf %662, %661 : vector<8x64xf32>
    %664 = arith.divf %662, %663 : vector<8x64xf32>
    %665 = math.tanh %659 : vector<8x64xf32>
    %666 = vector.extract_strided_slice %664 {offsets = [0, 16], sizes = [8, 16], strides = [1, 1]} : vector<8x64xf32> to vector<8x16xf32>
    %667 = arith.mulf %666, %648 : vector<8x16xf32>
    %668 = vector.extract_strided_slice %664 {offsets = [0, 0], sizes = [8, 16], strides = [1, 1]} : vector<8x64xf32> to vector<8x16xf32>
    %669 = vector.extract_strided_slice %665 {offsets = [0, 32], sizes = [8, 16], strides = [1, 1]} : vector<8x64xf32> to vector<8x16xf32>
    %670 = arith.mulf %668, %669 : vector<8x16xf32>
    %671 = arith.addf %667, %670 : vector<8x16xf32>
    %672 = vector.extract_strided_slice %664 {offsets = [0, 48], sizes = [8, 16], strides = [1, 1]} : vector<8x64xf32> to vector<8x16xf32>
    %673 = math.tanh %671 : vector<8x16xf32>
    %674 = arith.mulf %672, %673 : vector<8x16xf32>
    %c19_i32_167 = arith.constant 19 : i32
    %675 = arith.subi %c19_i32_167, %c8_i32_164 : i32
    %676 = arith.index_cast %675 : i32 to index
    %c0_168 = arith.constant 0 : index
    %c0_169 = arith.constant 0 : index
    %677 = vector.load %arg11[%676, %c0_168, %c0_169] : memref<20x8x16xf32, #tpu.memory_space<vmem>>, vector<1x8x16xf32>
    %678 = vector.shape_cast %677 : vector<1x8x16xf32> to vector<8x16xf32>
    %679 = vector.shape_cast %674 : vector<8x16xf32> to vector<1x8x16xf32>
    tpu.vector_store %arg11[%676, %c0_168, %c0_169], %679 {strides = array<i32>} : memref<20x8x16xf32, #tpu.memory_space<vmem>>, vector<1x8x16xf32>,
    %c9_i32_170 = arith.constant 9 : i32
    %680 = arith.truncf %674 : vector<8x16xf32> to vector<8x16xbf16>
    %cst_171 = arith.constant dense<0.000000e+00> : vector<8x64xf32>
    %681 = tpu.matmul %680, %459, %cst_171 {dimension_numbers = #tpu.dot_dimension_numbers<[1], [0], [0], [1], [0, 0, 1, 1], [], []>} : vector<8x16xbf16>, vector<16x64xbf16>, vector<8x64xf32> -> vector<8x64xf32>
    %682 = arith.addf %681, %463 : vector<8x64xf32>
    %683 = arith.negf %682 : vector<8x64xf32>
    %684 = math.exp %683 : vector<8x64xf32>
    %cst_172 = arith.constant 1.000000e+00 : f32
    %685 = vector.broadcast %cst_172 : f32 to vector<8x64xf32>
    %686 = arith.addf %685, %684 : vector<8x64xf32>
    %687 = arith.divf %685, %686 : vector<8x64xf32>
    %688 = math.tanh %682 : vector<8x64xf32>
    %689 = vector.extract_strided_slice %687 {offsets = [0, 16], sizes = [8, 16], strides = [1, 1]} : vector<8x64xf32> to vector<8x16xf32>
    %690 = arith.mulf %689, %671 : vector<8x16xf32>
    %691 = vector.extract_strided_slice %687 {offsets = [0, 0], sizes = [8, 16], strides = [1, 1]} : vector<8x64xf32> to vector<8x16xf32>
    %692 = vector.extract_strided_slice %688 {offsets = [0, 32], sizes = [8, 16], strides = [1, 1]} : vector<8x64xf32> to vector<8x16xf32>
    %693 = arith.mulf %691, %692 : vector<8x16xf32>
    %694 = arith.addf %690, %693 : vector<8x16xf32>
    %695 = vector.extract_strided_slice %687 {offsets = [0, 48], sizes = [8, 16], strides = [1, 1]} : vector<8x64xf32> to vector<8x16xf32>
    %696 = math.tanh %694 : vector<8x16xf32>
    %697 = arith.mulf %695, %696 : vector<8x16xf32>
    %c19_i32_173 = arith.constant 19 : i32
    %698 = arith.subi %c19_i32_173, %c9_i32_170 : i32
    %699 = arith.index_cast %698 : i32 to index
    %c0_174 = arith.constant 0 : index
    %c0_175 = arith.constant 0 : index
    %700 = vector.load %arg11[%699, %c0_174, %c0_175] : memref<20x8x16xf32, #tpu.memory_space<vmem>>, vector<1x8x16xf32>
    %701 = vector.shape_cast %700 : vector<1x8x16xf32> to vector<8x16xf32>
    %702 = vector.shape_cast %697 : vector<8x16xf32> to vector<1x8x16xf32>
    tpu.vector_store %arg11[%699, %c0_174, %c0_175], %702 {strides = array<i32>} : memref<20x8x16xf32, #tpu.memory_space<vmem>>, vector<1x8x16xf32>,
    %c10_i32_176 = arith.constant 10 : i32
    %703 = arith.truncf %697 : vector<8x16xf32> to vector<8x16xbf16>
    %cst_177 = arith.constant dense<0.000000e+00> : vector<8x64xf32>
    %704 = tpu.matmul %703, %459, %cst_177 {dimension_numbers = #tpu.dot_dimension_numbers<[1], [0], [0], [1], [0, 0, 1, 1], [], []>} : vector<8x16xbf16>, vector<16x64xbf16>, vector<8x64xf32> -> vector<8x64xf32>
    %705 = arith.addf %704, %463 : vector<8x64xf32>
    %706 = arith.negf %705 : vector<8x64xf32>
    %707 = math.exp %706 : vector<8x64xf32>
    %cst_178 = arith.constant 1.000000e+00 : f32
    %708 = vector.broadcast %cst_178 : f32 to vector<8x64xf32>
    %709 = arith.addf %708, %707 : vector<8x64xf32>
    %710 = arith.divf %708, %709 : vector<8x64xf32>
    %711 = math.tanh %705 : vector<8x64xf32>
    %712 = vector.extract_strided_slice %710 {offsets = [0, 16], sizes = [8, 16], strides = [1, 1]} : vector<8x64xf32> to vector<8x16xf32>
    %713 = arith.mulf %712, %694 : vector<8x16xf32>
    %714 = vector.extract_strided_slice %710 {offsets = [0, 0], sizes = [8, 16], strides = [1, 1]} : vector<8x64xf32> to vector<8x16xf32>
    %715 = vector.extract_strided_slice %711 {offsets = [0, 32], sizes = [8, 16], strides = [1, 1]} : vector<8x64xf32> to vector<8x16xf32>
    %716 = arith.mulf %714, %715 : vector<8x16xf32>
    %717 = arith.addf %713, %716 : vector<8x16xf32>
    %718 = vector.extract_strided_slice %710 {offsets = [0, 48], sizes = [8, 16], strides = [1, 1]} : vector<8x64xf32> to vector<8x16xf32>
    %719 = math.tanh %717 : vector<8x16xf32>
    %720 = arith.mulf %718, %719 : vector<8x16xf32>
    %c19_i32_179 = arith.constant 19 : i32
    %721 = arith.subi %c19_i32_179, %c10_i32_176 : i32
    %722 = arith.index_cast %721 : i32 to index
    %c0_180 = arith.constant 0 : index
    %c0_181 = arith.constant 0 : index
    %723 = vector.load %arg11[%722, %c0_180, %c0_181] : memref<20x8x16xf32, #tpu.memory_space<vmem>>, vector<1x8x16xf32>
    %724 = vector.shape_cast %723 : vector<1x8x16xf32> to vector<8x16xf32>
    %725 = vector.shape_cast %720 : vector<8x16xf32> to vector<1x8x16xf32>
    tpu.vector_store %arg11[%722, %c0_180, %c0_181], %725 {strides = array<i32>} : memref<20x8x16xf32, #tpu.memory_space<vmem>>, vector<1x8x16xf32>,
    %c11_i32_182 = arith.constant 11 : i32
    %726 = arith.truncf %720 : vector<8x16xf32> to vector<8x16xbf16>
    %cst_183 = arith.constant dense<0.000000e+00> : vector<8x64xf32>
    %727 = tpu.matmul %726, %459, %cst_183 {dimension_numbers = #tpu.dot_dimension_numbers<[1], [0], [0], [1], [0, 0, 1, 1], [], []>} : vector<8x16xbf16>, vector<16x64xbf16>, vector<8x64xf32> -> vector<8x64xf32>
    %728 = arith.addf %727, %463 : vector<8x64xf32>
    %729 = arith.negf %728 : vector<8x64xf32>
    %730 = math.exp %729 : vector<8x64xf32>
    %cst_184 = arith.constant 1.000000e+00 : f32
    %731 = vector.broadcast %cst_184 : f32 to vector<8x64xf32>
    %732 = arith.addf %731, %730 : vector<8x64xf32>
    %733 = arith.divf %731, %732 : vector<8x64xf32>
    %734 = math.tanh %728 : vector<8x64xf32>
    %735 = vector.extract_strided_slice %733 {offsets = [0, 16], sizes = [8, 16], strides = [1, 1]} : vector<8x64xf32> to vector<8x16xf32>
    %736 = arith.mulf %735, %717 : vector<8x16xf32>
    %737 = vector.extract_strided_slice %733 {offsets = [0, 0], sizes = [8, 16], strides = [1, 1]} : vector<8x64xf32> to vector<8x16xf32>
    %738 = vector.extract_strided_slice %734 {offsets = [0, 32], sizes = [8, 16], strides = [1, 1]} : vector<8x64xf32> to vector<8x16xf32>
    %739 = arith.mulf %737, %738 : vector<8x16xf32>
    %740 = arith.addf %736, %739 : vector<8x16xf32>
    %741 = vector.extract_strided_slice %733 {offsets = [0, 48], sizes = [8, 16], strides = [1, 1]} : vector<8x64xf32> to vector<8x16xf32>
    %742 = math.tanh %740 : vector<8x16xf32>
    %743 = arith.mulf %741, %742 : vector<8x16xf32>
    %c19_i32_185 = arith.constant 19 : i32
    %744 = arith.subi %c19_i32_185, %c11_i32_182 : i32
    %745 = arith.index_cast %744 : i32 to index
    %c0_186 = arith.constant 0 : index
    %c0_187 = arith.constant 0 : index
    %746 = vector.load %arg11[%745, %c0_186, %c0_187] : memref<20x8x16xf32, #tpu.memory_space<vmem>>, vector<1x8x16xf32>
    %747 = vector.shape_cast %746 : vector<1x8x16xf32> to vector<8x16xf32>
    %748 = vector.shape_cast %743 : vector<8x16xf32> to vector<1x8x16xf32>
    tpu.vector_store %arg11[%745, %c0_186, %c0_187], %748 {strides = array<i32>} : memref<20x8x16xf32, #tpu.memory_space<vmem>>, vector<1x8x16xf32>,
    %c12_i32_188 = arith.constant 12 : i32
    %749 = arith.truncf %743 : vector<8x16xf32> to vector<8x16xbf16>
    %cst_189 = arith.constant dense<0.000000e+00> : vector<8x64xf32>
    %750 = tpu.matmul %749, %459, %cst_189 {dimension_numbers = #tpu.dot_dimension_numbers<[1], [0], [0], [1], [0, 0, 1, 1], [], []>} : vector<8x16xbf16>, vector<16x64xbf16>, vector<8x64xf32> -> vector<8x64xf32>
    %751 = arith.addf %750, %463 : vector<8x64xf32>
    %752 = arith.negf %751 : vector<8x64xf32>
    %753 = math.exp %752 : vector<8x64xf32>
    %cst_190 = arith.constant 1.000000e+00 : f32
    %754 = vector.broadcast %cst_190 : f32 to vector<8x64xf32>
    %755 = arith.addf %754, %753 : vector<8x64xf32>
    %756 = arith.divf %754, %755 : vector<8x64xf32>
    %757 = math.tanh %751 : vector<8x64xf32>
    %758 = vector.extract_strided_slice %756 {offsets = [0, 16], sizes = [8, 16], strides = [1, 1]} : vector<8x64xf32> to vector<8x16xf32>
    %759 = arith.mulf %758, %740 : vector<8x16xf32>
    %760 = vector.extract_strided_slice %756 {offsets = [0, 0], sizes = [8, 16], strides = [1, 1]} : vector<8x64xf32> to vector<8x16xf32>
    %761 = vector.extract_strided_slice %757 {offsets = [0, 32], sizes = [8, 16], strides = [1, 1]} : vector<8x64xf32> to vector<8x16xf32>
    %762 = arith.mulf %760, %761 : vector<8x16xf32>
    %763 = arith.addf %759, %762 : vector<8x16xf32>
    %764 = vector.extract_strided_slice %756 {offsets = [0, 48], sizes = [8, 16], strides = [1, 1]} : vector<8x64xf32> to vector<8x16xf32>
    %765 = math.tanh %763 : vector<8x16xf32>
    %766 = arith.mulf %764, %765 : vector<8x16xf32>
    %c19_i32_191 = arith.constant 19 : i32
    %767 = arith.subi %c19_i32_191, %c12_i32_188 : i32
    %768 = arith.index_cast %767 : i32 to index
    %c0_192 = arith.constant 0 : index
    %c0_193 = arith.constant 0 : index
    %769 = vector.load %arg11[%768, %c0_192, %c0_193] : memref<20x8x16xf32, #tpu.memory_space<vmem>>, vector<1x8x16xf32>
    %770 = vector.shape_cast %769 : vector<1x8x16xf32> to vector<8x16xf32>
    %771 = vector.shape_cast %766 : vector<8x16xf32> to vector<1x8x16xf32>
    tpu.vector_store %arg11[%768, %c0_192, %c0_193], %771 {strides = array<i32>} : memref<20x8x16xf32, #tpu.memory_space<vmem>>, vector<1x8x16xf32>,
    %c13_i32_194 = arith.constant 13 : i32
    %772 = arith.truncf %766 : vector<8x16xf32> to vector<8x16xbf16>
    %cst_195 = arith.constant dense<0.000000e+00> : vector<8x64xf32>
    %773 = tpu.matmul %772, %459, %cst_195 {dimension_numbers = #tpu.dot_dimension_numbers<[1], [0], [0], [1], [0, 0, 1, 1], [], []>} : vector<8x16xbf16>, vector<16x64xbf16>, vector<8x64xf32> -> vector<8x64xf32>
    %774 = arith.addf %773, %463 : vector<8x64xf32>
    %775 = arith.negf %774 : vector<8x64xf32>
    %776 = math.exp %775 : vector<8x64xf32>
    %cst_196 = arith.constant 1.000000e+00 : f32
    %777 = vector.broadcast %cst_196 : f32 to vector<8x64xf32>
    %778 = arith.addf %777, %776 : vector<8x64xf32>
    %779 = arith.divf %777, %778 : vector<8x64xf32>
    %780 = math.tanh %774 : vector<8x64xf32>
    %781 = vector.extract_strided_slice %779 {offsets = [0, 16], sizes = [8, 16], strides = [1, 1]} : vector<8x64xf32> to vector<8x16xf32>
    %782 = arith.mulf %781, %763 : vector<8x16xf32>
    %783 = vector.extract_strided_slice %779 {offsets = [0, 0], sizes = [8, 16], strides = [1, 1]} : vector<8x64xf32> to vector<8x16xf32>
    %784 = vector.extract_strided_slice %780 {offsets = [0, 32], sizes = [8, 16], strides = [1, 1]} : vector<8x64xf32> to vector<8x16xf32>
    %785 = arith.mulf %783, %784 : vector<8x16xf32>
    %786 = arith.addf %782, %785 : vector<8x16xf32>
    %787 = vector.extract_strided_slice %779 {offsets = [0, 48], sizes = [8, 16], strides = [1, 1]} : vector<8x64xf32> to vector<8x16xf32>
    %788 = math.tanh %786 : vector<8x16xf32>
    %789 = arith.mulf %787, %788 : vector<8x16xf32>
    %c19_i32_197 = arith.constant 19 : i32
    %790 = arith.subi %c19_i32_197, %c13_i32_194 : i32
    %791 = arith.index_cast %790 : i32 to index
    %c0_198 = arith.constant 0 : index
    %c0_199 = arith.constant 0 : index
    %792 = vector.load %arg11[%791, %c0_198, %c0_199] : memref<20x8x16xf32, #tpu.memory_space<vmem>>, vector<1x8x16xf32>
    %793 = vector.shape_cast %792 : vector<1x8x16xf32> to vector<8x16xf32>
    %794 = vector.shape_cast %789 : vector<8x16xf32> to vector<1x8x16xf32>
    tpu.vector_store %arg11[%791, %c0_198, %c0_199], %794 {strides = array<i32>} : memref<20x8x16xf32, #tpu.memory_space<vmem>>, vector<1x8x16xf32>,
    %c14_i32_200 = arith.constant 14 : i32
    %795 = arith.truncf %789 : vector<8x16xf32> to vector<8x16xbf16>
    %cst_201 = arith.constant dense<0.000000e+00> : vector<8x64xf32>
    %796 = tpu.matmul %795, %459, %cst_201 {dimension_numbers = #tpu.dot_dimension_numbers<[1], [0], [0], [1], [0, 0, 1, 1], [], []>} : vector<8x16xbf16>, vector<16x64xbf16>, vector<8x64xf32> -> vector<8x64xf32>
    %797 = arith.addf %796, %463 : vector<8x64xf32>
    %798 = arith.negf %797 : vector<8x64xf32>
    %799 = math.exp %798 : vector<8x64xf32>
    %cst_202 = arith.constant 1.000000e+00 : f32
    %800 = vector.broadcast %cst_202 : f32 to vector<8x64xf32>
    %801 = arith.addf %800, %799 : vector<8x64xf32>
    %802 = arith.divf %800, %801 : vector<8x64xf32>
    %803 = math.tanh %797 : vector<8x64xf32>
    %804 = vector.extract_strided_slice %802 {offsets = [0, 16], sizes = [8, 16], strides = [1, 1]} : vector<8x64xf32> to vector<8x16xf32>
    %805 = arith.mulf %804, %786 : vector<8x16xf32>
    %806 = vector.extract_strided_slice %802 {offsets = [0, 0], sizes = [8, 16], strides = [1, 1]} : vector<8x64xf32> to vector<8x16xf32>
    %807 = vector.extract_strided_slice %803 {offsets = [0, 32], sizes = [8, 16], strides = [1, 1]} : vector<8x64xf32> to vector<8x16xf32>
    %808 = arith.mulf %806, %807 : vector<8x16xf32>
    %809 = arith.addf %805, %808 : vector<8x16xf32>
    %810 = vector.extract_strided_slice %802 {offsets = [0, 48], sizes = [8, 16], strides = [1, 1]} : vector<8x64xf32> to vector<8x16xf32>
    %811 = math.tanh %809 : vector<8x16xf32>
    %812 = arith.mulf %810, %811 : vector<8x16xf32>
    %c19_i32_203 = arith.constant 19 : i32
    %813 = arith.subi %c19_i32_203, %c14_i32_200 : i32
    %814 = arith.index_cast %813 : i32 to index
    %c0_204 = arith.constant 0 : index
    %c0_205 = arith.constant 0 : index
    %815 = vector.load %arg11[%814, %c0_204, %c0_205] : memref<20x8x16xf32, #tpu.memory_space<vmem>>, vector<1x8x16xf32>
    %816 = vector.shape_cast %815 : vector<1x8x16xf32> to vector<8x16xf32>
    %817 = vector.shape_cast %812 : vector<8x16xf32> to vector<1x8x16xf32>
    tpu.vector_store %arg11[%814, %c0_204, %c0_205], %817 {strides = array<i32>} : memref<20x8x16xf32, #tpu.memory_space<vmem>>, vector<1x8x16xf32>,
    %c15_i32_206 = arith.constant 15 : i32
    %818 = arith.truncf %812 : vector<8x16xf32> to vector<8x16xbf16>
    %cst_207 = arith.constant dense<0.000000e+00> : vector<8x64xf32>
    %819 = tpu.matmul %818, %459, %cst_207 {dimension_numbers = #tpu.dot_dimension_numbers<[1], [0], [0], [1], [0, 0, 1, 1], [], []>} : vector<8x16xbf16>, vector<16x64xbf16>, vector<8x64xf32> -> vector<8x64xf32>
    %820 = arith.addf %819, %463 : vector<8x64xf32>
    %821 = arith.negf %820 : vector<8x64xf32>
    %822 = math.exp %821 : vector<8x64xf32>
    %cst_208 = arith.constant 1.000000e+00 : f32
    %823 = vector.broadcast %cst_208 : f32 to vector<8x64xf32>
    %824 = arith.addf %823, %822 : vector<8x64xf32>
    %825 = arith.divf %823, %824 : vector<8x64xf32>
    %826 = math.tanh %820 : vector<8x64xf32>
    %827 = vector.extract_strided_slice %825 {offsets = [0, 16], sizes = [8, 16], strides = [1, 1]} : vector<8x64xf32> to vector<8x16xf32>
    %828 = arith.mulf %827, %809 : vector<8x16xf32>
    %829 = vector.extract_strided_slice %825 {offsets = [0, 0], sizes = [8, 16], strides = [1, 1]} : vector<8x64xf32> to vector<8x16xf32>
    %830 = vector.extract_strided_slice %826 {offsets = [0, 32], sizes = [8, 16], strides = [1, 1]} : vector<8x64xf32> to vector<8x16xf32>
    %831 = arith.mulf %829, %830 : vector<8x16xf32>
    %832 = arith.addf %828, %831 : vector<8x16xf32>
    %833 = vector.extract_strided_slice %825 {offsets = [0, 48], sizes = [8, 16], strides = [1, 1]} : vector<8x64xf32> to vector<8x16xf32>
    %834 = math.tanh %832 : vector<8x16xf32>
    %835 = arith.mulf %833, %834 : vector<8x16xf32>
    %c19_i32_209 = arith.constant 19 : i32
    %836 = arith.subi %c19_i32_209, %c15_i32_206 : i32
    %837 = arith.index_cast %836 : i32 to index
    %c0_210 = arith.constant 0 : index
    %c0_211 = arith.constant 0 : index
    %838 = vector.load %arg11[%837, %c0_210, %c0_211] : memref<20x8x16xf32, #tpu.memory_space<vmem>>, vector<1x8x16xf32>
    %839 = vector.shape_cast %838 : vector<1x8x16xf32> to vector<8x16xf32>
    %840 = vector.shape_cast %835 : vector<8x16xf32> to vector<1x8x16xf32>
    tpu.vector_store %arg11[%837, %c0_210, %c0_211], %840 {strides = array<i32>} : memref<20x8x16xf32, #tpu.memory_space<vmem>>, vector<1x8x16xf32>,
    %c16_i32_212 = arith.constant 16 : i32
    %841 = arith.truncf %835 : vector<8x16xf32> to vector<8x16xbf16>
    %cst_213 = arith.constant dense<0.000000e+00> : vector<8x64xf32>
    %842 = tpu.matmul %841, %459, %cst_213 {dimension_numbers = #tpu.dot_dimension_numbers<[1], [0], [0], [1], [0, 0, 1, 1], [], []>} : vector<8x16xbf16>, vector<16x64xbf16>, vector<8x64xf32> -> vector<8x64xf32>
    %843 = arith.addf %842, %463 : vector<8x64xf32>
    %844 = arith.negf %843 : vector<8x64xf32>
    %845 = math.exp %844 : vector<8x64xf32>
    %cst_214 = arith.constant 1.000000e+00 : f32
    %846 = vector.broadcast %cst_214 : f32 to vector<8x64xf32>
    %847 = arith.addf %846, %845 : vector<8x64xf32>
    %848 = arith.divf %846, %847 : vector<8x64xf32>
    %849 = math.tanh %843 : vector<8x64xf32>
    %850 = vector.extract_strided_slice %848 {offsets = [0, 16], sizes = [8, 16], strides = [1, 1]} : vector<8x64xf32> to vector<8x16xf32>
    %851 = arith.mulf %850, %832 : vector<8x16xf32>
    %852 = vector.extract_strided_slice %848 {offsets = [0, 0], sizes = [8, 16], strides = [1, 1]} : vector<8x64xf32> to vector<8x16xf32>
    %853 = vector.extract_strided_slice %849 {offsets = [0, 32], sizes = [8, 16], strides = [1, 1]} : vector<8x64xf32> to vector<8x16xf32>
    %854 = arith.mulf %852, %853 : vector<8x16xf32>
    %855 = arith.addf %851, %854 : vector<8x16xf32>
    %856 = vector.extract_strided_slice %848 {offsets = [0, 48], sizes = [8, 16], strides = [1, 1]} : vector<8x64xf32> to vector<8x16xf32>
    %857 = math.tanh %855 : vector<8x16xf32>
    %858 = arith.mulf %856, %857 : vector<8x16xf32>
    %c19_i32_215 = arith.constant 19 : i32
    %859 = arith.subi %c19_i32_215, %c16_i32_212 : i32
    %860 = arith.index_cast %859 : i32 to index
    %c0_216 = arith.constant 0 : index
    %c0_217 = arith.constant 0 : index
    %861 = vector.load %arg11[%860, %c0_216, %c0_217] : memref<20x8x16xf32, #tpu.memory_space<vmem>>, vector<1x8x16xf32>
    %862 = vector.shape_cast %861 : vector<1x8x16xf32> to vector<8x16xf32>
    %863 = vector.shape_cast %858 : vector<8x16xf32> to vector<1x8x16xf32>
    tpu.vector_store %arg11[%860, %c0_216, %c0_217], %863 {strides = array<i32>} : memref<20x8x16xf32, #tpu.memory_space<vmem>>, vector<1x8x16xf32>,
    %c17_i32_218 = arith.constant 17 : i32
    %864 = arith.truncf %858 : vector<8x16xf32> to vector<8x16xbf16>
    %cst_219 = arith.constant dense<0.000000e+00> : vector<8x64xf32>
    %865 = tpu.matmul %864, %459, %cst_219 {dimension_numbers = #tpu.dot_dimension_numbers<[1], [0], [0], [1], [0, 0, 1, 1], [], []>} : vector<8x16xbf16>, vector<16x64xbf16>, vector<8x64xf32> -> vector<8x64xf32>
    %866 = arith.addf %865, %463 : vector<8x64xf32>
    %867 = arith.negf %866 : vector<8x64xf32>
    %868 = math.exp %867 : vector<8x64xf32>
    %cst_220 = arith.constant 1.000000e+00 : f32
    %869 = vector.broadcast %cst_220 : f32 to vector<8x64xf32>
    %870 = arith.addf %869, %868 : vector<8x64xf32>
    %871 = arith.divf %869, %870 : vector<8x64xf32>
    %872 = math.tanh %866 : vector<8x64xf32>
    %873 = vector.extract_strided_slice %871 {offsets = [0, 16], sizes = [8, 16], strides = [1, 1]} : vector<8x64xf32> to vector<8x16xf32>
    %874 = arith.mulf %873, %855 : vector<8x16xf32>
    %875 = vector.extract_strided_slice %871 {offsets = [0, 0], sizes = [8, 16], strides = [1, 1]} : vector<8x64xf32> to vector<8x16xf32>
    %876 = vector.extract_strided_slice %872 {offsets = [0, 32], sizes = [8, 16], strides = [1, 1]} : vector<8x64xf32> to vector<8x16xf32>
    %877 = arith.mulf %875, %876 : vector<8x16xf32>
    %878 = arith.addf %874, %877 : vector<8x16xf32>
    %879 = vector.extract_strided_slice %871 {offsets = [0, 48], sizes = [8, 16], strides = [1, 1]} : vector<8x64xf32> to vector<8x16xf32>
    %880 = math.tanh %878 : vector<8x16xf32>
    %881 = arith.mulf %879, %880 : vector<8x16xf32>
    %c19_i32_221 = arith.constant 19 : i32
    %882 = arith.subi %c19_i32_221, %c17_i32_218 : i32
    %883 = arith.index_cast %882 : i32 to index
    %c0_222 = arith.constant 0 : index
    %c0_223 = arith.constant 0 : index
    %884 = vector.load %arg11[%883, %c0_222, %c0_223] : memref<20x8x16xf32, #tpu.memory_space<vmem>>, vector<1x8x16xf32>
    %885 = vector.shape_cast %884 : vector<1x8x16xf32> to vector<8x16xf32>
    %886 = vector.shape_cast %881 : vector<8x16xf32> to vector<1x8x16xf32>
    tpu.vector_store %arg11[%883, %c0_222, %c0_223], %886 {strides = array<i32>} : memref<20x8x16xf32, #tpu.memory_space<vmem>>, vector<1x8x16xf32>,
    %c18_i32_224 = arith.constant 18 : i32
    %887 = arith.truncf %881 : vector<8x16xf32> to vector<8x16xbf16>
    %cst_225 = arith.constant dense<0.000000e+00> : vector<8x64xf32>
    %888 = tpu.matmul %887, %459, %cst_225 {dimension_numbers = #tpu.dot_dimension_numbers<[1], [0], [0], [1], [0, 0, 1, 1], [], []>} : vector<8x16xbf16>, vector<16x64xbf16>, vector<8x64xf32> -> vector<8x64xf32>
    %889 = arith.addf %888, %463 : vector<8x64xf32>
    %890 = arith.negf %889 : vector<8x64xf32>
    %891 = math.exp %890 : vector<8x64xf32>
    %cst_226 = arith.constant 1.000000e+00 : f32
    %892 = vector.broadcast %cst_226 : f32 to vector<8x64xf32>
    %893 = arith.addf %892, %891 : vector<8x64xf32>
    %894 = arith.divf %892, %893 : vector<8x64xf32>
    %895 = math.tanh %889 : vector<8x64xf32>
    %896 = vector.extract_strided_slice %894 {offsets = [0, 16], sizes = [8, 16], strides = [1, 1]} : vector<8x64xf32> to vector<8x16xf32>
    %897 = arith.mulf %896, %878 : vector<8x16xf32>
    %898 = vector.extract_strided_slice %894 {offsets = [0, 0], sizes = [8, 16], strides = [1, 1]} : vector<8x64xf32> to vector<8x16xf32>
    %899 = vector.extract_strided_slice %895 {offsets = [0, 32], sizes = [8, 16], strides = [1, 1]} : vector<8x64xf32> to vector<8x16xf32>
    %900 = arith.mulf %898, %899 : vector<8x16xf32>
    %901 = arith.addf %897, %900 : vector<8x16xf32>
    %902 = vector.extract_strided_slice %894 {offsets = [0, 48], sizes = [8, 16], strides = [1, 1]} : vector<8x64xf32> to vector<8x16xf32>
    %903 = math.tanh %901 : vector<8x16xf32>
    %904 = arith.mulf %902, %903 : vector<8x16xf32>
    %c19_i32_227 = arith.constant 19 : i32
    %905 = arith.subi %c19_i32_227, %c18_i32_224 : i32
    %906 = arith.index_cast %905 : i32 to index
    %c0_228 = arith.constant 0 : index
    %c0_229 = arith.constant 0 : index
    %907 = vector.load %arg11[%906, %c0_228, %c0_229] : memref<20x8x16xf32, #tpu.memory_space<vmem>>, vector<1x8x16xf32>
    %908 = vector.shape_cast %907 : vector<1x8x16xf32> to vector<8x16xf32>
    %909 = vector.shape_cast %904 : vector<8x16xf32> to vector<1x8x16xf32>
    tpu.vector_store %arg11[%906, %c0_228, %c0_229], %909 {strides = array<i32>} : memref<20x8x16xf32, #tpu.memory_space<vmem>>, vector<1x8x16xf32>,
    %c19_i32_230 = arith.constant 19 : i32
    %910 = arith.truncf %904 : vector<8x16xf32> to vector<8x16xbf16>
    %cst_231 = arith.constant dense<0.000000e+00> : vector<8x64xf32>
    %911 = tpu.matmul %910, %459, %cst_231 {dimension_numbers = #tpu.dot_dimension_numbers<[1], [0], [0], [1], [0, 0, 1, 1], [], []>} : vector<8x16xbf16>, vector<16x64xbf16>, vector<8x64xf32> -> vector<8x64xf32>
    %912 = arith.addf %911, %463 : vector<8x64xf32>
    %913 = arith.negf %912 : vector<8x64xf32>
    %914 = math.exp %913 : vector<8x64xf32>
    %cst_232 = arith.constant 1.000000e+00 : f32
    %915 = vector.broadcast %cst_232 : f32 to vector<8x64xf32>
    %916 = arith.addf %915, %914 : vector<8x64xf32>
    %917 = arith.divf %915, %916 : vector<8x64xf32>
    %918 = math.tanh %912 : vector<8x64xf32>
    %919 = vector.extract_strided_slice %917 {offsets = [0, 16], sizes = [8, 16], strides = [1, 1]} : vector<8x64xf32> to vector<8x16xf32>
    %920 = arith.mulf %919, %901 : vector<8x16xf32>
    %921 = vector.extract_strided_slice %917 {offsets = [0, 0], sizes = [8, 16], strides = [1, 1]} : vector<8x64xf32> to vector<8x16xf32>
    %922 = vector.extract_strided_slice %918 {offsets = [0, 32], sizes = [8, 16], strides = [1, 1]} : vector<8x64xf32> to vector<8x16xf32>
    %923 = arith.mulf %921, %922 : vector<8x16xf32>
    %924 = arith.addf %920, %923 : vector<8x16xf32>
    %925 = vector.extract_strided_slice %917 {offsets = [0, 48], sizes = [8, 16], strides = [1, 1]} : vector<8x64xf32> to vector<8x16xf32>
    %926 = math.tanh %924 : vector<8x16xf32>
    %927 = arith.mulf %925, %926 : vector<8x16xf32>
    %c19_i32_233 = arith.constant 19 : i32
    %928 = arith.subi %c19_i32_233, %c19_i32_230 : i32
    %929 = arith.index_cast %928 : i32 to index
    %c0_234 = arith.constant 0 : index
    %c0_235 = arith.constant 0 : index
    %930 = vector.load %arg11[%929, %c0_234, %c0_235] : memref<20x8x16xf32, #tpu.memory_space<vmem>>, vector<1x8x16xf32>
    %931 = vector.shape_cast %930 : vector<1x8x16xf32> to vector<8x16xf32>
    %932 = vector.shape_cast %927 : vector<8x16xf32> to vector<1x8x16xf32>
    tpu.vector_store %arg11[%929, %c0_234, %c0_235], %932 {strides = array<i32>} : memref<20x8x16xf32, #tpu.memory_space<vmem>>, vector<1x8x16xf32>,
    %c19_i32_236 = arith.constant 19 : i32
    return
  }
}

</mosaic_0001>

<bundles_post_ra>
// kernel: tpu_custom_call.1
= control target key start
LH: loop header
LB: loop body
LE: loop exit
PB: predicated region body
PF: predicated region fallthrough
CT: control target
= control target key end

     0   :  { %vm87_vm0 = vcmask 130048   ;;  %s4327_s0 = inlined_call_operand.vmem [shape: f32[160,16], index: 0, kind: input, shape index: {}]   ;;  %s4328_s1 = inlined_call_operand.vmem [shape: f32[16,128], index: 1, kind: input, shape index: {}]   ;;  %s4329_s2 = inlined_call_operand.vmem [shape: f32[32,128], index: 2, kind: input, shape index: {}]   ;;  %s4330_s3 = inlined_call_operand.vmem [shape: f32[1,128], index: 3, kind: input, shape index: {}]   ;;  %s4331_s4 = inlined_call_operand.vmem [shape: f32[32,16], index: 4, kind: input, shape index: {}]   ;;  %s4332_s5 = inlined_call_operand.vmem [shape: f32[1,16], index: 5, kind: input, shape index: {}]   ;;  %s4333_s6 = inlined_call_operand.vmem [shape: f32[16,32], index: 6, kind: input, shape index: {}]   ;;  %s4334_s7 = inlined_call_operand.vmem [shape: f32[1,32], index: 7, kind: input, shape index: {}]   ;;  %s4335_s8 = inlined_call_operand.vmem [shape: f32[32,64], index: 8, kind: input, shape index: {}]   ;;  %s4336_s9 = inlined_call_operand.vmem [shape: f32[16,64], index: 9, kind: input, shape index: {}]   ;;  %s4337_s10 = inlined_call_operand.vmem [shape: f32[1,64], index: 10, kind: input, shape index: {}]   ;;  %s4338_s11 = inlined_call_operand.vmem [shape: f32[20,8,16], index: 11, kind: output, shape index: {0}]   ;;  %s4339_s12 = inlined_call_operand.hbm [shape: f32[8,16], index: 12, kind: output, shape index: {1}]  }
   0x1   :  { %v63_v0 = vld [vmem:[%s4328_s1 + $0x8] sm:$0xff]  ;;  %v62_v1 = vld [vmem:[%s4328_s1] sm:$0xff]  ;;  %v3547_v3 = vld [vmem:[%s4329_s2 + $0x18] sm:$0xff] }
   0x2   :  { %162 = vmatpush.msra.mxu0 %v63_v0  ;;  %v42_v2 = vld [vmem:[%s4327_s0] sm:$0xff]  ;;  %327 = vmatpush.msra.mxu2 %v3547_v3 }
   0x3   :  { %392 = vmatpush.msra.mxu3 %v3547_v3  ;;  %457 = vmatpush.msra.mxu1 %v3547_v3 }
   0x4   :  { %163 = vmatpush.msra.mxu0 %v62_v1 }
   0x5   :  { %18 = vsyncpa [#allocation4], 0  ;;  %2967 = vmatmul.msk.f32.vlgmr.msra.gmra.mxu0 %vm87_vm0, %v42_v2  ;;  %v43_v4 = vld [vmem:[%s4327_s0 + $0x8] sm:$0xff]  ;;  %v3561_v5 = vld [vmem:[%s4329_s2 + $0x10] sm:$0xff]  ;;  %v3463_v31 = vmov 0.0   ;;  %s3464_s17 = smov 64  }
   0x6   :  { %262 = vmatpush.msrb.mxu0 %v3547_v3  ;;  %328 = vmatpush.msra.mxu2 %v3561_v5  ;;  %v44_v6 = vld [vmem:[%s4327_s0 + $0x10] sm:$0xff]  ;;  %v45_v7 = vld [vmem:[%s4327_s0 + $0x18] sm:$0xff]  ;;  %v46_v8 = vld [vmem:[%s4327_s0 + $0x20] sm:$0xff]  ;;  %s3465_s18 = smov 32   ;;  %vm246_vm5 = vcmask 261120   ;;  %s3467_s15 = smov 96  }
   0x7   :  { %393 = vmatpush.msra.mxu3 %v3561_v5  ;;  %458 = vmatpush.msra.mxu1 %v3561_v5  ;;  %v47_v9 = vld [vmem:[%s4327_s0 + $0x28] sm:$0xff]  ;;  %v48_v10 = vld [vmem:[%s4327_s0 + $0x30] sm:$0xff]  ;;  %v49_v12 = vld [vmem:[%s4327_s0 + $0x38] sm:$0xff]  ;;  %s2956_s19 = sshll.u32 %s4339_s12, 4  ;;  %s2957_s19 = int_to_ptr.hbm [resolvable:$true] %s2956_s19 }
   0x8   :  { %263 = vmatpush.msrb.mxu0 %v3561_v5  ;;  %v3590_v11 = vld [vmem:[%s4329_s2 + $0x8] sm:$0xff]  ;;  %v50_v13 = vld [vmem:[%s4327_s0 + $0x40] sm:$0xff]  ;;  %v52_v15 = vld [vmem:[%s4327_s0 + $0x50] sm:$0xff] }
   0x9   :  { %329 = vmatpush.msra.mxu2 %v3590_v11  ;;  %394 = vmatpush.msra.mxu3 %v3590_v11  ;;  %v51_v14 = vld [vmem:[%s4327_s0 + $0x48] sm:$0xff]  ;;  %v53_v16 = vld [vmem:[%s4327_s0 + $0x58] sm:$0xff]  ;;  %v3619_v17 = vld [vmem:[%s4329_s2] sm:$0xff] }
   0xa   :  { %264 = vmatpush.msrb.mxu0 %v3590_v11  ;;  %459 = vmatpush.msra.mxu1 %v3590_v11  ;;  %v54_v18 = vld [vmem:[%s4327_s0 + $0x60] sm:$0xff]  ;;  %v55_v19 = vld [vmem:[%s4327_s0 + $0x68] sm:$0xff]  ;;  %v56_v20 = vld [vmem:[%s4327_s0 + $0x70] sm:$0xff] }
   0xb   :  { %330 = vmatpush.msra.mxu2 %v3619_v17  ;;  %395 = vmatpush.msra.mxu3 %v3619_v17  ;;  %v57_v21 = vld [vmem:[%s4327_s0 + $0x78] sm:$0xff]  ;;  %v58_v23 = vld [vmem:[%s4327_s0 + $0x80] sm:$0xff]  ;;  %v59_v25 = vld [vmem:[%s4327_s0 + $0x88] sm:$0xff] }
   0xc   :  { %265 = vmatpush.msrb.mxu0 %v3619_v17  ;;  %460 = vmatpush.msra.mxu1 %v3619_v17  ;;  %v60_v27 = vld [vmem:[%s4327_s0 + $0x90] sm:$0xff]  ;;  %v61_v29 = vld [vmem:[%s4327_s0 + $0x98] sm:$0xff]  ;;  %v3710_v47 = vld [vmem:[%s4330_s3] ss:$0 sm:$0xff]  ;;  %s3469_s0 = smov [#allocation3]  }
   0xd   :  { %2968 = vmatmul.msk.f32.gmra.mxu0 %vm87_vm0, %v43_v4  ;;  %522 = vmatpush.msrb.mxu2 %v3547_v3  ;;  %s2954_s16 = sshll.u32 %s3469_s0, 4  ;;  %s2955_s16 = int_to_ptr.vmem [resolvable:$true] %s2954_s16 }
   0xe   :  { %587 = vmatpush.msrb.mxu3 %v3547_v3  ;;  %652 = vmatpush.msrb.mxu1 %v3547_v3 }
   0xf   :  { %523 = vmatpush.msrb.mxu2 %v3561_v5 }
  0x10   :  { %588 = vmatpush.msrb.mxu3 %v3561_v5  ;;  %653 = vmatpush.msrb.mxu1 %v3561_v5 }
  0x11   :  { %524 = vmatpush.msrb.mxu2 %v3590_v11 }
  0x12   :  { %589 = vmatpush.msrb.mxu3 %v3590_v11  ;;  %654 = vmatpush.msrb.mxu1 %v3590_v11 }
  0x13   :  { %525 = vmatpush.msrb.mxu2 %v3619_v17 }
  0x14   :  { %590 = vmatpush.msrb.mxu3 %v3619_v17  ;;  %655 = vmatpush.msrb.mxu1 %v3619_v17 }
  0x15   :  { %2969 = vmatmul.msk.f32.gmra.mxu0 %vm87_vm0, %v44_v6 }
  0x1d   :  { %2970 = vmatmul.msk.f32.gmra.mxu0 %vm87_vm0, %v45_v7 }
  0x25   :  { %2971 = vmatmul.msk.f32.gmra.mxu0 %vm87_vm0, %v46_v8 }
  0x2d   :  { %2972 = vmatmul.msk.f32.gmra.mxu0 %vm87_vm0, %v47_v9 }
  0x35   :  { %2973 = vmatmul.msk.f32.gmra.mxu0 %vm87_vm0, %v48_v10 }
  0x3d   :  { %2974 = vmatmul.msk.f32.gmra.mxu0 %vm87_vm0, %v49_v12 }
  0x45   :  { %2975 = vmatmul.msk.f32.gmra.mxu0 %vm87_vm0, %v50_v13 }
  0x4d   :  { %2976 = vmatmul.msk.f32.gmra.mxu0 %vm87_vm0, %v51_v14 }
  0x55   :  { %2977 = vmatmul.msk.f32.gmra.mxu0 %vm87_vm0, %v52_v15 }
  0x5d   :  { %2978 = vmatmul.msk.f32.gmra.mxu0 %vm87_vm0, %v53_v16 }
  0x65   :  { %2979 = vmatmul.msk.f32.gmra.mxu0 %vm87_vm0, %v54_v18 }
  0x6d   :  { %2980 = vmatmul.msk.f32.gmra.mxu0 %vm87_vm0, %v55_v19 }
  0x75   :  { %2981 = vmatmul.msk.f32.gmra.mxu0 %vm87_vm0, %v56_v20 }
  0x7d   :  { %2982 = vmatmul.msk.f32.gmra.mxu0 %vm87_vm0, %v57_v21 }
  0x82   :  { %v165_v22 = vpop.f32.mrf.mxu0 }
  0x83   :  { %v166_v48 = vadd.f32 %v3710_v47, %v165_v22 }
  0x85   :  { %2983 = vmatmul.msk.f32.gmra.mxu0 %vm87_vm0, %v58_v23 }
  0x8a   :  { %v3657_v24 = vpop.f32.mrf.mxu0 }
  0x8b   :  { %v169_v13 = vadd.f32 %v3710_v47, %v3657_v24 }
  0x8d   :  { %2984 = vmatmul.msk.f32.gmra.mxu0 %vm87_vm0, %v59_v25 }
  0x92   :  { %v3663_v26 = vpop.f32.mrf.mxu0 }
  0x95   :  { %2985 = vmatmul.msk.f32.gmra.mxu0 %vm87_vm0, %v60_v27 }
  0x9a   :  { %v3669_v28 = vpop.f32.mrf.mxu0 }
  0x9d   :  { %2986 = vmatmul.msk.f32.gmra.mxu0 %vm87_vm0, %v61_v29 }
  0xa2   :  { %v3675_v30 = vpop.f32.mrf.mxu0 }
  0xa5   :  { %266 = vmatmul.f32.vlgmr.msrb.gmra.mxu0 %v3463_v31 }
  0xaa   :  { %v3677_v32 = vpop.f32.mrf.mxu0 }
  0xb2   :  { %v3679_v33 = vpop.f32.mrf.mxu0 }
  0xba   :  { %v3681_v34 = vpop.f32.mrf.mxu0 }
  0xc2   :  { %v3683_v35 = vpop.f32.mrf.mxu0 }
  0xca   :  { %v3685_v36 = vpop.f32.mrf.mxu0 }
  0xd2   :  { %v3687_v37 = vpop.f32.mrf.mxu0 }
  0xda   :  { %v3689_v38 = vpop.f32.mrf.mxu0 }
  0xe2   :  { %v3691_v39 = vpop.f32.mrf.mxu0 }
  0xea   :  { %v3693_v40 = vpop.f32.mrf.mxu0 }
  0xf2   :  { %v3695_v41 = vpop.f32.mrf.mxu0 }
  0xfa   :  { %v3697_v42 = vpop.f32.mrf.mxu0 }
 0x102   :  { %v3699_v43 = vpop.f32.mrf.mxu0 }
 0x10a   :  { %v3701_v44 = vpop.f32.mrf.mxu0 }
 0x112   :  { %v3703_v45 = vpop.f32.mrf.mxu0 }
 0x11a   :  { %v3705_v46 = vpop.f32.mrf.mxu0 }
 0x122   :  { %v267_v49 = vpop.f32.mrf.mxu0 }
 0x123   :  { %v270_v50 = vadd.f32 %v267_v49, %v166_v48 }
 0x125   :  { %3112 = vtanh.f32 %v270_v50  ;;  %v2987_v52 = vmul.f32 -1.442695, %v270_v50 }
 0x127   :  { %3114 = vpow2.f32 %v2987_v52 }
 0x12b   :  { %v3113_v51 = vpop.eup %3112 }
 0x12c   :  { %293 = vrot.lane.b32.xlu0 %v3113_v51, %s3464_s17 }
 0x12d   :  { %v3115_v53 = vpop.eup %3114 }
 0x12e   :  { %v274_v54 = vadd.f32 1.0, %v3115_v53 }
 0x130   :  { %3116 = vrcp.f32 %v274_v54  ;;  %v286_v60 = vand.u32 2147483648, %v274_v54  ;;  %vm280_vm2 = vweird.f32 %v274_v54  ;;  %v284_v61 = vand.u32 2147483647, %v274_v54 }
 0x132   :  { %v287_v63 = vor.u32 1.1754944e-38, %v286_v60  ;;  %vm285_vm4 = vcmp.eq.f32.partialorder %v284_v61, 8.507059e+37 }
 0x136   :  { %v3117_v55 = vpop.eup %3116 }
 0x137   :  { %v276_v56 = vmul.f32 %v3117_v55, %v274_v54  ;;  %vm281_vm1 = vweird.f32 %v3117_v55 }
 0x138   :  { %vm282_vm3 = vmor %vm280_vm2, %vm281_vm1 }
 0x139   :  { %v277_v57 = vsub.f32 1.0, %v276_v56 }
 0x13b   :  { %v278_v58 = vmul.f32 %v3117_v55, %v277_v57 }
 0x13d   :  { %v279_v59 = vadd.f32 %v3117_v55, %v278_v58 }
 0x13f   :  { %v283_v62 = vsel %vm282_vm3, %v3117_v55, %v279_v59  ;;  %v172_v59 = vadd.f32 %v3710_v47, %v3663_v26 }
 0x140   :  { %v288_v1 = vsel %vm285_vm4, %v287_v63, %v283_v62 }
 0x141   :  { %v291_v4 = vmul.f32 0.0, %v288_v1 }
 0x19e   :  { %v294_v0 = vpop.permute.xlu0 %293 }
 0x19f   :  { %v296_v2 = vmul.f32 %v294_v0, %v288_v1 }
 0x1a1   :  { %298 = vrot.lane.b32.xlu0 %v296_v2, %s3465_s18 }
 0x213   :  { %v299_v6 = vpop.permute.xlu0 %298 }
 0x214   :  { %v301_v7 = vadd.f32 %v299_v6, %v291_v4 }
 0x216   :  { %3118 = vtanh.f32 %v301_v7 }
 0x21c   :  { %v3119_v8 = vpop.eup %3118 }
 0x21d   :  { %304 = vrot.lane.b32.xlu1 %v3119_v8, %s3464_s17 }
 0x28f   :  { %v305_v9 = vpop.permute.xlu1 %304 }
 0x290   :  { %v307_v10 = vmul.f32 %v305_v9, %v288_v1 }
 0x292   :  { %311 = vrot.lane.b32.xlu1 %v307_v10, %s3465_s18 }
 0x304   :  { %v312_v12 = vpop.permute.xlu1 %311 }
 0x305   :  { %2988 = vmatmul.msk.f32.vlgmr.msra.gmra.mxu2 %vm246_vm5, %v312_v12 }
 0x306   :  { %717 = vmatpush.msra.mxu2 %v3547_v3 }
 0x308   :  { %718 = vmatpush.msra.mxu2 %v3561_v5 }
 0x30a   :  { %719 = vmatpush.msra.mxu2 %v3590_v11 }
 0x30c   :  { %720 = vmatpush.msra.mxu2 %v3619_v17 }
 0x388   :  { %v332_v14 = vpop.f32.mrf.mxu2 }
 0x389   :  { %v335_v15 = vadd.f32 %v332_v14, %v169_v13 }
 0x38b   :  { %3120 = vtanh.f32 %v335_v15  ;;  %v2989_v18 = vmul.f32 -1.442695, %v335_v15 }
 0x38d   :  { %3122 = vpow2.f32 %v2989_v18 }
 0x391   :  { %v3121_v16 = vpop.eup %3120 }
 0x392   :  { %358 = vrot.lane.b32.xlu2 %v3121_v16, %s3464_s17 }
 0x393   :  { %v3123_v19 = vpop.eup %3122 }
 0x394   :  { %v339_v20 = vadd.f32 1.0, %v3123_v19 }
 0x396   :  { %3124 = vrcp.f32 %v339_v20  ;;  %v351_v29 = vand.u32 2147483648, %v339_v20  ;;  %vm345_vm7 = vweird.f32 %v339_v20  ;;  %v349_v24 = vand.u32 2147483647, %v339_v20 }
 0x398   :  { %v352_v48 = vor.u32 1.1754944e-38, %v351_v29  ;;  %vm350_vm9 = vcmp.eq.f32.partialorder %v349_v24, 8.507059e+37 }
 0x39c   :  { %v3125_v21 = vpop.eup %3124 }
 0x39d   :  { %v341_v22 = vmul.f32 %v3125_v21, %v339_v20  ;;  %vm346_vm6 = vweird.f32 %v3125_v21 }
 0x39e   :  { %vm347_vm8 = vmor %vm345_vm7, %vm346_vm6 }
 0x39f   :  { %v342_v23 = vsub.f32 1.0, %v341_v22 }
 0x3a1   :  { %v343_v25 = vmul.f32 %v3125_v21, %v342_v23 }
 0x3a3   :  { %v344_v27 = vadd.f32 %v3125_v21, %v343_v25  ;;  %v175_v25 = vadd.f32 %v3710_v47, %v3669_v28 }
 0x3a5   :  { %v348_v31 = vsel %vm347_vm8, %v3125_v21, %v344_v27 }
 0x3a6   :  { %v353_v50 = vsel %vm350_vm9, %v352_v48, %v348_v31 }
 0x3a7   :  { %v356_v52 = vmul.f32 %v353_v50, %v301_v7 }
 0x3ec   :  { %v359_v49 = vpop.permute.xlu2 %358 }
 0x3ed   :  { %v361_v51 = vmul.f32 %v359_v49, %v353_v50 }
 0x3ef   :  { %363 = vrot.lane.b32.xlu2 %v361_v51, %s3465_s18 }
 0x449   :  { %v364_v53 = vpop.permute.xlu2 %363 }
 0x44a   :  { %v366_v54 = vadd.f32 %v364_v53, %v356_v52 }
 0x44c   :  { %3126 = vtanh.f32 %v366_v54 }
 0x452   :  { %v3127_v55 = vpop.eup %3126 }
 0x453   :  { %369 = vrot.lane.b32.xlu0 %v3127_v55, %s3464_s17 }
 0x4c5   :  { %v370_v56 = vpop.permute.xlu0 %369 }
 0x4c6   :  { %v372_v57 = vmul.f32 %v370_v56, %v353_v50 }
 0x4c8   :  { %376 = vrot.lane.b32.xlu1 %v372_v57, %s3465_s18 }
 0x53a   :  { %v377_v58 = vpop.permute.xlu1 %376 }
 0x53b   :  { %2990 = vmatmul.msk.f32.vlgmr.msra.gmra.mxu3 %vm246_vm5, %v377_v58 }
 0x53c   :  { %782 = vmatpush.msra.mxu3 %v3547_v3 }
 0x53e   :  { %783 = vmatpush.msra.mxu3 %v3561_v5 }
 0x540   :  { %784 = vmatpush.msra.mxu3 %v3590_v11 }
 0x542   :  { %785 = vmatpush.msra.mxu3 %v3619_v17 }
 0x5be   :  { %v397_v60 = vpop.f32.mrf.mxu3 }
 0x5bf   :  { %v400_v61 = vadd.f32 %v397_v60, %v172_v59 }
 0x5c1   :  { %3128 = vtanh.f32 %v400_v61  ;;  %v2991_v63 = vmul.f32 -1.442695, %v400_v61 }
 0x5c3   :  { %3130 = vpow2.f32 %v2991_v63 }
 0x5c7   :  { %v3129_v62 = vpop.eup %3128 }
 0x5c8   :  { %423 = vrot.lane.b32.xlu2 %v3129_v62, %s3464_s17 }
 0x5c9   :  { %v3131_v0 = vpop.eup %3130 }
 0x5ca   :  { %v404_v1 = vadd.f32 1.0, %v3131_v0 }
 0x5cc   :  { %3132 = vrcp.f32 %v404_v1  ;;  %v416_v9 = vand.u32 2147483648, %v404_v1  ;;  %vm410_vm11 = vweird.f32 %v404_v1  ;;  %v414_v26 = vand.u32 2147483647, %v404_v1 }
 0x5ce   :  { %v417_v12 = vor.u32 1.1754944e-38, %v416_v9  ;;  %vm415_vm13 = vcmp.eq.f32.partialorder %v414_v26, 8.507059e+37 }
 0x5d2   :  { %v3133_v2 = vpop.eup %3132 }
 0x5d3   :  { %v406_v4 = vmul.f32 %v3133_v2, %v404_v1  ;;  %vm411_vm10 = vweird.f32 %v3133_v2 }
 0x5d4   :  { %vm412_vm12 = vmor %vm410_vm11, %vm411_vm10 }
 0x5d5   :  { %v407_v6 = vsub.f32 1.0, %v406_v4 }
 0x5d7   :  { %v408_v7 = vmul.f32 %v3133_v2, %v407_v6  ;;  %v178_v6 = vadd.f32 %v3710_v47, %v3675_v30 }
 0x5d9   :  { %v409_v8 = vadd.f32 %v3133_v2, %v408_v7 }
 0x5db   :  { %v413_v10 = vsel %vm412_vm12, %v3133_v2, %v409_v8 }
 0x5dc   :  { %v418_v14 = vsel %vm415_vm13, %v417_v12, %v413_v10 }
 0x5dd   :  { %v421_v16 = vmul.f32 %v418_v14, %v366_v54 }
 0x622   :  { %v424_v13 = vpop.permute.xlu2 %423 }
 0x623   :  { %v426_v15 = vmul.f32 %v424_v13, %v418_v14 }
 0x625   :  { %428 = vrot.lane.b32.xlu0 %v426_v15, %s3465_s18 }
 0x697   :  { %v429_v18 = vpop.permute.xlu0 %428 }
 0x698   :  { %v431_v19 = vadd.f32 %v429_v18, %v421_v16 }
 0x69a   :  { %3134 = vtanh.f32 %v431_v19 }
 0x6a0   :  { %v3135_v20 = vpop.eup %3134 }
 0x6a1   :  { %434 = vrot.lane.b32.xlu1 %v3135_v20, %s3464_s17 }
 0x713   :  { %v435_v21 = vpop.permute.xlu1 %434 }
 0x714   :  { %v437_v22 = vmul.f32 %v435_v21, %v418_v14 }
 0x716   :  { %441 = vrot.lane.b32.xlu2 %v437_v22, %s3465_s18 }
 0x770   :  { %v442_v23 = vpop.permute.xlu2 %441 }
 0x771   :  { %2992 = vmatmul.msk.f32.vlgmr.msra.gmra.mxu1 %vm246_vm5, %v442_v23 }
 0x772   :  { %847 = vmatpush.msra.mxu1 %v3547_v3 }
 0x774   :  { %848 = vmatpush.msra.mxu1 %v3561_v5 }
 0x776   :  { %849 = vmatpush.msra.mxu1 %v3590_v11 }
 0x778   :  { %850 = vmatpush.msra.mxu1 %v3619_v17 }
 0x7ee   :  { %v462_v27 = vpop.f32.mrf.mxu1 }
 0x7ef   :  { %v465_v29 = vadd.f32 %v462_v27, %v175_v25 }
 0x7f1   :  { %3136 = vtanh.f32 %v465_v29  ;;  %v2993_v31 = vmul.f32 -1.442695, %v465_v29 }
 0x7f3   :  { %3138 = vpow2.f32 %v2993_v31 }
 0x7f7   :  { %v3137_v24 = vpop.eup %3136 }
 0x7f8   :  { %488 = vrot.lane.b32.xlu0 %v3137_v24, %s3464_s17 }
 0x7f9   :  { %v3139_v48 = vpop.eup %3138 }
 0x7fa   :  { %v469_v49 = vadd.f32 1.0, %v3139_v48 }
 0x7fc   :  { %3140 = vrcp.f32 %v469_v49  ;;  %v481_v55 = vand.u32 2147483648, %v469_v49  ;;  %vm475_vm15 = vweird.f32 %v469_v49  ;;  %v479_v28 = vand.u32 2147483647, %v469_v49 }
 0x7fe   :  { %v482_v57 = vor.u32 1.1754944e-38, %v481_v55  ;;  %vm480_vm2 = vcmp.eq.f32.partialorder %v479_v28, 8.507059e+37 }
 0x802   :  { %v3141_v50 = vpop.eup %3140 }
 0x803   :  { %v471_v51 = vmul.f32 %v3141_v50, %v469_v49  ;;  %vm476_vm14 = vweird.f32 %v3141_v50 }
 0x804   :  { %vm477_vm1 = vmor %vm475_vm15, %vm476_vm14 }
 0x805   :  { %v472_v52 = vsub.f32 1.0, %v471_v51  ;;  %v181_v51 = vadd.f32 %v3710_v47, %v3677_v32 }
 0x807   :  { %v473_v53 = vmul.f32 %v3141_v50, %v472_v52 }
 0x809   :  { %v474_v54 = vadd.f32 %v3141_v50, %v473_v53 }
 0x80b   :  { %v478_v56 = vsel %vm477_vm1, %v3141_v50, %v474_v54 }
 0x80c   :  { %v483_v59 = vsel %vm480_vm2, %v482_v57, %v478_v56 }
 0x80d   :  { %v486_v61 = vmul.f32 %v483_v59, %v431_v19 }
 0x86a   :  { %v489_v58 = vpop.permute.xlu0 %488 }
 0x86b   :  { %v491_v60 = vmul.f32 %v489_v58, %v483_v59 }
 0x86d   :  { %493 = vrot.lane.b32.xlu1 %v491_v60, %s3465_s18 }
 0x8df   :  { %v494_v62 = vpop.permute.xlu1 %493 }
 0x8e0   :  { %v496_v63 = vadd.f32 %v494_v62, %v486_v61 }
 0x8e2   :  { %3142 = vtanh.f32 %v496_v63 }
 0x8e8   :  { %v3143_v0 = vpop.eup %3142 }
 0x8e9   :  { %499 = vrot.lane.b32.xlu2 %v3143_v0, %s3464_s17 }
 0x943   :  { %v500_v1 = vpop.permute.xlu2 %499 }
 0x944   :  { %v502_v2 = vmul.f32 %v500_v1, %v483_v59 }
 0x946   :  { %506 = vrot.lane.b32.xlu0 %v502_v2, %s3465_s18 }
 0x9b8   :  { %v507_v4 = vpop.permute.xlu0 %506 }
 0x9b9   :  { %2994 = vmatmul.msk.f32.vlgmr.msrb.gmra.mxu2 %vm246_vm5, %v507_v4 }
 0x9ba   :  { %912 = vmatpush.msrb.mxu2 %v3547_v3 }
 0x9bc   :  { %913 = vmatpush.msrb.mxu2 %v3561_v5 }
 0x9be   :  { %914 = vmatpush.msrb.mxu2 %v3590_v11 }
 0x9c0   :  { %915 = vmatpush.msrb.mxu2 %v3619_v17 }
 0xa3c   :  { %v527_v7 = vpop.f32.mrf.mxu2 }
 0xa3d   :  { %v530_v8 = vadd.f32 %v527_v7, %v178_v6 }
 0xa3f   :  { %3144 = vtanh.f32 %v530_v8  ;;  %v2995_v26 = vmul.f32 -1.442695, %v530_v8 }
 0xa41   :  { %3146 = vpow2.f32 %v2995_v26 }
 0xa45   :  { %v3145_v9 = vpop.eup %3144 }
 0xa46   :  { %553 = vrot.lane.b32.xlu1 %v3145_v9, %s3464_s17 }
 0xa47   :  { %v3147_v10 = vpop.eup %3146 }
 0xa48   :  { %v534_v12 = vadd.f32 1.0, %v3147_v10 }
 0xa4a   :  { %3148 = vrcp.f32 %v534_v12  ;;  %v546_v19 = vand.u32 2147483648, %v534_v12  ;;  %vm540_vm4 = vweird.f32 %v534_v12  ;;  %v544_v30 = vand.u32 2147483647, %v534_v12 }
 0xa4c   :  { %v547_v21 = vor.u32 1.1754944e-38, %v546_v19  ;;  %vm545_vm7 = vcmp.eq.f32.partialorder %v544_v30, 8.507059e+37 }
 0xa50   :  { %v3149_v13 = vpop.eup %3148 }
 0xa51   :  { %v536_v14 = vmul.f32 %v3149_v13, %v534_v12  ;;  %vm541_vm3 = vweird.f32 %v3149_v13 }
 0xa52   :  { %vm542_vm6 = vmor %vm540_vm4, %vm541_vm3 }
 0xa53   :  { %v537_v15 = vsub.f32 1.0, %v536_v14 }
 0xa55   :  { %v538_v16 = vmul.f32 %v3149_v13, %v537_v15 }
 0xa57   :  { %v539_v18 = vadd.f32 %v3149_v13, %v538_v16 }
 0xa59   :  { %v543_v20 = vsel %vm542_vm6, %v3149_v13, %v539_v18  ;;  %v184_v13 = vadd.f32 %v3710_v47, %v3679_v33 }
 0xa5a   :  { %v548_v23 = vsel %vm545_vm7, %v547_v21, %v543_v20 }
 0xa5b   :  { %v551_v27 = vmul.f32 %v548_v23, %v496_v63 }
 0xab8   :  { %v554_v22 = vpop.permute.xlu1 %553 }
 0xab9   :  { %v556_v25 = vmul.f32 %v554_v22, %v548_v23 }
 0xabb   :  { %558 = vrot.lane.b32.xlu2 %v556_v25, %s3465_s18 }
 0xb15   :  { %v559_v29 = vpop.permute.xlu2 %558 }
 0xb16   :  { %v561_v24 = vadd.f32 %v559_v29, %v551_v27 }
 0xb18   :  { %3150 = vtanh.f32 %v561_v24 }
 0xb1e   :  { %v3151_v31 = vpop.eup %3150 }
 0xb1f   :  { %564 = vrot.lane.b32.xlu0 %v3151_v31, %s3464_s17 }
 0xb91   :  { %v565_v48 = vpop.permute.xlu0 %564 }
 0xb92   :  { %v567_v49 = vmul.f32 %v565_v48, %v548_v23 }
 0xb94   :  { %571 = vrot.lane.b32.xlu1 %v567_v49, %s3465_s18 }
 0xc06   :  { %v572_v50 = vpop.permute.xlu1 %571 }
 0xc07   :  { %2996 = vmatmul.msk.f32.vlgmr.msrb.gmra.mxu3 %vm246_vm5, %v572_v50 }
 0xc08   :  { %977 = vmatpush.msrb.mxu3 %v3547_v3 }
 0xc0a   :  { %978 = vmatpush.msrb.mxu3 %v3561_v5 }
 0xc0c   :  { %979 = vmatpush.msrb.mxu3 %v3590_v11 }
 0xc0e   :  { %980 = vmatpush.msrb.mxu3 %v3619_v17 }
 0xc8a   :  { %v592_v52 = vpop.f32.mrf.mxu3 }
 0xc8b   :  { %v595_v53 = vadd.f32 %v592_v52, %v181_v51 }
 0xc8d   :  { %3152 = vtanh.f32 %v595_v53  ;;  %v2997_v55 = vmul.f32 -1.442695, %v595_v53 }
 0xc8f   :  { %3154 = vpow2.f32 %v2997_v55 }
 0xc93   :  { %v3153_v54 = vpop.eup %3152 }
 0xc94   :  { %618 = vrot.lane.b32.xlu2 %v3153_v54, %s3464_s17 }
 0xc95   :  { %v3155_v28 = vpop.eup %3154 }
 0xc96   :  { %v599_v56 = vadd.f32 1.0, %v3155_v28 }
 0xc98   :  { %3156 = vrcp.f32 %v599_v56  ;;  %v611_v62 = vand.u32 2147483648, %v599_v56  ;;  %vm605_vm9 = vweird.f32 %v599_v56  ;;  %v609_v32 = vand.u32 2147483647, %v599_v56 }
 0xc9a   :  { %v612_v0 = vor.u32 1.1754944e-38, %v611_v62  ;;  %vm610_vm11 = vcmp.eq.f32.partialorder %v609_v32, 8.507059e+37 }
 0xc9e   :  { %v3157_v57 = vpop.eup %3156 }
 0xc9f   :  { %v601_v58 = vmul.f32 %v3157_v57, %v599_v56  ;;  %vm606_vm8 = vweird.f32 %v3157_v57  ;;  %v187_v56 = vadd.f32 %v3710_v47, %v3681_v34 }
 0xca0   :  { %vm607_vm10 = vmor %vm605_vm9, %vm606_vm8 }
 0xca1   :  { %v602_v59 = vsub.f32 1.0, %v601_v58 }
 0xca3   :  { %v603_v60 = vmul.f32 %v3157_v57, %v602_v59 }
 0xca5   :  { %v604_v61 = vadd.f32 %v3157_v57, %v603_v60 }
 0xca7   :  { %v608_v63 = vsel %vm607_vm10, %v3157_v57, %v604_v61 }
 0xca8   :  { %v613_v2 = vsel %vm610_vm11, %v612_v0, %v608_v63 }
 0xca9   :  { %v616_v6 = vmul.f32 %v613_v2, %v561_v24 }
 0xcee   :  { %v619_v1 = vpop.permute.xlu2 %618 }
 0xcef   :  { %v621_v4 = vmul.f32 %v619_v1, %v613_v2 }
 0xcf1   :  { %623 = vrot.lane.b32.xlu0 %v621_v4, %s3465_s18 }
 0xd63   :  { %v624_v7 = vpop.permute.xlu0 %623 }
 0xd64   :  { %v626_v8 = vadd.f32 %v624_v7, %v616_v6 }
 0xd66   :  { %3158 = vtanh.f32 %v626_v8 }
 0xd6c   :  { %v3159_v9 = vpop.eup %3158 }
 0xd6d   :  { %629 = vrot.lane.b32.xlu1 %v3159_v9, %s3464_s17 }
 0xddf   :  { %v630_v26 = vpop.permute.xlu1 %629 }
 0xde0   :  { %v632_v10 = vmul.f32 %v630_v26, %v613_v2 }
 0xde2   :  { %636 = vrot.lane.b32.xlu2 %v632_v10, %s3465_s18 }
 0xe3c   :  { %v637_v12 = vpop.permute.xlu2 %636 }
 0xe3d   :  { %2998 = vmatmul.msk.f32.vlgmr.msrb.gmra.mxu1 %vm246_vm5, %v637_v12 }
 0xe3e   :  { %1042 = vmatpush.msrb.mxu1 %v3547_v3 }
 0xe40   :  { %1043 = vmatpush.msrb.mxu1 %v3561_v5 }
 0xe42   :  { %1044 = vmatpush.msrb.mxu1 %v3590_v11 }
 0xe44   :  { %1045 = vmatpush.msrb.mxu1 %v3619_v17 }
 0xeba   :  { %v657_v14 = vpop.f32.mrf.mxu1 }
 0xebb   :  { %v660_v15 = vadd.f32 %v657_v14, %v184_v13 }
 0xebd   :  { %3160 = vtanh.f32 %v660_v15  ;;  %v2999_v18 = vmul.f32 -1.442695, %v660_v15 }
 0xebf   :  { %3162 = vpow2.f32 %v2999_v18 }
 0xec3   :  { %v3161_v16 = vpop.eup %3160 }
 0xec4   :  { %683 = vrot.lane.b32.xlu0 %v3161_v16, %s3464_s17 }
 0xec5   :  { %v3163_v19 = vpop.eup %3162 }
 0xec6   :  { %v664_v30 = vadd.f32 1.0, %v3163_v19  ;;  %v190_v19 = vadd.f32 %v3710_v47, %v3683_v35 }
 0xec8   :  { %3164 = vrcp.f32 %v664_v30  ;;  %v676_v27 = vand.u32 2147483648, %v664_v30  ;;  %vm670_vm13 = vweird.f32 %v664_v30  ;;  %v674_v33 = vand.u32 2147483647, %v664_v30 }
 0xeca   :  { %v677_v24 = vor.u32 1.1754944e-38, %v676_v27  ;;  %vm675_vm15 = vcmp.eq.f32.partialorder %v674_v33, 8.507059e+37 }
 0xece   :  { %v3165_v20 = vpop.eup %3164 }
 0xecf   :  { %v666_v21 = vmul.f32 %v3165_v20, %v664_v30  ;;  %vm671_vm12 = vweird.f32 %v3165_v20 }
 0xed0   :  { %vm672_vm14 = vmor %vm670_vm13, %vm671_vm12 }
 0xed1   :  { %v667_v22 = vsub.f32 1.0, %v666_v21 }
 0xed3   :  { %v668_v23 = vmul.f32 %v3165_v20, %v667_v22 }
 0xed5   :  { %v669_v25 = vadd.f32 %v3165_v20, %v668_v23 }
 0xed7   :  { %v673_v29 = vsel %vm672_vm14, %v3165_v20, %v669_v25 }
 0xed8   :  { %v678_v48 = vsel %vm675_vm15, %v677_v24, %v673_v29 }
 0xed9   :  { %v681_v50 = vmul.f32 %v678_v48, %v626_v8 }
 0xf36   :  { %v684_v31 = vpop.permute.xlu0 %683 }
 0xf37   :  { %v686_v49 = vmul.f32 %v684_v31, %v678_v48 }
 0xf39   :  { %688 = vrot.lane.b32.xlu1 %v686_v49, %s3465_s18 }
 0xfab   :  { %v689_v51 = vpop.permute.xlu1 %688 }
 0xfac   :  { %v691_v52 = vadd.f32 %v689_v51, %v681_v50 }
 0xfae   :  { %3166 = vtanh.f32 %v691_v52 }
 0xfb4   :  { %v3167_v53 = vpop.eup %3166 }
 0xfb5   :  { %694 = vrot.lane.b32.xlu2 %v3167_v53, %s3464_s17 }
0x100f   :  { %v695_v54 = vpop.permute.xlu2 %694 }
0x1010   :  { %v697_v55 = vmul.f32 %v695_v54, %v678_v48 }
0x1012   :  { %701 = vrot.lane.b32.xlu0 %v697_v55, %s3465_s18 }
0x1084   :  { %v702_v28 = vpop.permute.xlu0 %701 }
0x1085   :  { %3000 = vmatmul.msk.f32.vlgmr.msra.gmra.mxu2 %vm246_vm5, %v702_v28 }
0x1086   :  { %1107 = vmatpush.msra.mxu2 %v3547_v3 }
0x1088   :  { %1108 = vmatpush.msra.mxu2 %v3561_v5 }
0x108a   :  { %1109 = vmatpush.msra.mxu2 %v3590_v11 }
0x108c   :  { %1110 = vmatpush.msra.mxu2 %v3619_v17 }
0x1108   :  { %v722_v57 = vpop.f32.mrf.mxu2 }
0x1109   :  { %v725_v58 = vadd.f32 %v722_v57, %v187_v56 }
0x110b   :  { %3168 = vtanh.f32 %v725_v58  ;;  %v3001_v60 = vmul.f32 -1.442695, %v725_v58 }
0x110d   :  { %3170 = vpow2.f32 %v3001_v60  ;;  %v193_v60 = vadd.f32 %v3710_v47, %v3685_v36 }
0x1111   :  { %v3169_v59 = vpop.eup %3168 }
0x1112   :  { %748 = vrot.lane.b32.xlu1 %v3169_v59, %s3464_s17 }
0x1113   :  { %v3171_v61 = vpop.eup %3170 }
0x1114   :  { %v729_v62 = vadd.f32 1.0, %v3171_v61 }
0x1116   :  { %3172 = vrcp.f32 %v729_v62  ;;  %v741_v4 = vand.u32 2147483648, %v729_v62  ;;  %vm735_vm2 = vweird.f32 %v729_v62  ;;  %v739_v34 = vand.u32 2147483647, %v729_v62 }
0x1118   :  { %v742_v7 = vor.u32 1.1754944e-38, %v741_v4  ;;  %vm740_vm4 = vcmp.eq.f32.partialorder %v739_v34, 8.507059e+37 }
0x111c   :  { %v3173_v32 = vpop.eup %3172 }
0x111d   :  { %v731_v63 = vmul.f32 %v3173_v32, %v729_v62  ;;  %vm736_vm1 = vweird.f32 %v3173_v32 }
0x111e   :  { %vm737_vm3 = vmor %vm735_vm2, %vm736_vm1 }
0x111f   :  { %v732_v0 = vsub.f32 1.0, %v731_v63 }
0x1121   :  { %v733_v1 = vmul.f32 %v3173_v32, %v732_v0 }
0x1123   :  { %v734_v2 = vadd.f32 %v3173_v32, %v733_v1 }
0x1125   :  { %v738_v6 = vsel %vm737_vm3, %v3173_v32, %v734_v2 }
0x1126   :  { %v743_v9 = vsel %vm740_vm4, %v742_v7, %v738_v6 }
0x1127   :  { %v746_v10 = vmul.f32 %v743_v9, %v691_v52 }
0x1184   :  { %v749_v8 = vpop.permute.xlu1 %748 }
0x1185   :  { %v751_v26 = vmul.f32 %v749_v8, %v743_v9 }
0x1187   :  { %753 = vrot.lane.b32.xlu2 %v751_v26, %s3465_s18 }
0x11e1   :  { %v754_v12 = vpop.permute.xlu2 %753 }
0x11e2   :  { %v756_v13 = vadd.f32 %v754_v12, %v746_v10 }
0x11e4   :  { %3174 = vtanh.f32 %v756_v13 }
0x11ea   :  { %v3175_v14 = vpop.eup %3174 }
0x11eb   :  { %759 = vrot.lane.b32.xlu0 %v3175_v14, %s3464_s17 }
0x125d   :  { %v760_v15 = vpop.permute.xlu0 %759 }
0x125e   :  { %v762_v16 = vmul.f32 %v760_v15, %v743_v9 }
0x1260   :  { %766 = vrot.lane.b32.xlu1 %v762_v16, %s3465_s18 }
0x12d2   :  { %v767_v18 = vpop.permute.xlu1 %766 }
0x12d3   :  { %3002 = vmatmul.msk.f32.vlgmr.msra.gmra.mxu3 %vm246_vm5, %v767_v18 }
0x12d4   :  { %1172 = vmatpush.msra.mxu3 %v3547_v3 }
0x12d6   :  { %1173 = vmatpush.msra.mxu3 %v3561_v5 }
0x12d8   :  { %1174 = vmatpush.msra.mxu3 %v3590_v11 }
0x12da   :  { %1175 = vmatpush.msra.mxu3 %v3619_v17 }
0x1356   :  { %v787_v30 = vpop.f32.mrf.mxu3 }
0x1357   :  { %v790_v20 = vadd.f32 %v787_v30, %v190_v19  ;;  %v3820_v30 = vld [vmem:[%s4329_s2 + $0x18] sm:$0xff] }
0x1359   :  { %3176 = vtanh.f32 %v790_v20  ;;  %v3003_v22 = vmul.f32 -1.442695, %v790_v20  ;;  %v3826_v20 = vld [vmem:[%s4329_s2 + $0x10] sm:$0xff] }
0x135b   :  { %3178 = vpow2.f32 %v3003_v22 }
0x135f   :  { %v3177_v21 = vpop.eup %3176 }
0x1360   :  { %813 = vrot.lane.b32.xlu2 %v3177_v21, %s3464_s17  ;;  %v196_v21 = vadd.f32 %v3710_v47, %v3687_v37 }
0x1361   :  { %v3179_v23 = vpop.eup %3178 }
0x1362   :  { %v794_v25 = vadd.f32 1.0, %v3179_v23 }
0x1364   :  { %3180 = vrcp.f32 %v794_v25  ;;  %v806_v48 = vand.u32 2147483648, %v794_v25  ;;  %vm800_vm7 = vweird.f32 %v794_v25  ;;  %v804_v35 = vand.u32 2147483647, %v794_v25 }
0x1366   :  { %v807_v50 = vor.u32 1.1754944e-38, %v806_v48  ;;  %vm805_vm9 = vcmp.eq.f32.partialorder %v804_v35, 8.507059e+37 }
0x136a   :  { %v3181_v27 = vpop.eup %3180 }
0x136b   :  { %v796_v33 = vmul.f32 %v3181_v27, %v794_v25  ;;  %vm801_vm6 = vweird.f32 %v3181_v27 }
0x136c   :  { %vm802_vm8 = vmor %vm800_vm7, %vm801_vm6 }
0x136d   :  { %v797_v29 = vsub.f32 1.0, %v796_v33 }
0x136f   :  { %v798_v24 = vmul.f32 %v3181_v27, %v797_v29 }
0x1371   :  { %v799_v31 = vadd.f32 %v3181_v27, %v798_v24 }
0x1373   :  { %v803_v49 = vsel %vm802_vm8, %v3181_v27, %v799_v31 }
0x1374   :  { %v808_v52 = vsel %vm805_vm9, %v807_v50, %v803_v49 }
0x1375   :  { %v811_v54 = vmul.f32 %v808_v52, %v756_v13 }
0x13ba   :  { %v814_v51 = vpop.permute.xlu2 %813 }
0x13bb   :  { %v816_v53 = vmul.f32 %v814_v51, %v808_v52 }
0x13bd   :  { %818 = vrot.lane.b32.xlu0 %v816_v53, %s3465_s18 }
0x142f   :  { %v819_v55 = vpop.permute.xlu0 %818 }
0x1430   :  { %v821_v28 = vadd.f32 %v819_v55, %v811_v54 }
0x1432   :  { %3182 = vtanh.f32 %v821_v28 }
0x1438   :  { %v3183_v56 = vpop.eup %3182 }
0x1439   :  { %824 = vrot.lane.b32.xlu1 %v3183_v56, %s3464_s17 }
0x14ab   :  { %v825_v57 = vpop.permute.xlu1 %824 }
0x14ac   :  { %v827_v58 = vmul.f32 %v825_v57, %v808_v52 }
0x14ae   :  { %831 = vrot.lane.b32.xlu2 %v827_v58, %s3465_s18 }
0x1508   :  { %v832_v59 = vpop.permute.xlu2 %831 }
0x1509   :  { %3004 = vmatmul.msk.f32.vlgmr.msra.gmra.mxu1 %vm246_vm5, %v832_v59 }
0x150a   :  { %1237 = vmatpush.msra.mxu1 %v3547_v3 }
0x150c   :  { %1238 = vmatpush.msra.mxu1 %v3561_v5 }
0x150e   :  { %1239 = vmatpush.msra.mxu1 %v3590_v11 }
0x1510   :  { %1240 = vmatpush.msra.mxu1 %v3619_v17 }
0x1586   :  { %v852_v61 = vpop.f32.mrf.mxu1 }
0x1587   :  { %v855_v62 = vadd.f32 %v852_v61, %v193_v60  ;;  %v3843_v60 = vld [vmem:[%s4329_s2 + $0x8] sm:$0xff]  ;;  %v3849_v61 = vld [vmem:[%s4329_s2] sm:$0xff] }
0x1589   :  { %3184 = vtanh.f32 %v855_v62  ;;  %v3005_v63 = vmul.f32 -1.442695, %v855_v62  ;;  %v199_v62 = vadd.f32 %v3710_v47, %v3689_v38 }
0x158b   :  { %3186 = vpow2.f32 %v3005_v63 }
0x158f   :  { %v3185_v32 = vpop.eup %3184 }
0x1590   :  { %878 = vrot.lane.b32.xlu0 %v3185_v32, %s3464_s17 }
0x1591   :  { %v3187_v0 = vpop.eup %3186 }
0x1592   :  { %v859_v1 = vadd.f32 1.0, %v3187_v0 }
0x1594   :  { %3188 = vrcp.f32 %v859_v1  ;;  %v871_v6 = vand.u32 2147483648, %v859_v1  ;;  %vm865_vm11 = vweird.f32 %v859_v1  ;;  %v869_v36 = vand.u32 2147483647, %v859_v1 }
0x1596   :  { %v872_v8 = vor.u32 1.1754944e-38, %v871_v6  ;;  %vm870_vm13 = vcmp.eq.f32.partialorder %v869_v36, 8.507059e+37 }
0x159a   :  { %v3189_v3 = vpop.eup %3188 }
0x159b   :  { %v861_v5 = vmul.f32 %v3189_v3, %v859_v1  ;;  %vm866_vm10 = vweird.f32 %v3189_v3 }
0x159c   :  { %vm867_vm12 = vmor %vm865_vm11, %vm866_vm10 }
0x159d   :  { %v862_v2 = vsub.f32 1.0, %v861_v5 }
0x159f   :  { %v863_v4 = vmul.f32 %v3189_v3, %v862_v2 }
0x15a1   :  { %v864_v34 = vadd.f32 %v3189_v3, %v863_v4 }
0x15a3   :  { %v868_v7 = vsel %vm867_vm12, %v3189_v3, %v864_v34 }
0x15a4   :  { %v873_v26 = vsel %vm870_vm13, %v872_v8, %v868_v7 }
0x15a5   :  { %v876_v12 = vmul.f32 %v873_v26, %v821_v28 }
0x1602   :  { %v879_v9 = vpop.permute.xlu0 %878 }
0x1603   :  { %v881_v10 = vmul.f32 %v879_v9, %v873_v26 }
0x1605   :  { %883 = vrot.lane.b32.xlu1 %v881_v10, %s3465_s18 }
0x1677   :  { %v884_v13 = vpop.permute.xlu1 %883 }
0x1678   :  { %v886_v14 = vadd.f32 %v884_v13, %v876_v12 }
0x167a   :  { %3190 = vtanh.f32 %v886_v14 }
0x1680   :  { %v3191_v15 = vpop.eup %3190 }
0x1681   :  { %889 = vrot.lane.b32.xlu2 %v3191_v15, %s3464_s17 }
0x16db   :  { %v890_v16 = vpop.permute.xlu2 %889 }
0x16dc   :  { %v892_v18 = vmul.f32 %v890_v16, %v873_v26 }
0x16de   :  { %896 = vrot.lane.b32.xlu0 %v892_v18, %s3465_s18 }
0x1750   :  { %v897_v19 = vpop.permute.xlu0 %896 }
0x1751   :  { %3006 = vmatmul.msk.f32.vlgmr.msrb.gmra.mxu2 %vm246_vm5, %v897_v19 }
0x1752   :  { %1302 = vmatpush.msrb.mxu2 %v3820_v30 }
0x1754   :  { %1303 = vmatpush.msrb.mxu2 %v3826_v20 }
0x1756   :  { %1304 = vmatpush.msrb.mxu2 %v3590_v11 }
0x1758   :  { %1305 = vmatpush.msrb.mxu2 %v3619_v17 }
0x17d4   :  { %v917_v22 = vpop.f32.mrf.mxu2 }
0x17d5   :  { %v920_v23 = vadd.f32 %v917_v22, %v196_v21  ;;  %v3866_v21 = vld [vmem:[%s4330_s3] ss:$0 sm:$0xff] }
0x17d6   :  { %v202_v22 = vadd.f32 %v3866_v21, %v3691_v39 }
0x17d7   :  { %3192 = vtanh.f32 %v920_v23  ;;  %v3007_v27 = vmul.f32 -1.442695, %v920_v23 }
0x17d9   :  { %3194 = vpow2.f32 %v3007_v27 }
0x17dd   :  { %v3193_v25 = vpop.eup %3192 }
0x17de   :  { %943 = vrot.lane.b32.xlu1 %v3193_v25, %s3464_s17 }
0x17df   :  { %v3195_v33 = vpop.eup %3194 }
0x17e0   :  { %v924_v29 = vadd.f32 1.0, %v3195_v33 }
0x17e2   :  { %3196 = vrcp.f32 %v924_v29  ;;  %v936_v17 = vand.u32 2147483648, %v924_v29  ;;  %vm930_vm15 = vweird.f32 %v924_v29  ;;  %v934_v37 = vand.u32 2147483647, %v924_v29 }
0x17e4   :  { %v937_v50 = vor.u32 1.1754944e-38, %v936_v17  ;;  %vm935_vm2 = vcmp.eq.f32.partialorder %v934_v37, 8.507059e+37 }
0x17e8   :  { %v3197_v24 = vpop.eup %3196 }
0x17e9   :  { %v926_v31 = vmul.f32 %v3197_v24, %v924_v29  ;;  %vm931_vm14 = vweird.f32 %v3197_v24 }
0x17ea   :  { %vm932_vm1 = vmor %vm930_vm15, %vm931_vm14 }
0x17eb   :  { %v927_v48 = vsub.f32 1.0, %v926_v31 }
0x17ed   :  { %v928_v11 = vmul.f32 %v3197_v24, %v927_v48 }
0x17ef   :  { %v929_v35 = vadd.f32 %v3197_v24, %v928_v11 }
0x17f1   :  { %v933_v49 = vsel %vm932_vm1, %v3197_v24, %v929_v35 }
0x17f2   :  { %v938_v52 = vsel %vm935_vm2, %v937_v50, %v933_v49 }
0x17f3   :  { %v941_v54 = vmul.f32 %v938_v52, %v886_v14 }
0x1850   :  { %v944_v51 = vpop.permute.xlu1 %943 }
0x1851   :  { %v946_v53 = vmul.f32 %v944_v51, %v938_v52 }
0x1853   :  { %948 = vrot.lane.b32.xlu2 %v946_v53, %s3465_s18 }
0x18ad   :  { %v949_v55 = vpop.permute.xlu2 %948 }
0x18ae   :  { %v951_v28 = vadd.f32 %v949_v55, %v941_v54 }
0x18b0   :  { %3198 = vtanh.f32 %v951_v28 }
0x18b6   :  { %v3199_v56 = vpop.eup %3198 }
0x18b7   :  { %954 = vrot.lane.b32.xlu0 %v3199_v56, %s3464_s17 }
0x1929   :  { %v955_v57 = vpop.permute.xlu0 %954 }
0x192a   :  { %v957_v58 = vmul.f32 %v955_v57, %v938_v52 }
0x192c   :  { %961 = vrot.lane.b32.xlu1 %v957_v58, %s3465_s18 }
0x199e   :  { %v962_v59 = vpop.permute.xlu1 %961 }
0x199f   :  { %3008 = vmatmul.msk.f32.vlgmr.msrb.gmra.mxu3 %vm246_vm5, %v962_v59 }
0x19a0   :  { %1367 = vmatpush.msrb.mxu3 %v3820_v30 }
0x19a2   :  { %1368 = vmatpush.msrb.mxu3 %v3826_v20 }
0x19a4   :  { %1369 = vmatpush.msrb.mxu3 %v3843_v60 }
0x19a6   :  { %1370 = vmatpush.msrb.mxu3 %v3849_v61 }
0x1a22   :  { %v982_v32 = vpop.f32.mrf.mxu3 }
0x1a23   :  { %v985_v63 = vadd.f32 %v982_v32, %v199_v62  ;;  %v205_v62 = vadd.f32 %v3866_v21, %v3693_v40 }
0x1a25   :  { %3200 = vtanh.f32 %v985_v63  ;;  %v3009_v1 = vmul.f32 -1.442695, %v985_v63 }
0x1a27   :  { %3202 = vpow2.f32 %v3009_v1 }
0x1a2b   :  { %v3201_v0 = vpop.eup %3200 }
0x1a2c   :  { %1008 = vrot.lane.b32.xlu2 %v3201_v0, %s3464_s17 }
0x1a2d   :  { %v3203_v3 = vpop.eup %3202 }
0x1a2e   :  { %v989_v5 = vadd.f32 1.0, %v3203_v3 }
0x1a30   :  { %3204 = vrcp.f32 %v989_v5  ;;  %v1001_v7 = vand.u32 2147483648, %v989_v5  ;;  %vm995_vm4 = vweird.f32 %v989_v5  ;;  %v999_v38 = vand.u32 2147483647, %v989_v5 }
0x1a32   :  { %v1002_v8 = vor.u32 1.1754944e-38, %v1001_v7  ;;  %vm1000_vm7 = vcmp.eq.f32.partialorder %v999_v38, 8.507059e+37 }
0x1a36   :  { %v3205_v2 = vpop.eup %3204 }
0x1a37   :  { %v991_v4 = vmul.f32 %v3205_v2, %v989_v5  ;;  %vm996_vm3 = vweird.f32 %v3205_v2 }
0x1a38   :  { %vm997_vm6 = vmor %vm995_vm4, %vm996_vm3 }
0x1a39   :  { %v992_v34 = vsub.f32 1.0, %v991_v4 }
0x1a3b   :  { %v993_v6 = vmul.f32 %v3205_v2, %v992_v34 }
0x1a3d   :  { %v994_v36 = vadd.f32 %v3205_v2, %v993_v6 }
0x1a3f   :  { %v998_v47 = vsel %vm997_vm6, %v3205_v2, %v994_v36 }
0x1a40   :  { %v1003_v26 = vsel %vm1000_vm7, %v1002_v8, %v998_v47 }
0x1a41   :  { %v1006_v12 = vmul.f32 %v1003_v26, %v951_v28 }
0x1a86   :  { %v1009_v9 = vpop.permute.xlu2 %1008 }
0x1a87   :  { %v1011_v10 = vmul.f32 %v1009_v9, %v1003_v26 }
0x1a89   :  { %1013 = vrot.lane.b32.xlu0 %v1011_v10, %s3465_s18 }
0x1afb   :  { %v1014_v13 = vpop.permute.xlu0 %1013 }
0x1afc   :  { %v1016_v14 = vadd.f32 %v1014_v13, %v1006_v12 }
0x1afe   :  { %3206 = vtanh.f32 %v1016_v14 }
0x1b04   :  { %v3207_v15 = vpop.eup %3206 }
0x1b05   :  { %1019 = vrot.lane.b32.xlu1 %v3207_v15, %s3464_s17 }
0x1b77   :  { %v1020_v16 = vpop.permute.xlu1 %1019 }
0x1b78   :  { %v1022_v18 = vmul.f32 %v1020_v16, %v1003_v26 }
0x1b7a   :  { %1026 = vrot.lane.b32.xlu2 %v1022_v18, %s3465_s18 }
0x1bd4   :  { %v1027_v19 = vpop.permute.xlu2 %1026 }
0x1bd5   :  { %3010 = vmatmul.msk.f32.vlgmr.msrb.gmra.mxu1 %vm246_vm5, %v1027_v19 }
0x1bd6   :  { %1432 = vmatpush.msrb.mxu1 %v3820_v30 }
0x1bd8   :  { %1433 = vmatpush.msrb.mxu1 %v3826_v20 }
0x1bda   :  { %1434 = vmatpush.msrb.mxu1 %v3843_v60 }
0x1bdc   :  { %1435 = vmatpush.msrb.mxu1 %v3849_v61 }
0x1c52   :  { %v1047_v23 = vpop.f32.mrf.mxu1 }
0x1c53   :  { %v1050_v25 = vadd.f32 %v1047_v23, %v202_v22 }
0x1c55   :  { %3208 = vtanh.f32 %v1050_v25  ;;  %v3011_v33 = vmul.f32 -1.442695, %v1050_v25 }
0x1c57   :  { %3210 = vpow2.f32 %v3011_v33 }
0x1c5b   :  { %v3209_v27 = vpop.eup %3208 }
0x1c5c   :  { %1073 = vrot.lane.b32.xlu0 %v3209_v27, %s3464_s17 }
0x1c5d   :  { %v3211_v29 = vpop.eup %3210 }
0x1c5e   :  { %v1054_v24 = vadd.f32 1.0, %v3211_v29 }
0x1c60   :  { %3212 = vrcp.f32 %v1054_v24  ;;  %v1066_v37 = vand.u32 2147483648, %v1054_v24  ;;  %vm1060_vm9 = vweird.f32 %v1054_v24  ;;  %v1064_v39 = vand.u32 2147483647, %v1054_v24 }
0x1c62   :  { %v1067_v50 = vor.u32 1.1754944e-38, %v1066_v37  ;;  %vm1065_vm11 = vcmp.eq.f32.partialorder %v1064_v39, 8.507059e+37 }
0x1c66   :  { %v3213_v31 = vpop.eup %3212 }
0x1c67   :  { %v1056_v48 = vmul.f32 %v3213_v31, %v1054_v24  ;;  %vm1061_vm8 = vweird.f32 %v3213_v31 }
0x1c68   :  { %vm1062_vm10 = vmor %vm1060_vm9, %vm1061_vm8 }
0x1c69   :  { %v1057_v11 = vsub.f32 1.0, %v1056_v48 }
0x1c6b   :  { %v1058_v35 = vmul.f32 %v3213_v31, %v1057_v11 }
0x1c6d   :  { %v1059_v17 = vadd.f32 %v3213_v31, %v1058_v35 }
0x1c6f   :  { %v1063_v49 = vsel %vm1062_vm10, %v3213_v31, %v1059_v17 }
0x1c70   :  { %v1068_v52 = vsel %vm1065_vm11, %v1067_v50, %v1063_v49 }
0x1c71   :  { %v1071_v54 = vmul.f32 %v1068_v52, %v1016_v14  ;;  %v208_v14 = vadd.f32 %v3866_v21, %v3695_v41 }
0x1cce   :  { %v1074_v51 = vpop.permute.xlu0 %1073 }
0x1ccf   :  { %v1076_v53 = vmul.f32 %v1074_v51, %v1068_v52 }
0x1cd1   :  { %1078 = vrot.lane.b32.xlu1 %v1076_v53, %s3465_s18 }
0x1d43   :  { %v1079_v55 = vpop.permute.xlu1 %1078 }
0x1d44   :  { %v1081_v28 = vadd.f32 %v1079_v55, %v1071_v54  ;;  %v211_v55 = vadd.f32 %v3866_v21, %v3697_v42 }
0x1d46   :  { %3214 = vtanh.f32 %v1081_v28 }
0x1d4c   :  { %v3215_v56 = vpop.eup %3214 }
0x1d4d   :  { %1084 = vrot.lane.b32.xlu2 %v3215_v56, %s3464_s17 }
0x1da7   :  { %v1085_v57 = vpop.permute.xlu2 %1084 }
0x1da8   :  { %v1087_v58 = vmul.f32 %v1085_v57, %v1068_v52 }
0x1daa   :  { %1091 = vrot.lane.b32.xlu0 %v1087_v58, %s3465_s18 }
0x1e1c   :  { %v1092_v59 = vpop.permute.xlu0 %1091 }
0x1e1d   :  { %3012 = vmatmul.msk.f32.vlgmr.msra.gmra.mxu2 %vm246_vm5, %v1092_v59 }
0x1e1e   :  { %1497 = vmatpush.msra.mxu2 %v3820_v30 }
0x1e20   :  { %1498 = vmatpush.msra.mxu2 %v3826_v20 }
0x1e22   :  { %1499 = vmatpush.msra.mxu2 %v3843_v60 }
0x1e24   :  { %1500 = vmatpush.msra.mxu2 %v3849_v61 }
0x1ea0   :  { %v1112_v32 = vpop.f32.mrf.mxu2 }
0x1ea1   :  { %v1115_v63 = vadd.f32 %v1112_v32, %v205_v62 }
0x1ea3   :  { %3216 = vtanh.f32 %v1115_v63  ;;  %v3013_v1 = vmul.f32 -1.442695, %v1115_v63 }
0x1ea5   :  { %3218 = vpow2.f32 %v3013_v1 }
0x1ea9   :  { %v3217_v0 = vpop.eup %3216 }
0x1eaa   :  { %1138 = vrot.lane.b32.xlu1 %v3217_v0, %s3464_s17 }
0x1eab   :  { %v3219_v3 = vpop.eup %3218 }
0x1eac   :  { %v1119_v5 = vadd.f32 1.0, %v3219_v3 }
0x1eae   :  { %3220 = vrcp.f32 %v1119_v5  ;;  %v1131_v61 = vand.u32 2147483648, %v1119_v5  ;;  %vm1125_vm13 = vweird.f32 %v1119_v5  ;;  %v1129_v40 = vand.u32 2147483647, %v1119_v5 }
0x1eb0   :  { %v1132_v6 = vor.u32 1.1754944e-38, %v1131_v61  ;;  %vm1130_vm15 = vcmp.eq.f32.partialorder %v1129_v40, 8.507059e+37 }
0x1eb4   :  { %v3221_v30 = vpop.eup %3220 }
0x1eb5   :  { %v1121_v20 = vmul.f32 %v3221_v30, %v1119_v5  ;;  %vm1126_vm12 = vweird.f32 %v3221_v30 }
0x1eb6   :  { %vm1127_vm14 = vmor %vm1125_vm13, %vm1126_vm12 }
0x1eb7   :  { %v1122_v2 = vsub.f32 1.0, %v1121_v20 }
0x1eb9   :  { %v1123_v60 = vmul.f32 %v3221_v30, %v1122_v2 }
0x1ebb   :  { %v1124_v4 = vadd.f32 %v3221_v30, %v1123_v60 }
0x1ebd   :  { %v1128_v34 = vsel %vm1127_vm14, %v3221_v30, %v1124_v4 }
0x1ebe   :  { %v1133_v7 = vsel %vm1130_vm15, %v1132_v6, %v1128_v34 }
0x1ebf   :  { %v1136_v47 = vmul.f32 %v1133_v7, %v1081_v28 }
0x1f1c   :  { %v1139_v36 = vpop.permute.xlu1 %1138 }
0x1f1d   :  { %v1141_v38 = vmul.f32 %v1139_v36, %v1133_v7 }
0x1f1f   :  { %1143 = vrot.lane.b32.xlu2 %v1141_v38, %s3465_s18 }
0x1f79   :  { %v1144_v8 = vpop.permute.xlu2 %1143 }
0x1f7a   :  { %v1146_v9 = vadd.f32 %v1144_v8, %v1136_v47  ;;  %v214_v47 = vadd.f32 %v3866_v21, %v3699_v43 }
0x1f7c   :  { %3222 = vtanh.f32 %v1146_v9 }
0x1f82   :  { %v3223_v26 = vpop.eup %3222 }
0x1f83   :  { %1149 = vrot.lane.b32.xlu0 %v3223_v26, %s3464_s17 }
0x1ff5   :  { %v1150_v10 = vpop.permute.xlu0 %1149 }
0x1ff6   :  { %v1152_v12 = vmul.f32 %v1150_v10, %v1133_v7 }
0x1ff8   :  { %1156 = vrot.lane.b32.xlu1 %v1152_v12, %s3465_s18 }
0x206a   :  { %v1157_v13 = vpop.permute.xlu1 %1156 }
0x206b   :  { %3014 = vmatmul.msk.f32.vlgmr.msra.gmra.mxu3 %vm246_vm5, %v1157_v13 }
0x20ee   :  { %v1177_v15 = vpop.f32.mrf.mxu3 }
0x20ef   :  { %v1180_v16 = vadd.f32 %v1177_v15, %v208_v14 }
0x20f1   :  { %3224 = vtanh.f32 %v1180_v16  ;;  %v3015_v19 = vmul.f32 -1.442695, %v1180_v16 }
0x20f3   :  { %3226 = vpow2.f32 %v3015_v19 }
0x20f7   :  { %v3225_v18 = vpop.eup %3224 }
0x20f8   :  { %1203 = vrot.lane.b32.xlu2 %v3225_v18, %s3464_s17 }
0x20f9   :  { %v3227_v22 = vpop.eup %3226 }
0x20fa   :  { %v1184_v23 = vadd.f32 1.0, %v3227_v22 }
0x20fc   :  { %3228 = vrcp.f32 %v1184_v23  ;;  %v1196_v31 = vand.u32 2147483648, %v1184_v23  ;;  %vm1190_vm2 = vweird.f32 %v1184_v23  ;;  %v1194_v41 = vand.u32 2147483647, %v1184_v23 }
0x20fe   :  { %v1197_v11 = vor.u32 1.1754944e-38, %v1196_v31  ;;  %vm1195_vm4 = vcmp.eq.f32.partialorder %v1194_v41, 8.507059e+37 }
0x2102   :  { %v3229_v25 = vpop.eup %3228 }
0x2103   :  { %v1186_v27 = vmul.f32 %v3229_v25, %v1184_v23  ;;  %vm1191_vm1 = vweird.f32 %v3229_v25 }
0x2104   :  { %vm1192_vm3 = vmor %vm1190_vm2, %vm1191_vm1 }
0x2105   :  { %v1187_v33 = vsub.f32 1.0, %v1186_v27 }
0x2107   :  { %v1188_v29 = vmul.f32 %v3229_v25, %v1187_v33 }
0x2109   :  { %v1189_v24 = vadd.f32 %v3229_v25, %v1188_v29 }
0x210b   :  { %v1193_v48 = vsel %vm1192_vm3, %v3229_v25, %v1189_v24 }
0x210c   :  { %v1198_v17 = vsel %vm1195_vm4, %v1197_v11, %v1193_v48 }
0x210d   :  { %v1201_v39 = vmul.f32 %v1198_v17, %v1146_v9 }
0x2152   :  { %v1204_v35 = vpop.permute.xlu2 %1203 }
0x2153   :  { %v1206_v37 = vmul.f32 %v1204_v35, %v1198_v17 }
0x2155   :  { %1208 = vrot.lane.b32.xlu0 %v1206_v37, %s3465_s18  ;;  %v217_v37 = vadd.f32 %v3866_v21, %v3701_v44 }
0x21c7   :  { %v1209_v49 = vpop.permute.xlu0 %1208 }
0x21c8   :  { %v1211_v50 = vadd.f32 %v1209_v49, %v1201_v39 }
0x21ca   :  { %3230 = vtanh.f32 %v1211_v50 }
0x21d0   :  { %v3231_v51 = vpop.eup %3230 }
0x21d1   :  { %1214 = vrot.lane.b32.xlu1 %v3231_v51, %s3464_s17 }
0x2243   :  { %v1215_v52 = vpop.permute.xlu1 %1214 }
0x2244   :  { %v1217_v53 = vmul.f32 %v1215_v52, %v1198_v17 }
0x2246   :  { %1221 = vrot.lane.b32.xlu2 %v1217_v53, %s3465_s18 }
0x22a0   :  { %v1222_v54 = vpop.permute.xlu2 %1221 }
0x22a1   :  { %3016 = vmatmul.msk.f32.vlgmr.msra.gmra.mxu1 %vm246_vm5, %v1222_v54 }
0x231e   :  { %v1242_v28 = vpop.f32.mrf.mxu1 }
0x231f   :  { %v1245_v56 = vadd.f32 %v1242_v28, %v211_v55 }
0x2321   :  { %3232 = vtanh.f32 %v1245_v56  ;;  %v3017_v58 = vmul.f32 -1.442695, %v1245_v56 }
0x2323   :  { %3234 = vpow2.f32 %v3017_v58 }
0x2327   :  { %v3233_v57 = vpop.eup %3232 }
0x2328   :  { %1268 = vrot.lane.b32.xlu0 %v3233_v57, %s3464_s17 }
0x2329   :  { %v3235_v59 = vpop.eup %3234 }
0x232a   :  { %v1249_v62 = vadd.f32 1.0, %v3235_v59 }
0x232c   :  { %3236 = vrcp.f32 %v1249_v62  ;;  %v1261_v5 = vand.u32 2147483648, %v1249_v62  ;;  %vm1255_vm7 = vweird.f32 %v1249_v62  ;;  %v1259_v42 = vand.u32 2147483647, %v1249_v62 }
0x232e   :  { %v1262_v20 = vor.u32 1.1754944e-38, %v1261_v5  ;;  %vm1260_vm9 = vcmp.eq.f32.partialorder %v1259_v42, 8.507059e+37 }
0x2332   :  { %v3237_v32 = vpop.eup %3236 }
0x2333   :  { %v1251_v63 = vmul.f32 %v3237_v32, %v1249_v62  ;;  %vm1256_vm6 = vweird.f32 %v3237_v32 }
0x2334   :  { %vm1257_vm8 = vmor %vm1255_vm7, %vm1256_vm6 }
0x2335   :  { %v1252_v0 = vsub.f32 1.0, %v1251_v63 }
0x2337   :  { %v1253_v1 = vmul.f32 %v3237_v32, %v1252_v0 }
0x2339   :  { %v1254_v3 = vadd.f32 %v3237_v32, %v1253_v1 }
0x233b   :  { %v1258_v30 = vsel %vm1257_vm8, %v3237_v32, %v1254_v3 }
0x233c   :  { %v1263_v60 = vsel %vm1260_vm9, %v1262_v20, %v1258_v30 }
0x233d   :  { %v1266_v61 = vmul.f32 %v1263_v60, %v1211_v50 }
0x239a   :  { %v1269_v2 = vpop.permute.xlu0 %1268 }
0x239b   :  { %v1271_v4 = vmul.f32 %v1269_v2, %v1263_v60 }
0x239d   :  { %1273 = vrot.lane.b32.xlu1 %v1271_v4, %s3465_s18 }
0x240f   :  { %v1274_v40 = vpop.permute.xlu1 %1273 }
0x2410   :  { %v1276_v34 = vadd.f32 %v1274_v40, %v1266_v61 }
0x2412   :  { %3238 = vtanh.f32 %v1276_v34 }
0x2418   :  { %v3239_v6 = vpop.eup %3238 }
0x2419   :  { %1279 = vrot.lane.b32.xlu2 %v3239_v6, %s3464_s17 }
0x2473   :  { %v1280_v36 = vpop.permute.xlu2 %1279 }
0x2474   :  { %v1282_v7 = vmul.f32 %v1280_v36, %v1263_v60  ;;  %v220_v60 = vadd.f32 %v3866_v21, %v3703_v45 }
0x2476   :  { %1286 = vrot.lane.b32.xlu0 %v1282_v7, %s3465_s18 }
0x24e8   :  { %v1287_v38 = vpop.permute.xlu0 %1286 }
0x24e9   :  { %3018 = vmatmul.msk.f32.vlgmr.msrb.gmra.mxu2 %vm246_vm5, %v1287_v38 }
0x256c   :  { %v1307_v8 = vpop.f32.mrf.mxu2 }
0x256d   :  { %v1310_v9 = vadd.f32 %v1307_v8, %v214_v47 }
0x256f   :  { %3240 = vtanh.f32 %v1310_v9  ;;  %v3019_v10 = vmul.f32 -1.442695, %v1310_v9 }
0x2571   :  { %3242 = vpow2.f32 %v3019_v10 }
0x2575   :  { %v3241_v26 = vpop.eup %3240 }
0x2576   :  { %1333 = vrot.lane.b32.xlu1 %v3241_v26, %s3464_s17 }
0x2577   :  { %v3243_v12 = vpop.eup %3242 }
0x2578   :  { %v1314_v13 = vadd.f32 1.0, %v3243_v12 }
0x257a   :  { %3244 = vrcp.f32 %v1314_v13  ;;  %v1326_v22 = vand.u32 2147483648, %v1314_v13  ;;  %vm1320_vm11 = vweird.f32 %v1314_v13  ;;  %v1324_v43 = vand.u32 2147483647, %v1314_v13 }
0x257c   :  { %v1327_v25 = vor.u32 1.1754944e-38, %v1326_v22  ;;  %vm1325_vm13 = vcmp.eq.f32.partialorder %v1324_v43, 8.507059e+37 }
0x2580   :  { %v3245_v14 = vpop.eup %3244 }
0x2581   :  { %v1316_v15 = vmul.f32 %v3245_v14, %v1314_v13  ;;  %vm1321_vm10 = vweird.f32 %v3245_v14 }
0x2582   :  { %vm1322_vm12 = vmor %vm1320_vm11, %vm1321_vm10 }
0x2583   :  { %v1317_v16 = vsub.f32 1.0, %v1316_v15 }
0x2585   :  { %v1318_v18 = vmul.f32 %v3245_v14, %v1317_v16 }
0x2587   :  { %v1319_v19 = vadd.f32 %v3245_v14, %v1318_v18 }
0x2589   :  { %v1323_v23 = vsel %vm1322_vm12, %v3245_v14, %v1319_v19 }
0x258a   :  { %v1328_v33 = vsel %vm1325_vm13, %v1327_v25, %v1323_v23 }
0x258b   :  { %v1331_v24 = vmul.f32 %v1328_v33, %v1276_v34 }
0x25e8   :  { %v1334_v27 = vpop.permute.xlu1 %1333 }
0x25e9   :  { %v1336_v29 = vmul.f32 %v1334_v27, %v1328_v33  ;;  %v223_v27 = vadd.f32 %v3866_v21, %v3705_v46 }
0x25eb   :  { %1338 = vrot.lane.b32.xlu2 %v1336_v29, %s3465_s18 }
0x2645   :  { %v1339_v31 = vpop.permute.xlu2 %1338 }
0x2646   :  { %v1341_v41 = vadd.f32 %v1339_v31, %v1331_v24 }
0x2648   :  { %3246 = vtanh.f32 %v1341_v41 }
0x264e   :  { %v3247_v48 = vpop.eup %3246 }
0x264f   :  { %1344 = vrot.lane.b32.xlu0 %v3247_v48, %s3464_s17 }
0x26c1   :  { %v1345_v11 = vpop.permute.xlu0 %1344 }
0x26c2   :  { %v1347_v35 = vmul.f32 %v1345_v11, %v1328_v33 }
0x26c4   :  { %1351 = vrot.lane.b32.xlu1 %v1347_v35, %s3465_s18 }
0x2736   :  { %v1352_v17 = vpop.permute.xlu1 %1351 }
0x2737   :  { %3020 = vmatmul.msk.f32.vlgmr.msrb.gmra.mxu3 %vm246_vm5, %v1352_v17 }
0x27ba   :  { %v1372_v39 = vpop.f32.mrf.mxu3 }
0x27bb   :  { %v1375_v49 = vadd.f32 %v1372_v39, %v217_v37 }
0x27bd   :  { %3248 = vtanh.f32 %v1375_v49  ;;  %v3021_v51 = vmul.f32 -1.442695, %v1375_v49 }
0x27bf   :  { %3250 = vpow2.f32 %v3021_v51 }
0x27c3   :  { %v3249_v50 = vpop.eup %3248 }
0x27c4   :  { %1398 = vrot.lane.b32.xlu2 %v3249_v50, %s3464_s17 }
0x27c5   :  { %v3251_v52 = vpop.eup %3250 }
0x27c6   :  { %v1379_v53 = vadd.f32 1.0, %v3251_v52 }
0x27c8   :  { %3252 = vrcp.f32 %v1379_v53  ;;  %v1391_v58 = vand.u32 2147483648, %v1379_v53  ;;  %vm1385_vm15 = vweird.f32 %v1379_v53  ;;  %v1389_v44 = vand.u32 2147483647, %v1379_v53 }
0x27ca   :  { %v1392_v62 = vor.u32 1.1754944e-38, %v1391_v58  ;;  %vm1390_vm2 = vcmp.eq.f32.partialorder %v1389_v44, 8.507059e+37 }
0x27ce   :  { %v3253_v54 = vpop.eup %3252 }
0x27cf   :  { %v1381_v55 = vmul.f32 %v3253_v54, %v1379_v53  ;;  %vm1386_vm14 = vweird.f32 %v3253_v54 }
0x27d0   :  { %vm1387_vm1 = vmor %vm1385_vm15, %vm1386_vm14 }
0x27d1   :  { %v1382_v28 = vsub.f32 1.0, %v1381_v55 }
0x27d3   :  { %v1383_v56 = vmul.f32 %v3253_v54, %v1382_v28 }
0x27d5   :  { %v1384_v57 = vadd.f32 %v3253_v54, %v1383_v56 }
0x27d7   :  { %v1388_v59 = vsel %vm1387_vm1, %v3253_v54, %v1384_v57 }
0x27d8   :  { %v1393_v63 = vsel %vm1390_vm2, %v1392_v62, %v1388_v59  ;;  %v72_v59 = vld [vmem:[%s4331_s4 + $0x18] sm:$0xff]  ;;  %v71_v62 = vld [vmem:[%s4331_s4 + $0x10] sm:$0xff] }
0x27d9   :  { %v1396_v1 = vmul.f32 %v1393_v63, %v1341_v41  ;;  %1570 = vmatpush.msra.mxu3 %v72_v59 }
0x27db   :  { %1571 = vmatpush.msra.mxu3 %v71_v62 }
0x281e   :  { %v1399_v32 = vpop.permute.xlu2 %1398 }
0x281f   :  { %v1401_v0 = vmul.f32 %v1399_v32, %v1393_v63  ;;  %v70_v32 = vld [vmem:[%s4331_s4 + $0x8] sm:$0xff] }
0x2820   :  { %1572 = vmatpush.msra.mxu3 %v70_v32 }
0x2821   :  { %1403 = vrot.lane.b32.xlu0 %v1401_v0, %s3465_s18 }
0x2893   :  { %v1404_v3 = vpop.permute.xlu0 %1403 }
0x2894   :  { %v1406_v5 = vadd.f32 %v1404_v3, %v1396_v1  ;;  %v81_v3 = vld [vmem:[%s4336_s9] sm:$0xff] }
0x2896   :  { %3254 = vtanh.f32 %v1406_v5 }
0x289c   :  { %v3255_v42 = vpop.eup %3254 }
0x289d   :  { %1409 = vrot.lane.b32.xlu1 %v3255_v42, %s3464_s17 }
0x290f   :  { %v1410_v30 = vpop.permute.xlu1 %1409 }
0x2910   :  { %v1412_v20 = vmul.f32 %v1410_v30, %v1393_v63  ;;  %v69_v63 = vld [vmem:[%s4331_s4] sm:$0xff]  ;;  %v80_v30 = vld [vmem:[%s4335_s8 + $0x18] sm:$0xff] }
0x2911   :  { %1573 = vmatpush.msra.mxu3 %v69_v63  ;;  %1634 = vmatpush.msrb.mxu2 %v80_v30 }
0x2912   :  { %1416 = vrot.lane.b32.xlu2 %v1412_v20, %s3465_s18  ;;  %1607 = vmatpush.msra.mxu1 %v80_v30  ;;  %v79_v20 = vld [vmem:[%s4335_s8 + $0x10] sm:$0xff] }
0x2913   :  { %1635 = vmatpush.msrb.mxu2 %v79_v20 }
0x2914   :  { %1608 = vmatpush.msra.mxu1 %v79_v20 }
0x296c   :  { %v1417_v2 = vpop.permute.xlu2 %1416 }
0x296d   :  { %3022 = vmatmul.msk.f32.vlgmr.msrb.gmra.mxu1 %vm246_vm5, %v1417_v2  ;;  %v78_v2 = vld [vmem:[%s4335_s8 + $0x8] sm:$0xff] }
0x296e   :  { %1636 = vmatpush.msrb.mxu2 %v78_v2  ;;  %1609 = vmatpush.msra.mxu1 %v78_v2 }
0x29ea   :  { %v1437_v4 = vpop.f32.mrf.mxu1 }
0x29eb   :  { %v1440_v61 = vadd.f32 %v1437_v4, %v220_v60  ;;  %v77_v60 = vld [vmem:[%s4335_s8] sm:$0xff] }
0x29ec   :  { %1637 = vmatpush.msrb.mxu2 %v77_v60  ;;  %v76_v4 = vld [vmem:[%s4334_s7] sm:$0x1]  ;;  %1610 = vmatpush.msra.mxu1 %v77_v60 }
0x29ed   :  { %3256 = vtanh.f32 %v1440_v61  ;;  %v3023_v34 = vmul.f32 -1.442695, %v1440_v61  ;;  %v74_v61 = vld [vmem:[%s4333_s6] sm:$0xff] }
0x29ee   :  { %3029 = vmatmul.msk.f32.vlgmr.msra.gmra.mxu1 %vm246_vm5, %v74_v61 }
0x29ef   :  { %3258 = vpow2.f32 %v3023_v34 }
0x29f3   :  { %v3257_v40 = vpop.eup %3256 }
0x29f4   :  { %1463 = vrot.lane.b32.xlu0 %v3257_v40, %s3464_s17  ;;  %v75_v40 = vld [vmem:[%s4333_s6 + $0x8] sm:$0xff]  ;;  %s3466_s6 = smov 16  }
0x29f5   :  { %v3259_v6 = vpop.eup %3258  ;;  %v1646_v34 = vpack.c.bf16 %v75_v40, %v74_v61 }
0x29f6   :  { %v1444_v36 = vadd.f32 1.0, %v3259_v6  ;;  %v1644_v6 = vpack.c.bf16 %v80_v30, %v79_v20  ;;  %3030 = vmatmul.msk.f32.gmra.mxu1 %vm246_vm5, %v75_v40 }
0x29f8   :  { %3260 = vrcp.f32 %v1444_v36  ;;  %v1456_v26 = vand.u32 2147483648, %v1444_v36  ;;  %vm1450_vm4 = vweird.f32 %v1444_v36  ;;  %v1454_v45 = vand.u32 2147483647, %v1444_v36  ;;  %1693 = vmatpush.bf16.msrb.mxu1 %v1644_v6 }
0x29fa   :  { %v1457_v12 = vor.u32 1.1754944e-38, %v1456_v26  ;;  %vm1455_vm7 = vcmp.eq.f32.partialorder %v1454_v45, 8.507059e+37 }
0x29fe   :  { %v3261_v7 = vpop.eup %3260 }
0x29ff   :  { %v1446_v38 = vmul.f32 %v3261_v7, %v1444_v36  ;;  %vm1451_vm3 = vweird.f32 %v3261_v7  ;;  %v3109_v36 = vld [vmem:[%s4332_s5] ss:$0 sm:$0xff] }
0x2a00   :  { %vm1452_vm6 = vmor %vm1450_vm4, %vm1451_vm3 }
0x2a01   :  { %v1447_v47 = vsub.f32 1.0, %v1446_v38 }
0x2a03   :  { %v1448_v8 = vmul.f32 %v3261_v7, %v1447_v47 }
0x2a05   :  { %v1449_v9 = vadd.f32 %v3261_v7, %v1448_v8 }
0x2a07   :  { %v1453_v10 = vsel %vm1452_vm6, %v3261_v7, %v1449_v9 }
0x2a08   :  { %v1458_v14 = vsel %vm1455_vm7, %v1457_v12, %v1453_v10 }
0x2a09   :  { %v1461_v16 = vmul.f32 %v1458_v14, %v1406_v5  ;;  %v82_v5 = vld [vmem:[%s4336_s9 + $0x8] sm:$0xff] }
0x2a0a   :  { %v1645_v42 = vpack.c.bf16 %v82_v5, %v81_v3 }
0x2a0c   :  { %1678 = vmatpush.bf16.msrb.mxu3 %v1645_v42 }
0x2a66   :  { %v1464_v13 = vpop.permute.xlu0 %1463 }
0x2a67   :  { %v1466_v15 = vmul.f32 %v1464_v13, %v1458_v14 }
0x2a69   :  { %1468 = vrot.lane.b32.xlu1 %v1466_v15, %s3465_s18 }
0x2adb   :  { %v1469_v18 = vpop.permute.xlu1 %1468 }
0x2adc   :  { %v1471_v19 = vadd.f32 %v1469_v18, %v1461_v16 }
0x2ade   :  { %3262 = vtanh.f32 %v1471_v19 }
0x2ae4   :  { %v3263_v22 = vpop.eup %3262 }
0x2ae5   :  { %1474 = vrot.lane.b32.xlu2 %v3263_v22, %s3464_s17 }
0x2b3f   :  { %v1475_v43 = vpop.permute.xlu2 %1474 }
0x2b40   :  { %v1477_v23 = vmul.f32 %v1475_v43, %v1458_v14 }
0x2b42   :  { %1481 = vrot.lane.b32.xlu0 %v1477_v23, %s3465_s18 }
0x2bb4   :  { %v1482_v25 = vpop.permute.xlu0 %1481 }
0x2bb5   :  { %3024 = vmatmul.msk.f32.vlgmr.msra.gmra.mxu2 %vm246_vm5, %v1482_v25 }
0x2bb6   :  { %1660 = vmatpush.bf16.msra.mxu2 %v1646_v34 }
0x2bbd   :  { %3031 = vmatmul.msk.f32.vlgmr.msrb.gmra.mxu2 %vm246_vm5, %v76_v4 }
0x2c38   :  { %v1502_v33 = vpop.f32.mrf.mxu2 }
0x2c39   :  { %v1505_v29 = vadd.f32 %v1502_v33, %v223_v27  ;;  %v1643_v27 = vpack.c.bf16 %v78_v2, %v77_v60  ;;  %v1612_v33 = vpop.f32.mrf.mxu1 }
0x2c3b   :  { %3264 = vtanh.f32 %v1505_v29  ;;  %v3025_v31 = vmul.f32 -1.442695, %v1505_v29  ;;  %1694 = vmatpush.bf16.msrb.mxu1 %v1643_v27 }
0x2c3d   :  { %3266 = vpow2.f32 %v3025_v31 }
0x2c41   :  { %v3265_v24 = vpop.eup %3264  ;;  %v1615_v31 = vpop.f32.mrf.mxu1 }
0x2c42   :  { %1528 = vrot.lane.b32.xlu1 %v3265_v24, %s3464_s17  ;;  %v1613_v24 = vadd.f32 %v1612_v33, %v81_v3 }
0x2c43   :  { %v3267_v41 = vpop.eup %3266 }
0x2c44   :  { %v1509_v48 = vadd.f32 1.0, %v3267_v41  ;;  %v1616_v41 = vadd.f32 %v1615_v31, %v82_v5 }
0x2c46   :  { %3268 = vrcp.f32 %v1509_v48  ;;  %v1521_v49 = vand.u32 2147483648, %v1509_v48  ;;  %vm1515_vm9 = vweird.f32 %v1509_v48  ;;  %v1519_v46 = vand.u32 2147483647, %v1509_v48 }
0x2c48   :  { %v1522_v50 = vor.u32 1.1754944e-38, %v1521_v49  ;;  %vm1520_vm11 = vcmp.eq.f32.partialorder %v1519_v46, 8.507059e+37 }
0x2c4c   :  { %v3269_v11 = vpop.eup %3268 }
0x2c4d   :  { %v1511_v35 = vmul.f32 %v3269_v11, %v1509_v48  ;;  %vm1516_vm8 = vweird.f32 %v3269_v11 }
0x2c4e   :  { %vm1517_vm10 = vmor %vm1515_vm9, %vm1516_vm8 }
0x2c4f   :  { %v1512_v17 = vsub.f32 1.0, %v1511_v35  ;;  %v1639_v35 = vpop.f32.mrf.mxu2 }
0x2c51   :  { %v1513_v37 = vmul.f32 %v3269_v11, %v1512_v17  ;;  %v3111_v17 = vld [vmem:[%s4334_s7] ss:$0 sm:$0xff]  ;;  %s3468_s7 = smov 80  }
0x2c53   :  { %v1514_v39 = vadd.f32 %v3269_v11, %v1513_v37 }
0x2c55   :  { %v1518_v21 = vsel %vm1517_vm10, %v3269_v11, %v1514_v39  ;;  %v3980_v11 = vpack.c.bf16 %v1616_v41, %v1613_v24 }
0x2c56   :  { %v1523_v52 = vsel %vm1520_vm11, %v1522_v50, %v1518_v21  ;;  %v3110_v21 = vld [vmem:[%s4337_s10] ss:$0 sm:$0xff] }
0x2c57   :  { %v1526_v54 = vmul.f32 %v1523_v52, %v1471_v19  ;;  %1765 = vmatpush.bf16.msrb.mxu2 %v3980_v11  ;;  %1891 = vmatpush.bf16.msra.mxu1 %v3980_v11 }
0x2c58   :  { %2710 = vmatpush.bf16.msra.mxu0 %v3980_v11 }
0x2cb4   :  { %v1529_v51 = vpop.permute.xlu1 %1528 }
0x2cb5   :  { %v1531_v53 = vmul.f32 %v1529_v51, %v1523_v52 }
0x2cb7   :  { %1533 = vrot.lane.b32.xlu2 %v1531_v53, %s3465_s18 }
0x2d11   :  { %v1534_v55 = vpop.permute.xlu2 %1533 }
0x2d12   :  { %v1536_v28 = vadd.f32 %v1534_v55, %v1526_v54 }
0x2d14   :  { %3270 = vtanh.f32 %v1536_v28  ;;  %1544 = vrot.lane.b32.xlu2 %v1536_v28, %s3464_s17 }
0x2d1a   :  { %v3271_v56 = vpop.eup %3270 }
0x2d1b   :  { %1539 = vrot.lane.b32.xlu0 %v3271_v56, %s3464_s17 }
0x2d6e   :  { %v1545_v57 = vpop.permute.xlu2 %1544 }
0x2d6f   :  { %1552 = vrot.lane.b32.xlu0 %v1545_v57, %s3465_s18 }
0x2d8d   :  { %v1540_v58 = vpop.permute.xlu0 %1539 }
0x2d8e   :  { %v1542_v44 = vmul.f32 %v1540_v58, %v1523_v52 }
0x2d90   :  { %1550 = vrot.lane.b32.xlu1 %v1542_v44, %s3465_s18 }
0x2de1   :  { %v1553_v1 = vpop.permute.xlu0 %1552 }
0x2e02   :  { %v1551_v0 = vpop.permute.xlu1 %1550 }
0x2e03   :  { %3026 = vmatmul.msk.f32.vlgmr.msra.gmra.mxu3 %vm246_vm5, %v1551_v0 }
0x2e04   :  { %1828 = vmatpush.bf16.msra.mxu3 %v3980_v11 }
0x2e0b   :  { %3027 = vmatmul.msk.f32.gmra.mxu3 %vm246_vm5, %v1553_v1 }
0x2e86   :  { %v1575_v7 = vpop.f32.mrf.mxu3 }
0x2e87   :  { %v1576_v38 = vadd.f32 %v3109_v36, %v1575_v7 }
0x2e89   :  { %v1581_v47 = vadd.f32 1.0, %v1576_v38  ;;  %v1667_v8 = vpack.c.bf16 %v1576_v38, %v1576_v38 }
0x2e8b   :  { %v1582_v9 = vmul.f32 0.5, %v1581_v47  ;;  %3033 = vmatmul.msk.bf16.vlgmr.msrb.gmra.mxu3 %vm87_vm0, %v1667_v8 }
0x2e8c   :  { %2017 = vmatpush.bf16.msrb.mxu3 %v3980_v11 }
0x2e8d   :  { %v1583_v26 = vmax.f32 %v1582_v9, 0.0 }
0x2e8e   :  { %v1578_v45 = vpop.f32.mrf.mxu3 }
0x2e8f   :  { %v1584_v10 = vmin.f32 %v1583_v26, 1.0  ;;  %v1579_v12 = vadd.f32 %v3109_v36, %v1578_v45  ;;  %v83_v36 = vld [vmem:[%s4337_s10] sm:$0x1] }
0x2e90   :  { %v1640_v7 = vadd.f32 %v1639_v35, %v83_v36 }
0x2e91   :  { %v3095_v13 = vcvt.f32.s32 %v1584_v10  ;;  %1725 = vrot.lane.b32.xlu2 %v1579_v12, %s3466_s6  ;;  %v3093_v15 = vand.u32 2147483647, %v1584_v10  ;;  %v3098_v18 = vand.u32 2147483648, %v1584_v10 }
0x2e92   :  { %v4009_v38 = vperm.slane %v1640_v7, 0 }
0x2e93   :  { %v3096_v14 = vcvt.s32.f32 %v3095_v13  ;;  %vm3094_vm12 = vcmp.lt.f32.partialorder %v3093_v15, 8388608.0 }
0x2e95   :  { %v3097_v16 = vand.u32 2147483647, %v3096_v14 }
0x2e97   :  { %v3099_v19 = vor.u32 %v3098_v18, %v3097_v16 }
0x2e99   :  { %v3100_v22 = vsel %vm3094_vm12, %v3099_v19, %v1584_v10 }
0x2e9a   :  { %v1586_v43 = vmul.f32 2.0, %v3100_v22 }
0x2e9c   :  { %v3028_v23 = vadd.f32 -1.0, %v1586_v43 }
0x2e9e   :  { %1588 = vst.msk [vmem:[#allocation3] sm:$0xff] %vm87_vm0, %v3028_v23  ;;  %v1647_v25 = vpack.c.bf16 %v3028_v23, %v3028_v23 }
0x2e9f   :  { %2959 = dma.vmem_to_hbm [thread:$0]  %s2955_s16, 128, %s2957_s19, [#allocation4]  }
0x2ea0   :  { %3032 = vmatmul.msk.bf16.vlgmr.msra.gmra.mxu2 %vm87_vm0, %v1647_v25 }
0x2ea1   :  { %1954 = vmatpush.bf16.msra.mxu2 %v3980_v11 }
0x2eeb   :  { %v1726_v30 = vpop.permute.xlu2 %1725 }
0x2f0e   :  { %v1680_v29 = vpop.f32.mrf.mxu3 }
0x2f16   :  { %v1682_v48 = vpop.f32.mrf.mxu3 }
0x2f23   :  { %v1662_v37 = vpop.f32.mrf.mxu2 }
0x2f24   :  { %v1663_v39 = vadd.f32 %v3111_v17, %v1662_v37 }
0x2f26   :  { %v1666_v49 = vpack.c.bf16 %v1663_v39, %v1663_v39 }
0x2f28   :  { %3034 = vmatmul.msk.bf16.vlgmr.msrb.gmra.mxu1 %vm246_vm5, %v1666_v49 }
0x2f29   :  { %2080 = vmatpush.bf16.msrb.mxu1 %v3980_v11 }
0x2f2b   :  { %v1664_v46 = vpop.f32.mrf.mxu2 }
0x2fa5   :  { %v1696_v50 = vpop.f32.mrf.mxu1 }
0x2fa6   :  { %v1697_v51 = vadd.f32 %v1696_v50, %v1680_v29 }
0x2fa8   :  { %v1703_v52 = vadd.f32 %v3110_v21, %v1697_v51 }
0x2faa   :  { %3272 = vtanh.f32 %v1703_v52  ;;  %v3035_v55 = vmul.f32 -1.442695, %v1703_v52 }
0x2fac   :  { %3274 = vpow2.f32 %v3035_v55 }
0x2fad   :  { %v1698_v53 = vpop.f32.mrf.mxu1 }
0x2fb0   :  { %v3273_v54 = vpop.eup %3272 }
0x2fb1   :  { %1730 = vrot.lane.b32.xlu1 %v3273_v54, %s3467_s15 }
0x2fb2   :  { %v3275_v28 = vpop.eup %3274 }
0x2fb3   :  { %v1707_v56 = vadd.f32 1.0, %v3275_v28 }
0x2fb5   :  { %3276 = vrcp.f32 %v1707_v56  ;;  %v1719_v32 = vand.u32 2147483648, %v1707_v56  ;;  %vm1713_vm13 = vweird.f32 %v1707_v56  ;;  %v1717_v63 = vand.u32 2147483647, %v1707_v56 }
0x2fb7   :  { %v1720_v1 = vor.u32 1.1754944e-38, %v1719_v32  ;;  %vm1718_vm15 = vcmp.eq.f32.partialorder %v1717_v63, 8.507059e+37 }
0x2fbb   :  { %v3277_v57 = vpop.eup %3276 }
0x2fbc   :  { %v1709_v58 = vmul.f32 %v3277_v57, %v1707_v56  ;;  %vm1714_vm5 = vweird.f32 %v3277_v57 }
0x2fbd   :  { %vm1715_vm14 = vmor %vm1713_vm13, %vm1714_vm5 }
0x2fbe   :  { %v1710_v44 = vsub.f32 1.0, %v1709_v58 }
0x2fc0   :  { %v1711_v59 = vmul.f32 %v3277_v57, %v1710_v44 }
0x2fc2   :  { %v1712_v62 = vadd.f32 %v3277_v57, %v1711_v59 }
0x2fc4   :  { %v1716_v0 = vsel %vm1715_vm14, %v3277_v57, %v1712_v62 }
0x2fc5   :  { %v1721_v5 = vsel %vm1718_vm15, %v1720_v1, %v1716_v0 }
0x2fc6   :  { %v1728_v20 = vmul.f32 %v1726_v30, %v1721_v5 }
0x3023   :  { %v1731_v3 = vpop.permute.xlu1 %1730 }
0x3024   :  { %v1733_v42 = vmul.f32 %v1731_v3, %v1721_v5 }
0x3026   :  { %1735 = vrot.lane.b32.xlu0 %v1733_v42, %s3466_s6 }
0x3098   :  { %v1736_v2 = vpop.permute.xlu0 %1735 }
0x3099   :  { %v1738_v60 = vadd.f32 %v1736_v2, %v1728_v20 }
0x309b   :  { %3278 = vtanh.f32 %v1738_v60 }
0x30a1   :  { %v3279_v4 = vpop.eup %3278 }
0x30a2   :  { %1741 = vrot.lane.b32.xlu1 %v3279_v4, %s3465_s18 }
0x3114   :  { %v1742_v61 = vpop.permute.xlu1 %1741 }
0x3115   :  { %v3999_v40 = vmul.f32 %v1742_v61, %v1721_v5 }
0x3117   :  { %v1751_v34 = vpack.c.bf16 %v3999_v40, %v3999_v40 }
0x3119   :  { %1753 = vrot.lane.b32.xlu2 %v1751_v34, %s3468_s7 }
0x3173   :  { %v1754_v6 = vpop.permute.xlu2 %1753 }
0x3174   :  { %3037 = vmatmul.msk.bf16.vlgmr.msrb.gmra.mxu2 %vm87_vm0, %v1754_v6 }
0x3175   :  { %2143 = vmatpush.bf16.msrb.mxu2 %v3980_v11 }
0x31f7   :  { %v1767_v47 = vpop.f32.mrf.mxu2 }
0x31f8   :  { %v1768_v8 = vadd.f32 %v1767_v47, %v4009_v38 }
0x31fa   :  { %3280 = vtanh.f32 %v1768_v8  ;;  %v3038_v45 = vmul.f32 -1.442695, %v1768_v8 }
0x31fc   :  { %3282 = vpow2.f32 %v3038_v45 }
0x31ff   :  { %v1769_v9 = vpop.f32.mrf.mxu2 }
0x3200   :  { %v3281_v26 = vpop.eup %3280 }
0x3201   :  { %1793 = vrot.lane.b32.xlu0 %v3281_v26, %s3467_s15 }
0x3202   :  { %v3283_v10 = vpop.eup %3282 }
0x3203   :  { %v1774_v12 = vadd.f32 1.0, %v3283_v10 }
0x3205   :  { %3284 = vrcp.f32 %v1774_v12  ;;  %v1786_v19 = vand.u32 2147483648, %v1774_v12  ;;  %vm1780_vm2 = vweird.f32 %v1774_v12  ;;  %v1784_v22 = vand.u32 2147483647, %v1774_v12 }
0x3207   :  { %v1787_v23 = vor.u32 1.1754944e-38, %v1786_v19  ;;  %vm1785_vm4 = vcmp.eq.f32.partialorder %v1784_v22, 8.507059e+37 }
0x320b   :  { %v3285_v13 = vpop.eup %3284 }
0x320c   :  { %v1776_v14 = vmul.f32 %v3285_v13, %v1774_v12  ;;  %vm1781_vm1 = vweird.f32 %v3285_v13 }
0x320d   :  { %vm1782_vm3 = vmor %vm1780_vm2, %vm1781_vm1 }
0x320e   :  { %v1777_v15 = vsub.f32 1.0, %v1776_v14 }
0x3210   :  { %v1778_v16 = vmul.f32 %v3285_v13, %v1777_v15 }
0x3212   :  { %v1779_v18 = vadd.f32 %v3285_v13, %v1778_v16 }
0x3214   :  { %v1783_v43 = vsel %vm1782_vm3, %v3285_v13, %v1779_v18 }
0x3215   :  { %v1788_v27 = vsel %vm1785_vm4, %v1787_v23, %v1783_v43 }
0x3216   :  { %v1791_v29 = vmul.f32 %v1788_v27, %v1738_v60 }
0x3273   :  { %v1794_v25 = vpop.permute.xlu0 %1793 }
0x3274   :  { %v1796_v33 = vmul.f32 %v1794_v25, %v1788_v27 }
0x3276   :  { %1798 = vrot.lane.b32.xlu1 %v1796_v33, %s3466_s6 }
0x32e8   :  { %v1799_v24 = vpop.permute.xlu1 %1798 }
0x32e9   :  { %v1801_v31 = vadd.f32 %v1799_v24, %v1791_v29 }
0x32eb   :  { %3286 = vtanh.f32 %v1801_v31 }
0x32f1   :  { %v3287_v41 = vpop.eup %3286 }
0x32f2   :  { %1804 = vrot.lane.b32.xlu2 %v3287_v41, %s3465_s18 }
0x334c   :  { %v1805_v48 = vpop.permute.xlu2 %1804 }
0x334d   :  { %v4015_v35 = vmul.f32 %v1805_v48, %v1788_v27 }
0x334f   :  { %v1814_v17 = vpack.c.bf16 %v4015_v35, %v4015_v35 }
0x3351   :  { %1816 = vrot.lane.b32.xlu0 %v1814_v17, %s3468_s7 }
0x33c3   :  { %v1817_v37 = vpop.permute.xlu0 %1816 }
0x33c4   :  { %3040 = vmatmul.msk.bf16.vlgmr.msra.gmra.mxu3 %vm87_vm0, %v1817_v37 }
0x33c5   :  { %2206 = vmatpush.bf16.msra.mxu3 %v3980_v11 }
0x3447   :  { %v1830_v39 = vpop.f32.mrf.mxu3 }
0x3448   :  { %v1831_v49 = vadd.f32 %v1830_v39, %v4009_v38 }
0x344a   :  { %3288 = vtanh.f32 %v1831_v49  ;;  %v3041_v50 = vmul.f32 -1.442695, %v1831_v49 }
0x344c   :  { %3290 = vpow2.f32 %v3041_v50 }
0x344f   :  { %v1832_v46 = vpop.f32.mrf.mxu3 }
0x3450   :  { %v3289_v21 = vpop.eup %3288 }
0x3451   :  { %1856 = vrot.lane.b32.xlu1 %v3289_v21, %s3467_s15 }
0x3452   :  { %v3291_v51 = vpop.eup %3290 }
0x3453   :  { %v1837_v52 = vadd.f32 1.0, %v3291_v51 }
0x3455   :  { %3292 = vrcp.f32 %v1837_v52  ;;  %v1849_v57 = vand.u32 2147483648, %v1837_v52  ;;  %vm1843_vm7 = vweird.f32 %v1837_v52  ;;  %v1847_v58 = vand.u32 2147483647, %v1837_v52 }
0x3457   :  { %v1850_v59 = vor.u32 1.1754944e-38, %v1849_v57  ;;  %vm1848_vm9 = vcmp.eq.f32.partialorder %v1847_v58, 8.507059e+37 }
0x345b   :  { %v3293_v53 = vpop.eup %3292 }
0x345c   :  { %v1839_v54 = vmul.f32 %v3293_v53, %v1837_v52  ;;  %vm1844_vm6 = vweird.f32 %v3293_v53 }
0x345d   :  { %vm1845_vm8 = vmor %vm1843_vm7, %vm1844_vm6 }
0x345e   :  { %v1840_v55 = vsub.f32 1.0, %v1839_v54 }
0x3460   :  { %v1841_v28 = vmul.f32 %v3293_v53, %v1840_v55 }
0x3462   :  { %v1842_v56 = vadd.f32 %v3293_v53, %v1841_v28 }
0x3464   :  { %v1846_v44 = vsel %vm1845_vm8, %v3293_v53, %v1842_v56 }
0x3465   :  { %v1851_v32 = vsel %vm1848_vm9, %v1850_v59, %v1846_v44 }
0x3466   :  { %v1854_v0 = vmul.f32 %v1851_v32, %v1801_v31 }
0x34c3   :  { %v1857_v62 = vpop.permute.xlu1 %1856 }
0x34c4   :  { %v1859_v63 = vmul.f32 %v1857_v62, %v1851_v32 }
0x34c6   :  { %1861 = vrot.lane.b32.xlu2 %v1859_v63, %s3466_s6 }
0x3520   :  { %v1862_v1 = vpop.permute.xlu2 %1861 }
0x3521   :  { %v1864_v3 = vadd.f32 %v1862_v1, %v1854_v0 }
0x3523   :  { %3294 = vtanh.f32 %v1864_v3 }
0x3529   :  { %v3295_v5 = vpop.eup %3294 }
0x352a   :  { %1867 = vrot.lane.b32.xlu0 %v3295_v5, %s3465_s18 }
0x359c   :  { %v1868_v42 = vpop.permute.xlu0 %1867 }
0x359d   :  { %v4026_v30 = vmul.f32 %v1868_v42, %v1851_v32 }
0x359f   :  { %v1877_v20 = vpack.c.bf16 %v4026_v30, %v4026_v30 }
0x35a1   :  { %1879 = vrot.lane.b32.xlu1 %v1877_v20, %s3468_s7 }
0x3613   :  { %v1880_v2 = vpop.permute.xlu1 %1879 }
0x3614   :  { %3043 = vmatmul.msk.bf16.vlgmr.msra.gmra.mxu1 %vm87_vm0, %v1880_v2 }
0x3615   :  { %2269 = vmatpush.bf16.msra.mxu1 %v3980_v11 }
0x3691   :  { %v1893_v60 = vpop.f32.mrf.mxu1 }
0x3692   :  { %v1894_v4 = vadd.f32 %v1893_v60, %v4009_v38 }
0x3694   :  { %3296 = vtanh.f32 %v1894_v4  ;;  %v3044_v6 = vmul.f32 -1.442695, %v1894_v4 }
0x3696   :  { %3298 = vpow2.f32 %v3044_v6 }
0x3699   :  { %v1895_v61 = vpop.f32.mrf.mxu1 }
0x369a   :  { %v3297_v34 = vpop.eup %3296 }
0x369b   :  { %1919 = vrot.lane.b32.xlu2 %v3297_v34, %s3467_s15 }
0x369c   :  { %v3299_v36 = vpop.eup %3298 }
0x369d   :  { %v1900_v7 = vadd.f32 1.0, %v3299_v36 }
0x369f   :  { %3300 = vrcp.f32 %v1900_v7  ;;  %v1912_v10 = vand.u32 2147483648, %v1900_v7  ;;  %vm1906_vm11 = vweird.f32 %v1900_v7  ;;  %v1910_v12 = vand.u32 2147483647, %v1900_v7 }
0x36a1   :  { %v1913_v14 = vor.u32 1.1754944e-38, %v1912_v10  ;;  %vm1911_vm5 = vcmp.eq.f32.partialorder %v1910_v12, 8.507059e+37 }
0x36a5   :  { %v3301_v47 = vpop.eup %3300 }
0x36a6   :  { %v1902_v8 = vmul.f32 %v3301_v47, %v1900_v7  ;;  %vm1907_vm10 = vweird.f32 %v3301_v47 }
0x36a7   :  { %vm1908_vm12 = vmor %vm1906_vm11, %vm1907_vm10 }
0x36a8   :  { %v1903_v9 = vsub.f32 1.0, %v1902_v8 }
0x36aa   :  { %v1904_v26 = vmul.f32 %v3301_v47, %v1903_v9 }
0x36ac   :  { %v1905_v45 = vadd.f32 %v3301_v47, %v1904_v26 }
0x36ae   :  { %v1909_v13 = vsel %vm1908_vm12, %v3301_v47, %v1905_v45 }
0x36af   :  { %v1914_v16 = vsel %vm1911_vm5, %v1913_v14, %v1909_v13 }
0x36b0   :  { %v1917_v19 = vmul.f32 %v1914_v16, %v1864_v3 }
0x36f5   :  { %v1920_v15 = vpop.permute.xlu2 %1919 }
0x36f6   :  { %v1922_v18 = vmul.f32 %v1920_v15, %v1914_v16 }
0x36f8   :  { %1924 = vrot.lane.b32.xlu0 %v1922_v18, %s3466_s6 }
0x376a   :  { %v1925_v22 = vpop.permute.xlu0 %1924 }
0x376b   :  { %v1927_v43 = vadd.f32 %v1925_v22, %v1917_v19 }
0x376d   :  { %3302 = vtanh.f32 %v1927_v43 }
0x3773   :  { %v3303_v23 = vpop.eup %3302 }
0x3774   :  { %1930 = vrot.lane.b32.xlu1 %v3303_v23, %s3465_s18 }
0x37e6   :  { %v1931_v25 = vpop.permute.xlu1 %1930 }
0x37e7   :  { %v4037_v27 = vmul.f32 %v1931_v25, %v1914_v16 }
0x37e9   :  { %v1940_v33 = vpack.c.bf16 %v4037_v27, %v4037_v27 }
0x37eb   :  { %1942 = vrot.lane.b32.xlu2 %v1940_v33, %s3468_s7 }
0x3845   :  { %v1943_v29 = vpop.permute.xlu2 %1942 }
0x3846   :  { %3046 = vmatmul.msk.bf16.vlgmr.msra.gmra.mxu2 %vm87_vm0, %v1943_v29 }
0x3847   :  { %2332 = vmatpush.bf16.msra.mxu2 %v3980_v11 }
0x38c9   :  { %v1956_v24 = vpop.f32.mrf.mxu2 }
0x38ca   :  { %v1957_v31 = vadd.f32 %v1956_v24, %v4009_v38 }
0x38cc   :  { %3304 = vtanh.f32 %v1957_v31  ;;  %v3047_v17 = vmul.f32 -1.442695, %v1957_v31 }
0x38ce   :  { %3306 = vpow2.f32 %v3047_v17 }
0x38d1   :  { %v1958_v41 = vpop.f32.mrf.mxu2 }
0x38d2   :  { %v3305_v48 = vpop.eup %3304 }
0x38d3   :  { %1982 = vrot.lane.b32.xlu0 %v3305_v48, %s3467_s15 }
0x38d4   :  { %v3307_v37 = vpop.eup %3306 }
0x38d5   :  { %v1963_v39 = vadd.f32 1.0, %v3307_v37 }
0x38d7   :  { %3308 = vrcp.f32 %v1963_v39  ;;  %v1975_v52 = vand.u32 2147483648, %v1963_v39  ;;  %vm1969_vm14 = vweird.f32 %v1963_v39  ;;  %v1973_v53 = vand.u32 2147483647, %v1963_v39 }
0x38d9   :  { %v1976_v55 = vor.u32 1.1754944e-38, %v1975_v52  ;;  %vm1974_vm1 = vcmp.eq.f32.partialorder %v1973_v53, 8.507059e+37 }
0x38dd   :  { %v3309_v49 = vpop.eup %3308 }
0x38de   :  { %v1965_v46 = vmul.f32 %v3309_v49, %v1963_v39  ;;  %vm1970_vm13 = vweird.f32 %v3309_v49 }
0x38df   :  { %vm1971_vm15 = vmor %vm1969_vm14, %vm1970_vm13 }
0x38e0   :  { %v1966_v21 = vsub.f32 1.0, %v1965_v46 }
0x38e2   :  { %v1967_v50 = vmul.f32 %v3309_v49, %v1966_v21 }
0x38e4   :  { %v1968_v51 = vadd.f32 %v3309_v49, %v1967_v50 }
0x38e6   :  { %v1972_v54 = vsel %vm1971_vm15, %v3309_v49, %v1968_v51 }
0x38e7   :  { %v1977_v56 = vsel %vm1974_vm1, %v1976_v55, %v1972_v54 }
0x38e8   :  { %v1980_v58 = vmul.f32 %v1977_v56, %v1927_v43 }
0x3945   :  { %v1983_v28 = vpop.permute.xlu0 %1982 }
0x3946   :  { %v1985_v57 = vmul.f32 %v1983_v28, %v1977_v56 }
0x3948   :  { %1987 = vrot.lane.b32.xlu1 %v1985_v57, %s3466_s6 }
0x39ba   :  { %v1988_v44 = vpop.permute.xlu1 %1987 }
0x39bb   :  { %v1990_v59 = vadd.f32 %v1988_v44, %v1980_v58 }
0x39bd   :  { %3310 = vtanh.f32 %v1990_v59 }
0x39c3   :  { %v3311_v62 = vpop.eup %3310 }
0x39c4   :  { %1993 = vrot.lane.b32.xlu2 %v3311_v62, %s3465_s18 }
0x3a1e   :  { %v1994_v32 = vpop.permute.xlu2 %1993 }
0x3a1f   :  { %v4048_v63 = vmul.f32 %v1994_v32, %v1977_v56 }
0x3a21   :  { %v2003_v0 = vpack.c.bf16 %v4048_v63, %v4048_v63 }
0x3a23   :  { %2005 = vrot.lane.b32.xlu0 %v2003_v0, %s3468_s7 }
0x3a95   :  { %v2006_v1 = vpop.permute.xlu0 %2005 }
0x3a96   :  { %3049 = vmatmul.msk.bf16.vlgmr.msrb.gmra.mxu3 %vm87_vm0, %v2006_v1 }
0x3a97   :  { %2395 = vmatpush.bf16.msrb.mxu3 %v3980_v11 }
0x3b19   :  { %v2019_v3 = vpop.f32.mrf.mxu3 }
0x3b1a   :  { %v2020_v5 = vadd.f32 %v2019_v3, %v4009_v38 }
0x3b1c   :  { %3312 = vtanh.f32 %v2020_v5  ;;  %v3050_v2 = vmul.f32 -1.442695, %v2020_v5 }
0x3b1e   :  { %3314 = vpow2.f32 %v3050_v2 }
0x3b21   :  { %v2021_v42 = vpop.f32.mrf.mxu3 }
0x3b22   :  { %v3313_v20 = vpop.eup %3312 }
0x3b23   :  { %2045 = vrot.lane.b32.xlu1 %v3313_v20, %s3467_s15 }
0x3b24   :  { %v3315_v60 = vpop.eup %3314 }
0x3b25   :  { %v2026_v4 = vadd.f32 1.0, %v3315_v60 }
0x3b27   :  { %3316 = vrcp.f32 %v2026_v4  ;;  %v2038_v47 = vand.u32 2147483648, %v2026_v4  ;;  %vm2032_vm3 = vweird.f32 %v2026_v4  ;;  %v2036_v8 = vand.u32 2147483647, %v2026_v4 }
0x3b29   :  { %v2039_v26 = vor.u32 1.1754944e-38, %v2038_v47  ;;  %vm2037_vm6 = vcmp.eq.f32.partialorder %v2036_v8, 8.507059e+37 }
0x3b2d   :  { %v3317_v61 = vpop.eup %3316 }
0x3b2e   :  { %v2028_v34 = vmul.f32 %v3317_v61, %v2026_v4  ;;  %vm2033_vm2 = vweird.f32 %v3317_v61 }
0x3b2f   :  { %vm2034_vm4 = vmor %vm2032_vm3, %vm2033_vm2 }
0x3b30   :  { %v2029_v6 = vsub.f32 1.0, %v2028_v34 }
0x3b32   :  { %v2030_v36 = vmul.f32 %v3317_v61, %v2029_v6 }
0x3b34   :  { %v2031_v7 = vadd.f32 %v3317_v61, %v2030_v36 }
0x3b36   :  { %v2035_v9 = vsel %vm2034_vm4, %v3317_v61, %v2031_v7 }
0x3b37   :  { %v2040_v10 = vsel %vm2037_vm6, %v2039_v26, %v2035_v9 }
0x3b38   :  { %v2043_v13 = vmul.f32 %v2040_v10, %v1990_v59 }
0x3b95   :  { %v2046_v45 = vpop.permute.xlu1 %2045 }
0x3b96   :  { %v2048_v12 = vmul.f32 %v2046_v45, %v2040_v10 }
0x3b98   :  { %2050 = vrot.lane.b32.xlu2 %v2048_v12, %s3466_s6 }
0x3bf2   :  { %v2051_v14 = vpop.permute.xlu2 %2050 }
0x3bf3   :  { %v2053_v15 = vadd.f32 %v2051_v14, %v2043_v13 }
0x3bf5   :  { %3318 = vtanh.f32 %v2053_v15 }
0x3bfb   :  { %v3319_v16 = vpop.eup %3318 }
0x3bfc   :  { %2056 = vrot.lane.b32.xlu0 %v3319_v16, %s3465_s18 }
0x3c6e   :  { %v2057_v18 = vpop.permute.xlu0 %2056 }
0x3c6f   :  { %v4059_v19 = vmul.f32 %v2057_v18, %v2040_v10 }
0x3c71   :  { %v2066_v22 = vpack.c.bf16 %v4059_v19, %v4059_v19 }
0x3c73   :  { %2068 = vrot.lane.b32.xlu1 %v2066_v22, %s3468_s7 }
0x3ce5   :  { %v2069_v43 = vpop.permute.xlu1 %2068 }
0x3ce6   :  { %3052 = vmatmul.msk.bf16.vlgmr.msrb.gmra.mxu1 %vm87_vm0, %v2069_v43 }
0x3ce7   :  { %2458 = vmatpush.bf16.msrb.mxu1 %v3980_v11 }
0x3d63   :  { %v2082_v23 = vpop.f32.mrf.mxu1 }
0x3d64   :  { %v2083_v25 = vadd.f32 %v2082_v23, %v4009_v38 }
0x3d66   :  { %3320 = vtanh.f32 %v2083_v25  ;;  %v3053_v24 = vmul.f32 -1.442695, %v2083_v25 }
0x3d68   :  { %3322 = vpow2.f32 %v3053_v24 }
0x3d6b   :  { %v2084_v33 = vpop.f32.mrf.mxu1 }
0x3d6c   :  { %v3321_v29 = vpop.eup %3320 }
0x3d6d   :  { %2108 = vrot.lane.b32.xlu2 %v3321_v29, %s3467_s15 }
0x3d6e   :  { %v3323_v31 = vpop.eup %3322 }
0x3d6f   :  { %v2089_v41 = vadd.f32 1.0, %v3323_v31 }
0x3d71   :  { %3324 = vrcp.f32 %v2089_v41  ;;  %v2101_v46 = vand.u32 2147483648, %v2089_v41  ;;  %vm2095_vm8 = vweird.f32 %v2089_v41  ;;  %v2099_v21 = vand.u32 2147483647, %v2089_v41 }
0x3d73   :  { %v2102_v51 = vor.u32 1.1754944e-38, %v2101_v46  ;;  %vm2100_vm10 = vcmp.eq.f32.partialorder %v2099_v21, 8.507059e+37 }
0x3d77   :  { %v3325_v48 = vpop.eup %3324 }
0x3d78   :  { %v2091_v17 = vmul.f32 %v3325_v48, %v2089_v41  ;;  %vm2096_vm7 = vweird.f32 %v3325_v48 }
0x3d79   :  { %vm2097_vm9 = vmor %vm2095_vm8, %vm2096_vm7 }
0x3d7a   :  { %v2092_v37 = vsub.f32 1.0, %v2091_v17 }
0x3d7c   :  { %v2093_v39 = vmul.f32 %v3325_v48, %v2092_v37 }
0x3d7e   :  { %v2094_v49 = vadd.f32 %v3325_v48, %v2093_v39 }
0x3d80   :  { %v2098_v50 = vsel %vm2097_vm9, %v3325_v48, %v2094_v49 }
0x3d81   :  { %v2103_v53 = vsel %vm2100_vm10, %v2102_v51, %v2098_v50 }
0x3d82   :  { %v2106_v55 = vmul.f32 %v2103_v53, %v2053_v15 }
0x3dc7   :  { %v2109_v52 = vpop.permute.xlu2 %2108 }
0x3dc8   :  { %v2111_v54 = vmul.f32 %v2109_v52, %v2103_v53 }
0x3dca   :  { %2113 = vrot.lane.b32.xlu0 %v2111_v54, %s3466_s6 }
0x3e3c   :  { %v2114_v28 = vpop.permute.xlu0 %2113 }
0x3e3d   :  { %v2116_v56 = vadd.f32 %v2114_v28, %v2106_v55 }
0x3e3f   :  { %3326 = vtanh.f32 %v2116_v56 }
0x3e45   :  { %v3327_v57 = vpop.eup %3326 }
0x3e46   :  { %2119 = vrot.lane.b32.xlu1 %v3327_v57, %s3465_s18 }
0x3eb8   :  { %v2120_v58 = vpop.permute.xlu1 %2119 }
0x3eb9   :  { %v4070_v44 = vmul.f32 %v2120_v58, %v2103_v53 }
0x3ebb   :  { %v2129_v59 = vpack.c.bf16 %v4070_v44, %v4070_v44 }
0x3ebd   :  { %2131 = vrot.lane.b32.xlu2 %v2129_v59, %s3468_s7 }
0x3f17   :  { %v2132_v62 = vpop.permute.xlu2 %2131 }
0x3f18   :  { %3055 = vmatmul.msk.bf16.vlgmr.msrb.gmra.mxu2 %vm87_vm0, %v2132_v62 }
0x3f19   :  { %2521 = vmatpush.bf16.msrb.mxu2 %v3980_v11 }
0x3f9b   :  { %v2145_v32 = vpop.f32.mrf.mxu2 }
0x3f9c   :  { %v2146_v0 = vadd.f32 %v2145_v32, %v4009_v38 }
0x3f9e   :  { %3328 = vtanh.f32 %v2146_v0  ;;  %v3056_v5 = vmul.f32 -1.442695, %v2146_v0 }
0x3fa0   :  { %3330 = vpow2.f32 %v3056_v5 }
0x3fa3   :  { %v2147_v1 = vpop.f32.mrf.mxu2 }
0x3fa4   :  { %v3329_v3 = vpop.eup %3328 }
0x3fa5   :  { %2171 = vrot.lane.b32.xlu0 %v3329_v3, %s3467_s15 }
0x3fa6   :  { %v3331_v42 = vpop.eup %3330 }
0x3fa7   :  { %v2152_v20 = vadd.f32 1.0, %v3331_v42 }
0x3fa9   :  { %3332 = vrcp.f32 %v2152_v20  ;;  %v2164_v6 = vand.u32 2147483648, %v2152_v20  ;;  %vm2158_vm12 = vweird.f32 %v2152_v20  ;;  %v2162_v36 = vand.u32 2147483647, %v2152_v20 }
0x3fab   :  { %v2165_v47 = vor.u32 1.1754944e-38, %v2164_v6  ;;  %vm2163_vm13 = vcmp.eq.f32.partialorder %v2162_v36, 8.507059e+37 }
0x3faf   :  { %v3333_v2 = vpop.eup %3332 }
0x3fb0   :  { %v2154_v60 = vmul.f32 %v3333_v2, %v2152_v20  ;;  %vm2159_vm11 = vweird.f32 %v3333_v2 }
0x3fb1   :  { %vm2160_vm5 = vmor %vm2158_vm12, %vm2159_vm11 }
0x3fb2   :  { %v2155_v4 = vsub.f32 1.0, %v2154_v60 }
0x3fb4   :  { %v2156_v61 = vmul.f32 %v3333_v2, %v2155_v4 }
0x3fb6   :  { %v2157_v34 = vadd.f32 %v3333_v2, %v2156_v61 }
0x3fb8   :  { %v2161_v7 = vsel %vm2160_vm5, %v3333_v2, %v2157_v34 }
0x3fb9   :  { %v2166_v9 = vsel %vm2163_vm13, %v2165_v47, %v2161_v7 }
0x3fba   :  { %v2169_v45 = vmul.f32 %v2166_v9, %v2116_v56 }
0x4017   :  { %v2172_v8 = vpop.permute.xlu0 %2171 }
0x4018   :  { %v2174_v26 = vmul.f32 %v2172_v8, %v2166_v9 }
0x401a   :  { %2176 = vrot.lane.b32.xlu1 %v2174_v26, %s3466_s6 }
0x408c   :  { %v2177_v10 = vpop.permute.xlu1 %2176 }
0x408d   :  { %v2179_v12 = vadd.f32 %v2177_v10, %v2169_v45 }
0x408f   :  { %3334 = vtanh.f32 %v2179_v12 }
0x4095   :  { %v3335_v13 = vpop.eup %3334 }
0x4096   :  { %2182 = vrot.lane.b32.xlu2 %v3335_v13, %s3465_s18 }
0x40f0   :  { %v2183_v14 = vpop.permute.xlu2 %2182 }
0x40f1   :  { %v4081_v15 = vmul.f32 %v2183_v14, %v2166_v9 }
0x40f3   :  { %v2192_v16 = vpack.c.bf16 %v4081_v15, %v4081_v15 }
0x40f5   :  { %2194 = vrot.lane.b32.xlu0 %v2192_v16, %s3468_s7 }
0x4167   :  { %v2195_v18 = vpop.permute.xlu0 %2194 }
0x4168   :  { %3058 = vmatmul.msk.bf16.vlgmr.msra.gmra.mxu3 %vm87_vm0, %v2195_v18 }
0x4169   :  { %2584 = vmatpush.bf16.msra.mxu3 %v3980_v11 }
0x41eb   :  { %v2208_v22 = vpop.f32.mrf.mxu3 }
0x41ec   :  { %v2209_v43 = vadd.f32 %v2208_v22, %v4009_v38 }
0x41ee   :  { %3336 = vtanh.f32 %v2209_v43  ;;  %v3059_v33 = vmul.f32 -1.442695, %v2209_v43 }
0x41f0   :  { %3338 = vpow2.f32 %v3059_v33 }
0x41f3   :  { %v2210_v23 = vpop.f32.mrf.mxu3 }
0x41f4   :  { %v3337_v25 = vpop.eup %3336 }
0x41f5   :  { %2234 = vrot.lane.b32.xlu1 %v3337_v25, %s3467_s15 }
0x41f6   :  { %v3339_v29 = vpop.eup %3338 }
0x41f7   :  { %v2215_v24 = vadd.f32 1.0, %v3339_v29 }
0x41f9   :  { %3340 = vrcp.f32 %v2215_v24  ;;  %v2227_v39 = vand.u32 2147483648, %v2215_v24  ;;  %vm2221_vm15 = vweird.f32 %v2215_v24  ;;  %v2225_v49 = vand.u32 2147483647, %v2215_v24 }
0x41fb   :  { %v2228_v21 = vor.u32 1.1754944e-38, %v2227_v39  ;;  %vm2226_vm2 = vcmp.eq.f32.partialorder %v2225_v49, 8.507059e+37 }
0x41ff   :  { %v3341_v31 = vpop.eup %3340 }
0x4200   :  { %v2217_v41 = vmul.f32 %v3341_v31, %v2215_v24  ;;  %vm2222_vm14 = vweird.f32 %v3341_v31 }
0x4201   :  { %vm2223_vm1 = vmor %vm2221_vm15, %vm2222_vm14 }
0x4202   :  { %v2218_v48 = vsub.f32 1.0, %v2217_v41 }
0x4204   :  { %v2219_v17 = vmul.f32 %v3341_v31, %v2218_v48 }
0x4206   :  { %v2220_v37 = vadd.f32 %v3341_v31, %v2219_v17 }
0x4208   :  { %v2224_v46 = vsel %vm2223_vm1, %v3341_v31, %v2220_v37 }
0x4209   :  { %v2229_v51 = vsel %vm2226_vm2, %v2228_v21, %v2224_v46 }
0x420a   :  { %v2232_v53 = vmul.f32 %v2229_v51, %v2179_v12 }
0x4267   :  { %v2235_v50 = vpop.permute.xlu1 %2234 }
0x4268   :  { %v2237_v52 = vmul.f32 %v2235_v50, %v2229_v51 }
0x426a   :  { %2239 = vrot.lane.b32.xlu2 %v2237_v52, %s3466_s6 }
0x42c4   :  { %v2240_v54 = vpop.permute.xlu2 %2239 }
0x42c5   :  { %v2242_v55 = vadd.f32 %v2240_v54, %v2232_v53 }
0x42c7   :  { %3342 = vtanh.f32 %v2242_v55 }
0x42cd   :  { %v3343_v28 = vpop.eup %3342 }
0x42ce   :  { %2245 = vrot.lane.b32.xlu0 %v3343_v28, %s3465_s18 }
0x4340   :  { %v2246_v56 = vpop.permute.xlu0 %2245 }
0x4341   :  { %v4092_v57 = vmul.f32 %v2246_v56, %v2229_v51 }
0x4343   :  { %v2255_v58 = vpack.c.bf16 %v4092_v57, %v4092_v57 }
0x4345   :  { %2257 = vrot.lane.b32.xlu1 %v2255_v58, %s3468_s7 }
0x43b7   :  { %v2258_v59 = vpop.permute.xlu1 %2257 }
0x43b8   :  { %3061 = vmatmul.msk.bf16.vlgmr.msra.gmra.mxu1 %vm87_vm0, %v2258_v59 }
0x43b9   :  { %2647 = vmatpush.bf16.msra.mxu1 %v3980_v11 }
0x4435   :  { %v2271_v62 = vpop.f32.mrf.mxu1 }
0x4436   :  { %v2272_v32 = vadd.f32 %v2271_v62, %v4009_v38 }
0x4438   :  { %3344 = vtanh.f32 %v2272_v32  ;;  %v3062_v3 = vmul.f32 -1.442695, %v2272_v32 }
0x443a   :  { %3346 = vpow2.f32 %v3062_v3 }
0x443d   :  { %v2273_v0 = vpop.f32.mrf.mxu1 }
0x443e   :  { %v3345_v1 = vpop.eup %3344 }
0x443f   :  { %2297 = vrot.lane.b32.xlu2 %v3345_v1, %s3467_s15 }
0x4440   :  { %v3347_v5 = vpop.eup %3346 }
0x4441   :  { %v2278_v42 = vadd.f32 1.0, %v3347_v5 }
0x4443   :  { %3348 = vrcp.f32 %v2278_v42  ;;  %v2290_v34 = vand.u32 2147483648, %v2278_v42  ;;  %vm2284_vm4 = vweird.f32 %v2278_v42  ;;  %v2288_v6 = vand.u32 2147483647, %v2278_v42 }
0x4445   :  { %v2291_v7 = vor.u32 1.1754944e-38, %v2290_v34  ;;  %vm2289_vm7 = vcmp.eq.f32.partialorder %v2288_v6, 8.507059e+37 }
0x4449   :  { %v3349_v20 = vpop.eup %3348 }
0x444a   :  { %v2280_v2 = vmul.f32 %v3349_v20, %v2278_v42  ;;  %vm2285_vm3 = vweird.f32 %v3349_v20 }
0x444b   :  { %vm2286_vm6 = vmor %vm2284_vm4, %vm2285_vm3 }
0x444c   :  { %v2281_v60 = vsub.f32 1.0, %v2280_v2 }
0x444e   :  { %v2282_v4 = vmul.f32 %v3349_v20, %v2281_v60 }
0x4450   :  { %v2283_v61 = vadd.f32 %v3349_v20, %v2282_v4 }
0x4452   :  { %v2287_v36 = vsel %vm2286_vm6, %v3349_v20, %v2283_v61 }
0x4453   :  { %v2292_v8 = vsel %vm2289_vm7, %v2291_v7, %v2287_v36 }
0x4454   :  { %v2295_v26 = vmul.f32 %v2292_v8, %v2242_v55 }
0x4499   :  { %v2298_v47 = vpop.permute.xlu2 %2297 }
0x449a   :  { %v2300_v9 = vmul.f32 %v2298_v47, %v2292_v8 }
0x449c   :  { %2302 = vrot.lane.b32.xlu0 %v2300_v9, %s3466_s6 }
0x450e   :  { %v2303_v45 = vpop.permute.xlu0 %2302 }
0x450f   :  { %v2305_v10 = vadd.f32 %v2303_v45, %v2295_v26 }
0x4511   :  { %3350 = vtanh.f32 %v2305_v10 }
0x4517   :  { %v3351_v12 = vpop.eup %3350 }
0x4518   :  { %2308 = vrot.lane.b32.xlu1 %v3351_v12, %s3465_s18 }
0x458a   :  { %v2309_v13 = vpop.permute.xlu1 %2308 }
0x458b   :  { %v4103_v14 = vmul.f32 %v2309_v13, %v2292_v8 }
0x458d   :  { %v2318_v16 = vpack.c.bf16 %v4103_v14, %v4103_v14 }
0x458f   :  { %2320 = vrot.lane.b32.xlu2 %v2318_v16, %s3468_s7 }
0x45e9   :  { %v2321_v18 = vpop.permute.xlu2 %2320 }
0x45ea   :  { %3064 = vmatmul.msk.bf16.vlgmr.msra.gmra.mxu2 %vm87_vm0, %v2321_v18 }
0x45eb   :  { %2773 = vmatpush.bf16.msra.mxu2 %v3980_v11 }
0x466d   :  { %v2334_v22 = vpop.f32.mrf.mxu2 }
0x466e   :  { %v2335_v43 = vadd.f32 %v2334_v22, %v4009_v38 }
0x4670   :  { %3352 = vtanh.f32 %v2335_v43  ;;  %v3065_v33 = vmul.f32 -1.442695, %v2335_v43 }
0x4672   :  { %3354 = vpow2.f32 %v3065_v33 }
0x4675   :  { %v2336_v23 = vpop.f32.mrf.mxu2 }
0x4676   :  { %v3353_v25 = vpop.eup %3352 }
0x4677   :  { %2360 = vrot.lane.b32.xlu0 %v3353_v25, %s3467_s15 }
0x4678   :  { %v3355_v29 = vpop.eup %3354 }
0x4679   :  { %v2341_v24 = vadd.f32 1.0, %v3355_v29 }
0x467b   :  { %3356 = vrcp.f32 %v2341_v24  ;;  %v2353_v39 = vand.u32 2147483648, %v2341_v24  ;;  %vm2347_vm9 = vweird.f32 %v2341_v24  ;;  %v2351_v49 = vand.u32 2147483647, %v2341_v24 }
0x467d   :  { %v2354_v21 = vor.u32 1.1754944e-38, %v2353_v39  ;;  %vm2352_vm11 = vcmp.eq.f32.partialorder %v2351_v49, 8.507059e+37 }
0x4681   :  { %v3357_v31 = vpop.eup %3356 }
0x4682   :  { %v2343_v41 = vmul.f32 %v3357_v31, %v2341_v24  ;;  %vm2348_vm8 = vweird.f32 %v3357_v31 }
0x4683   :  { %vm2349_vm10 = vmor %vm2347_vm9, %vm2348_vm8 }
0x4684   :  { %v2344_v48 = vsub.f32 1.0, %v2343_v41 }
0x4686   :  { %v2345_v17 = vmul.f32 %v3357_v31, %v2344_v48 }
0x4688   :  { %v2346_v37 = vadd.f32 %v3357_v31, %v2345_v17 }
0x468a   :  { %v2350_v46 = vsel %vm2349_vm10, %v3357_v31, %v2346_v37 }
0x468b   :  { %v2355_v51 = vsel %vm2352_vm11, %v2354_v21, %v2350_v46 }
0x468c   :  { %v2358_v53 = vmul.f32 %v2355_v51, %v2305_v10 }
0x46e9   :  { %v2361_v50 = vpop.permute.xlu0 %2360 }
0x46ea   :  { %v2363_v52 = vmul.f32 %v2361_v50, %v2355_v51 }
0x46ec   :  { %2365 = vrot.lane.b32.xlu1 %v2363_v52, %s3466_s6 }
0x475e   :  { %v2366_v54 = vpop.permute.xlu1 %2365 }
0x475f   :  { %v2368_v55 = vadd.f32 %v2366_v54, %v2358_v53 }
0x4761   :  { %3358 = vtanh.f32 %v2368_v55 }
0x4767   :  { %v3359_v28 = vpop.eup %3358 }
0x4768   :  { %2371 = vrot.lane.b32.xlu2 %v3359_v28, %s3465_s18 }
0x47c2   :  { %v2372_v56 = vpop.permute.xlu2 %2371 }
0x47c3   :  { %v4114_v58 = vmul.f32 %v2372_v56, %v2355_v51 }
0x47c5   :  { %v2381_v59 = vpack.c.bf16 %v4114_v58, %v4114_v58 }
0x47c7   :  { %2383 = vrot.lane.b32.xlu0 %v2381_v59, %s3468_s7 }
0x4839   :  { %v2384_v62 = vpop.permute.xlu0 %2383 }
0x483a   :  { %3067 = vmatmul.msk.bf16.vlgmr.msrb.gmra.mxu3 %vm87_vm0, %v2384_v62 }
0x483b   :  { %2836 = vmatpush.bf16.msrb.mxu3 %v3980_v11 }
0x48bd   :  { %v2397_v32 = vpop.f32.mrf.mxu3 }
0x48be   :  { %v2398_v0 = vadd.f32 %v2397_v32, %v4009_v38 }
0x48c0   :  { %3360 = vtanh.f32 %v2398_v0  ;;  %v3068_v5 = vmul.f32 -1.442695, %v2398_v0 }
0x48c2   :  { %3362 = vpow2.f32 %v3068_v5 }
0x48c5   :  { %v2399_v1 = vpop.f32.mrf.mxu3 }
0x48c6   :  { %v3361_v3 = vpop.eup %3360 }
0x48c7   :  { %2423 = vrot.lane.b32.xlu1 %v3361_v3, %s3467_s15 }
0x48c8   :  { %v3363_v42 = vpop.eup %3362 }
0x48c9   :  { %v2404_v20 = vadd.f32 1.0, %v3363_v42 }
0x48cb   :  { %3364 = vrcp.f32 %v2404_v20  ;;  %v2416_v6 = vand.u32 2147483648, %v2404_v20  ;;  %vm2410_vm5 = vweird.f32 %v2404_v20  ;;  %v2414_v36 = vand.u32 2147483647, %v2404_v20 }
0x48cd   :  { %v2417_v47 = vor.u32 1.1754944e-38, %v2416_v6  ;;  %vm2415_vm14 = vcmp.eq.f32.partialorder %v2414_v36, 8.507059e+37 }
0x48d1   :  { %v3365_v2 = vpop.eup %3364 }
0x48d2   :  { %v2406_v60 = vmul.f32 %v3365_v2, %v2404_v20  ;;  %vm2411_vm12 = vweird.f32 %v3365_v2 }
0x48d3   :  { %vm2412_vm13 = vmor %vm2410_vm5, %vm2411_vm12 }
0x48d4   :  { %v2407_v4 = vsub.f32 1.0, %v2406_v60 }
0x48d6   :  { %v2408_v61 = vmul.f32 %v3365_v2, %v2407_v4 }
0x48d8   :  { %v2409_v34 = vadd.f32 %v3365_v2, %v2408_v61 }
0x48da   :  { %v2413_v7 = vsel %vm2412_vm13, %v3365_v2, %v2409_v34 }
0x48db   :  { %v2418_v9 = vsel %vm2415_vm14, %v2417_v47, %v2413_v7 }
0x48dc   :  { %v2421_v45 = vmul.f32 %v2418_v9, %v2368_v55 }
0x4939   :  { %v2424_v8 = vpop.permute.xlu1 %2423 }
0x493a   :  { %v2426_v26 = vmul.f32 %v2424_v8, %v2418_v9 }
0x493c   :  { %2428 = vrot.lane.b32.xlu2 %v2426_v26, %s3466_s6 }
0x4996   :  { %v2429_v10 = vpop.permute.xlu2 %2428 }
0x4997   :  { %v2431_v12 = vadd.f32 %v2429_v10, %v2421_v45 }
0x4999   :  { %3366 = vtanh.f32 %v2431_v12 }
0x499f   :  { %v3367_v13 = vpop.eup %3366 }
0x49a0   :  { %2434 = vrot.lane.b32.xlu0 %v3367_v13, %s3465_s18 }
0x4a12   :  { %v2435_v16 = vpop.permute.xlu0 %2434 }
0x4a13   :  { %v4125_v18 = vmul.f32 %v2435_v16, %v2418_v9 }
0x4a15   :  { %v2444_v22 = vpack.c.bf16 %v4125_v18, %v4125_v18 }
0x4a17   :  { %2446 = vrot.lane.b32.xlu1 %v2444_v22, %s3468_s7 }
0x4a89   :  { %v2447_v43 = vpop.permute.xlu1 %2446 }
0x4a8a   :  { %3070 = vmatmul.msk.bf16.vlgmr.msrb.gmra.mxu1 %vm87_vm0, %v2447_v43 }
0x4a8b   :  { %2899 = vmatpush.bf16.msrb.mxu1 %v3980_v11 }
0x4b07   :  { %v2460_v23 = vpop.f32.mrf.mxu1 }
0x4b08   :  { %v2461_v25 = vadd.f32 %v2460_v23, %v4009_v38 }
0x4b0a   :  { %3368 = vtanh.f32 %v2461_v25  ;;  %v3071_v24 = vmul.f32 -1.442695, %v2461_v25 }
0x4b0c   :  { %3370 = vpow2.f32 %v3071_v24 }
0x4b0f   :  { %v2462_v33 = vpop.f32.mrf.mxu1 }
0x4b10   :  { %v3369_v29 = vpop.eup %3368 }
0x4b11   :  { %2486 = vrot.lane.b32.xlu2 %v3369_v29, %s3467_s15 }
0x4b12   :  { %v3371_v31 = vpop.eup %3370 }
0x4b13   :  { %v2467_v41 = vadd.f32 1.0, %v3371_v31 }
0x4b15   :  { %3372 = vrcp.f32 %v2467_v41  ;;  %v2479_v11 = vand.u32 2147483648, %v2467_v41  ;;  %vm2473_vm1 = vweird.f32 %v2467_v41  ;;  %v2477_v46 = vand.u32 2147483647, %v2467_v41 }
0x4b17   :  { %v2480_v50 = vor.u32 1.1754944e-38, %v2479_v11  ;;  %vm2478_vm3 = vcmp.eq.f32.partialorder %v2477_v46, 8.507059e+37 }
0x4b1b   :  { %v3373_v48 = vpop.eup %3372 }
0x4b1c   :  { %v2469_v17 = vmul.f32 %v3373_v48, %v2467_v41  ;;  %vm2474_vm15 = vweird.f32 %v3373_v48 }
0x4b1d   :  { %vm2475_vm2 = vmor %vm2473_vm1, %vm2474_vm15 }
0x4b1e   :  { %v2470_v37 = vsub.f32 1.0, %v2469_v17 }
0x4b20   :  { %v2471_v39 = vmul.f32 %v3373_v48, %v2470_v37 }
0x4b22   :  { %v2472_v49 = vadd.f32 %v3373_v48, %v2471_v39 }
0x4b24   :  { %v2476_v21 = vsel %vm2475_vm2, %v3373_v48, %v2472_v49 }
0x4b25   :  { %v2481_v52 = vsel %vm2478_vm3, %v2480_v50, %v2476_v21 }
0x4b26   :  { %v2484_v54 = vmul.f32 %v2481_v52, %v2431_v12 }
0x4b6b   :  { %v2487_v51 = vpop.permute.xlu2 %2486 }
0x4b6c   :  { %v2489_v53 = vmul.f32 %v2487_v51, %v2481_v52 }
0x4b6e   :  { %2491 = vrot.lane.b32.xlu0 %v2489_v53, %s3466_s6 }
0x4be0   :  { %v2492_v55 = vpop.permute.xlu0 %2491 }
0x4be1   :  { %v2494_v28 = vadd.f32 %v2492_v55, %v2484_v54 }
0x4be3   :  { %3374 = vtanh.f32 %v2494_v28 }
0x4be9   :  { %v3375_v56 = vpop.eup %3374 }
0x4bea   :  { %2497 = vrot.lane.b32.xlu1 %v3375_v56, %s3465_s18 }
0x4c5c   :  { %v2498_v59 = vpop.permute.xlu1 %2497 }
0x4c5d   :  { %v4136_v62 = vmul.f32 %v2498_v59, %v2481_v52 }
0x4c5f   :  { %v2507_v32 = vpack.c.bf16 %v4136_v62, %v4136_v62 }
0x4c61   :  { %2509 = vrot.lane.b32.xlu2 %v2507_v32, %s3468_s7 }
0x4cbb   :  { %v2510_v0 = vpop.permute.xlu2 %2509 }
0x4cbc   :  { %3073 = vmatmul.msk.bf16.vlgmr.msrb.gmra.mxu2 %vm87_vm0, %v2510_v0 }
0x4d3f   :  { %v2523_v1 = vpop.f32.mrf.mxu2 }
0x4d40   :  { %v2524_v3 = vadd.f32 %v2523_v1, %v4009_v38 }
0x4d42   :  { %3376 = vtanh.f32 %v2524_v3  ;;  %v3074_v20 = vmul.f32 -1.442695, %v2524_v3 }
0x4d44   :  { %3378 = vpow2.f32 %v3074_v20 }
0x4d47   :  { %v2525_v5 = vpop.f32.mrf.mxu2 }
0x4d48   :  { %v3377_v42 = vpop.eup %3376 }
0x4d49   :  { %2549 = vrot.lane.b32.xlu0 %v3377_v42, %s3467_s15 }
0x4d4a   :  { %v3379_v2 = vpop.eup %3378 }
0x4d4b   :  { %v2530_v60 = vadd.f32 1.0, %v3379_v2 }
0x4d4d   :  { %3380 = vrcp.f32 %v2530_v60  ;;  %v2542_v7 = vand.u32 2147483648, %v2530_v60  ;;  %vm2536_vm6 = vweird.f32 %v2530_v60  ;;  %v2540_v47 = vand.u32 2147483647, %v2530_v60 }
0x4d4f   :  { %v2543_v9 = vor.u32 1.1754944e-38, %v2542_v7  ;;  %vm2541_vm8 = vcmp.eq.f32.partialorder %v2540_v47, 8.507059e+37 }
0x4d53   :  { %v3381_v4 = vpop.eup %3380 }
0x4d54   :  { %v2532_v61 = vmul.f32 %v3381_v4, %v2530_v60  ;;  %vm2537_vm4 = vweird.f32 %v3381_v4 }
0x4d55   :  { %vm2538_vm7 = vmor %vm2536_vm6, %vm2537_vm4 }
0x4d56   :  { %v2533_v34 = vsub.f32 1.0, %v2532_v61 }
0x4d58   :  { %v2534_v6 = vmul.f32 %v3381_v4, %v2533_v34 }
0x4d5a   :  { %v2535_v36 = vadd.f32 %v3381_v4, %v2534_v6 }
0x4d5c   :  { %v2539_v8 = vsel %vm2538_vm7, %v3381_v4, %v2535_v36 }
0x4d5d   :  { %v2544_v45 = vsel %vm2541_vm8, %v2543_v9, %v2539_v8 }
0x4d5e   :  { %v2547_v12 = vmul.f32 %v2544_v45, %v2494_v28 }
0x4dbb   :  { %v2550_v26 = vpop.permute.xlu0 %2549 }
0x4dbc   :  { %v2552_v10 = vmul.f32 %v2550_v26, %v2544_v45 }
0x4dbe   :  { %2554 = vrot.lane.b32.xlu1 %v2552_v10, %s3466_s6 }
0x4e30   :  { %v2555_v13 = vpop.permute.xlu1 %2554 }
0x4e31   :  { %v2557_v16 = vadd.f32 %v2555_v13, %v2547_v12 }
0x4e33   :  { %3382 = vtanh.f32 %v2557_v16 }
0x4e39   :  { %v3383_v22 = vpop.eup %3382 }
0x4e3a   :  { %2560 = vrot.lane.b32.xlu2 %v3383_v22, %s3465_s18 }
0x4e94   :  { %v2561_v43 = vpop.permute.xlu2 %2560 }
0x4e95   :  { %v4146_v23 = vmul.f32 %v2561_v43, %v2544_v45 }
0x4e97   :  { %v2570_v25 = vpack.c.bf16 %v4146_v23, %v4146_v23 }
0x4e99   :  { %2572 = vrot.lane.b32.xlu0 %v2570_v25, %s3468_s7 }
0x4f0b   :  { %v2573_v33 = vpop.permute.xlu0 %2572 }
0x4f0c   :  { %3076 = vmatmul.msk.bf16.vlgmr.msra.gmra.mxu3 %vm87_vm0, %v2573_v33 }
0x4f8f   :  { %v2586_v29 = vpop.f32.mrf.mxu3 }
0x4f90   :  { %v2587_v24 = vadd.f32 %v2586_v29, %v4009_v38 }
0x4f92   :  { %3384 = vtanh.f32 %v2587_v24  ;;  %v3077_v48 = vmul.f32 -1.442695, %v2587_v24 }
0x4f94   :  { %3386 = vpow2.f32 %v3077_v48 }
0x4f97   :  { %v2588_v31 = vpop.f32.mrf.mxu3 }
0x4f98   :  { %v3385_v41 = vpop.eup %3384 }
0x4f99   :  { %2612 = vrot.lane.b32.xlu1 %v3385_v41, %s3467_s15 }
0x4f9a   :  { %v3387_v17 = vpop.eup %3386 }
0x4f9b   :  { %v2593_v37 = vadd.f32 1.0, %v3387_v17 }
0x4f9d   :  { %3388 = vrcp.f32 %v2593_v37  ;;  %v2605_v50 = vand.u32 2147483648, %v2593_v37  ;;  %vm2599_vm10 = vweird.f32 %v2593_v37  ;;  %v2603_v51 = vand.u32 2147483647, %v2593_v37 }
0x4f9f   :  { %v2606_v53 = vor.u32 1.1754944e-38, %v2605_v50  ;;  %vm2604_vm12 = vcmp.eq.f32.partialorder %v2603_v51, 8.507059e+37 }
0x4fa3   :  { %v3389_v39 = vpop.eup %3388 }
0x4fa4   :  { %v2595_v49 = vmul.f32 %v3389_v39, %v2593_v37  ;;  %vm2600_vm9 = vweird.f32 %v3389_v39 }
0x4fa5   :  { %vm2601_vm11 = vmor %vm2599_vm10, %vm2600_vm9 }
0x4fa6   :  { %v2596_v11 = vsub.f32 1.0, %v2595_v49 }
0x4fa8   :  { %v2597_v46 = vmul.f32 %v3389_v39, %v2596_v11 }
0x4faa   :  { %v2598_v21 = vadd.f32 %v3389_v39, %v2597_v46 }
0x4fac   :  { %v2602_v52 = vsel %vm2601_vm11, %v3389_v39, %v2598_v21 }
0x4fad   :  { %v2607_v55 = vsel %vm2604_vm12, %v2606_v53, %v2602_v52 }
0x4fae   :  { %v2610_v56 = vmul.f32 %v2607_v55, %v2557_v16 }
0x500b   :  { %v2613_v54 = vpop.permute.xlu1 %2612 }
0x500c   :  { %v2615_v28 = vmul.f32 %v2613_v54, %v2607_v55 }
0x500e   :  { %2617 = vrot.lane.b32.xlu2 %v2615_v28, %s3466_s6 }
0x5068   :  { %v2618_v59 = vpop.permute.xlu2 %2617 }
0x5069   :  { %v2620_v32 = vadd.f32 %v2618_v59, %v2610_v56 }
0x506b   :  { %3390 = vtanh.f32 %v2620_v32 }
0x5071   :  { %v3391_v0 = vpop.eup %3390 }
0x5072   :  { %2623 = vrot.lane.b32.xlu0 %v3391_v0, %s3465_s18 }
0x50e4   :  { %v2624_v1 = vpop.permute.xlu0 %2623 }
0x50e5   :  { %v4156_v3 = vmul.f32 %v2624_v1, %v2607_v55 }
0x50e7   :  { %v2633_v5 = vpack.c.bf16 %v4156_v3, %v4156_v3 }
0x50e9   :  { %2635 = vrot.lane.b32.xlu1 %v2633_v5, %s3468_s7 }
0x515b   :  { %v2636_v42 = vpop.permute.xlu1 %2635 }
0x515c   :  { %3079 = vmatmul.msk.bf16.vlgmr.msra.gmra.mxu1 %vm87_vm0, %v2636_v42 }
0x51d9   :  { %v2649_v20 = vpop.f32.mrf.mxu1 }
0x51da   :  { %v2650_v2 = vadd.f32 %v2649_v20, %v4009_v38 }
0x51dc   :  { %3392 = vtanh.f32 %v2650_v2  ;;  %v3080_v61 = vmul.f32 -1.442695, %v2650_v2 }
0x51de   :  { %3394 = vpow2.f32 %v3080_v61 }
0x51e1   :  { %v2651_v60 = vpop.f32.mrf.mxu1 }
0x51e2   :  { %v3393_v4 = vpop.eup %3392 }
0x51e3   :  { %2675 = vrot.lane.b32.xlu2 %v3393_v4, %s3467_s15 }
0x51e4   :  { %v3395_v34 = vpop.eup %3394 }
0x51e5   :  { %v2656_v6 = vadd.f32 1.0, %v3395_v34 }
0x51e7   :  { %3396 = vrcp.f32 %v2656_v6  ;;  %v2668_v26 = vand.u32 2147483648, %v2656_v6  ;;  %vm2662_vm13 = vweird.f32 %v2656_v6  ;;  %v2666_v45 = vand.u32 2147483647, %v2656_v6 }
0x51e9   :  { %v2669_v12 = vor.u32 1.1754944e-38, %v2668_v26  ;;  %vm2667_vm15 = vcmp.eq.f32.partialorder %v2666_v45, 8.507059e+37 }
0x51ed   :  { %v3397_v36 = vpop.eup %3396 }
0x51ee   :  { %v2658_v7 = vmul.f32 %v3397_v36, %v2656_v6  ;;  %vm2663_vm5 = vweird.f32 %v3397_v36 }
0x51ef   :  { %vm2664_vm14 = vmor %vm2662_vm13, %vm2663_vm5 }
0x51f0   :  { %v2659_v47 = vsub.f32 1.0, %v2658_v7 }
0x51f2   :  { %v2660_v8 = vmul.f32 %v3397_v36, %v2659_v47 }
0x51f4   :  { %v2661_v9 = vadd.f32 %v3397_v36, %v2660_v8 }
0x51f6   :  { %v2665_v10 = vsel %vm2664_vm14, %v3397_v36, %v2661_v9 }
0x51f7   :  { %v2670_v16 = vsel %vm2667_vm15, %v2669_v12, %v2665_v10 }
0x51f8   :  { %v2673_v43 = vmul.f32 %v2670_v16, %v2620_v32 }
0x523d   :  { %v2676_v13 = vpop.permute.xlu2 %2675 }
0x523e   :  { %v2678_v22 = vmul.f32 %v2676_v13, %v2670_v16 }
0x5240   :  { %2680 = vrot.lane.b32.xlu0 %v2678_v22, %s3466_s6 }
0x52b2   :  { %v2681_v25 = vpop.permute.xlu0 %2680 }
0x52b3   :  { %v2683_v33 = vadd.f32 %v2681_v25, %v2673_v43 }
0x52b5   :  { %3398 = vtanh.f32 %v2683_v33 }
0x52bb   :  { %v3399_v29 = vpop.eup %3398 }
0x52bc   :  { %2686 = vrot.lane.b32.xlu1 %v3399_v29, %s3465_s18 }
0x532e   :  { %v2687_v24 = vpop.permute.xlu1 %2686 }
0x532f   :  { %v4166_v31 = vmul.f32 %v2687_v24, %v2670_v16 }
0x5331   :  { %v2696_v41 = vpack.c.bf16 %v4166_v31, %v4166_v31 }
0x5333   :  { %2698 = vrot.lane.b32.xlu2 %v2696_v41, %s3468_s7 }
0x538d   :  { %v2699_v48 = vpop.permute.xlu2 %2698 }
0x538e   :  { %3082 = vmatmul.msk.bf16.vlgmr.msra.gmra.mxu0 %vm87_vm0, %v2699_v48 }
0x540b   :  { %v2712_v17 = vpop.f32.mrf.mxu0 }
0x540c   :  { %v2713_v37 = vadd.f32 %v2712_v17, %v4009_v38 }
0x540e   :  { %3400 = vtanh.f32 %v2713_v37  ;;  %v3083_v11 = vmul.f32 -1.442695, %v2713_v37 }
0x5410   :  { %3402 = vpow2.f32 %v3083_v11 }
0x5413   :  { %v2714_v39 = vpop.f32.mrf.mxu0 }
0x5414   :  { %v3401_v49 = vpop.eup %3400 }
0x5415   :  { %2738 = vrot.lane.b32.xlu0 %v3401_v49, %s3467_s15 }
0x5416   :  { %v3403_v46 = vpop.eup %3402 }
0x5417   :  { %v2719_v21 = vadd.f32 1.0, %v3403_v46 }
0x5419   :  { %3404 = vrcp.f32 %v2719_v21  ;;  %v2731_v55 = vand.u32 2147483648, %v2719_v21  ;;  %vm2725_vm2 = vweird.f32 %v2719_v21  ;;  %v2729_v28 = vand.u32 2147483647, %v2719_v21 }
0x541b   :  { %v2732_v59 = vor.u32 1.1754944e-38, %v2731_v55  ;;  %vm2730_vm4 = vcmp.eq.f32.partialorder %v2729_v28, 8.507059e+37 }
0x541f   :  { %v3405_v50 = vpop.eup %3404 }
0x5420   :  { %v2721_v51 = vmul.f32 %v3405_v50, %v2719_v21  ;;  %vm2726_vm1 = vweird.f32 %v3405_v50 }
0x5421   :  { %vm2727_vm3 = vmor %vm2725_vm2, %vm2726_vm1 }
0x5422   :  { %v2722_v52 = vsub.f32 1.0, %v2721_v51 }
0x5424   :  { %v2723_v53 = vmul.f32 %v3405_v50, %v2722_v52 }
0x5426   :  { %v2724_v54 = vadd.f32 %v3405_v50, %v2723_v53 }
0x5428   :  { %v2728_v56 = vsel %vm2727_vm3, %v3405_v50, %v2724_v54 }
0x5429   :  { %v2733_v0 = vsel %vm2730_vm4, %v2732_v59, %v2728_v56 }
0x542a   :  { %v2736_v5 = vmul.f32 %v2733_v0, %v2683_v33 }
0x5487   :  { %v2739_v32 = vpop.permute.xlu0 %2738 }
0x5488   :  { %v2741_v1 = vmul.f32 %v2739_v32, %v2733_v0 }
0x548a   :  { %2743 = vrot.lane.b32.xlu1 %v2741_v1, %s3466_s6 }
0x54fc   :  { %v2744_v42 = vpop.permute.xlu1 %2743 }
0x54fd   :  { %v2746_v20 = vadd.f32 %v2744_v42, %v2736_v5 }
0x54ff   :  { %3406 = vtanh.f32 %v2746_v20 }
0x5505   :  { %v3407_v2 = vpop.eup %3406 }
0x5506   :  { %2749 = vrot.lane.b32.xlu2 %v3407_v2, %s3465_s18 }
0x5560   :  { %v2750_v60 = vpop.permute.xlu2 %2749 }
0x5561   :  { %v4176_v4 = vmul.f32 %v2750_v60, %v2733_v0 }
0x5563   :  { %v2759_v61 = vpack.c.bf16 %v4176_v4, %v4176_v4 }
0x5565   :  { %2761 = vrot.lane.b32.xlu0 %v2759_v61, %s3468_s7 }
0x55d7   :  { %v2762_v34 = vpop.permute.xlu0 %2761 }
0x55d8   :  { %3085 = vmatmul.msk.bf16.vlgmr.msra.gmra.mxu2 %vm87_vm0, %v2762_v34 }
0x565b   :  { %v2775_v6 = vpop.f32.mrf.mxu2 }
0x565c   :  { %v2776_v36 = vadd.f32 %v2775_v6, %v4009_v38 }
0x565e   :  { %3408 = vtanh.f32 %v2776_v36  ;;  %v3086_v8 = vmul.f32 -1.442695, %v2776_v36 }
0x5660   :  { %3410 = vpow2.f32 %v3086_v8 }
0x5663   :  { %v2777_v7 = vpop.f32.mrf.mxu2 }
0x5664   :  { %v3409_v47 = vpop.eup %3408 }
0x5665   :  { %2801 = vrot.lane.b32.xlu1 %v3409_v47, %s3467_s15 }
0x5666   :  { %v3411_v9 = vpop.eup %3410 }
0x5667   :  { %v2782_v26 = vadd.f32 1.0, %v3411_v9 }
0x5669   :  { %3412 = vrcp.f32 %v2782_v26  ;;  %v2794_v22 = vand.u32 2147483648, %v2782_v26  ;;  %vm2788_vm7 = vweird.f32 %v2782_v26  ;;  %v2792_v43 = vand.u32 2147483647, %v2782_v26 }
0x566b   :  { %v2795_v33 = vor.u32 1.1754944e-38, %v2794_v22  ;;  %vm2793_vm9 = vcmp.eq.f32.partialorder %v2792_v43, 8.507059e+37 }
0x566f   :  { %v3413_v45 = vpop.eup %3412 }
0x5670   :  { %v2784_v10 = vmul.f32 %v3413_v45, %v2782_v26  ;;  %vm2789_vm6 = vweird.f32 %v3413_v45 }
0x5671   :  { %vm2790_vm8 = vmor %vm2788_vm7, %vm2789_vm6 }
0x5672   :  { %v2785_v12 = vsub.f32 1.0, %v2784_v10 }
0x5674   :  { %v2786_v13 = vmul.f32 %v3413_v45, %v2785_v12 }
0x5676   :  { %v2787_v16 = vadd.f32 %v3413_v45, %v2786_v13 }
0x5678   :  { %v2791_v25 = vsel %vm2790_vm8, %v3413_v45, %v2787_v16 }
0x5679   :  { %v2796_v24 = vsel %vm2793_vm9, %v2795_v33, %v2791_v25 }
0x567a   :  { %v2799_v48 = vmul.f32 %v2796_v24, %v2746_v20 }
0x56d7   :  { %v2802_v29 = vpop.permute.xlu1 %2801 }
0x56d8   :  { %v2804_v41 = vmul.f32 %v2802_v29, %v2796_v24 }
0x56da   :  { %2806 = vrot.lane.b32.xlu2 %v2804_v41, %s3466_s6 }
0x5734   :  { %v2807_v17 = vpop.permute.xlu2 %2806 }
0x5735   :  { %v2809_v37 = vadd.f32 %v2807_v17, %v2799_v48 }
0x5737   :  { %3414 = vtanh.f32 %v2809_v37 }
0x573d   :  { %v3415_v39 = vpop.eup %3414 }
0x573e   :  { %2812 = vrot.lane.b32.xlu0 %v3415_v39, %s3465_s18 }
0x57b0   :  { %v2813_v49 = vpop.permute.xlu0 %2812 }
0x57b1   :  { %v4186_v11 = vmul.f32 %v2813_v49, %v2796_v24 }
0x57b3   :  { %v2822_v46 = vpack.c.bf16 %v4186_v11, %v4186_v11 }
0x57b5   :  { %2824 = vrot.lane.b32.xlu1 %v2822_v46, %s3468_s7 }
0x5827   :  { %v2825_v21 = vpop.permute.xlu1 %2824 }
0x5828   :  { %3088 = vmatmul.msk.bf16.vlgmr.msrb.gmra.mxu3 %vm87_vm0, %v2825_v21 }
0x58ab   :  { %v2838_v50 = vpop.f32.mrf.mxu3 }
0x58ac   :  { %v2839_v51 = vadd.f32 %v2838_v50, %v4009_v38 }
0x58ae   :  { %3416 = vtanh.f32 %v2839_v51  ;;  %v3089_v54 = vmul.f32 -1.442695, %v2839_v51 }
0x58b0   :  { %3418 = vpow2.f32 %v3089_v54 }
0x58b3   :  { %v2840_v52 = vpop.f32.mrf.mxu3 }
0x58b4   :  { %v3417_v53 = vpop.eup %3416 }
0x58b5   :  { %2864 = vrot.lane.b32.xlu2 %v3417_v53, %s3467_s15 }
0x58b6   :  { %v3419_v55 = vpop.eup %3418 }
0x58b7   :  { %v2845_v28 = vadd.f32 1.0, %v3419_v55 }
0x58b9   :  { %3420 = vrcp.f32 %v2845_v28  ;;  %v2857_v5 = vand.u32 2147483648, %v2845_v28  ;;  %vm2851_vm11 = vweird.f32 %v2845_v28  ;;  %v2855_v42 = vand.u32 2147483647, %v2845_v28 }
0x58bb   :  { %v2858_v2 = vor.u32 1.1754944e-38, %v2857_v5  ;;  %vm2856_vm5 = vcmp.eq.f32.partialorder %v2855_v42, 8.507059e+37 }
0x58bf   :  { %v3421_v56 = vpop.eup %3420 }
0x58c0   :  { %v2847_v59 = vmul.f32 %v3421_v56, %v2845_v28  ;;  %vm2852_vm10 = vweird.f32 %v3421_v56 }
0x58c1   :  { %vm2853_vm12 = vmor %vm2851_vm11, %vm2852_vm10 }
0x58c2   :  { %v2848_v32 = vsub.f32 1.0, %v2847_v59 }
0x58c4   :  { %v2849_v0 = vmul.f32 %v3421_v56, %v2848_v32 }
0x58c6   :  { %v2850_v1 = vadd.f32 %v3421_v56, %v2849_v0 }
0x58c8   :  { %v2854_v20 = vsel %vm2853_vm12, %v3421_v56, %v2850_v1 }
0x58c9   :  { %v2859_v61 = vsel %vm2856_vm5, %v2858_v2, %v2854_v20 }
0x58ca   :  { %v2862_v6 = vmul.f32 %v2859_v61, %v2809_v37 }
0x590f   :  { %v2865_v60 = vpop.permute.xlu2 %2864 }
0x5910   :  { %v2867_v34 = vmul.f32 %v2865_v60, %v2859_v61 }
0x5912   :  { %2869 = vrot.lane.b32.xlu0 %v2867_v34, %s3466_s6 }
0x5984   :  { %v2870_v36 = vpop.permute.xlu0 %2869 }
0x5985   :  { %v4195_v7 = vadd.f32 %v2870_v36, %v2862_v6 }
0x5987   :  { %3422 = vtanh.f32 %v4195_v7 }
0x598d   :  { %v3423_v47 = vpop.eup %3422 }
0x598e   :  { %2875 = vrot.lane.b32.xlu1 %v3423_v47, %s3465_s18 }
0x5a00   :  { %v2876_v8 = vpop.permute.xlu1 %2875 }
0x5a01   :  { %v2878_v9 = vmul.f32 %v2876_v8, %v2859_v61 }
0x5a03   :  { %v2885_v26 = vpack.c.bf16 %v2878_v9, %v2878_v9 }
0x5a05   :  { %2887 = vrot.lane.b32.xlu2 %v2885_v26, %s3468_s7 }
0x5a5f   :  { %v2888_v45 = vpop.permute.xlu2 %2887 }
0x5a60   :  { %3091 = vmatmul.msk.bf16.vlgmr.msrb.gmra.mxu1 %vm87_vm0, %v2888_v45 }
0x5add   :  { %v2901_v10 = vpop.f32.mrf.mxu1 }
0x5ade   :  { %v2902_v12 = vadd.f32 %v2901_v10, %v4009_v38 }
0x5ae0   :  { %3424 = vtanh.f32 %v2902_v12  ;;  %v3092_v38 = vmul.f32 -1.442695, %v2902_v12 }
0x5ae2   :  { %3426 = vpow2.f32 %v3092_v38 }
0x5ae5   :  { %v2903_v13 = vpop.f32.mrf.mxu1 }
0x5ae6   :  { %v3425_v16 = vpop.eup %3424 }
0x5ae7   :  { %2927 = vrot.lane.b32.xlu0 %v3425_v16, %s3467_s15 }
0x5aef   :  { %1746 = vrot.lane.b32.xlu0 %v3999_v40, %s3468_s7  ;;  %v3427_v40 = vpop.eup %3426 }
0x5af0   :  { %v2908_v22 = vadd.f32 1.0, %v3427_v40 }
0x5af2   :  { %3428 = vrcp.f32 %v2908_v22  ;;  %vm2914_vm14 = vweird.f32 %v2908_v22  ;;  %v2918_v29 = vand.u32 2147483647, %v2908_v22 }
0x5af4   :  { %vm2919_vm1 = vcmp.eq.f32.partialorder %v2918_v29, 8.507059e+37 }
0x5af7   :  { %1935 = vrot.lane.b32.xlu0 %v4037_v27, %s3468_s7 }
0x5af8   :  { %v3429_v27 = vpop.eup %3428 }
0x5af9   :  { %v2910_v43 = vmul.f32 %v3429_v27, %v2908_v22  ;;  %vm2915_vm13 = vweird.f32 %v3429_v27 }
0x5afa   :  { %vm2916_vm15 = vmor %vm2914_vm14, %vm2915_vm13 }
0x5afb   :  { %v2911_v25 = vsub.f32 1.0, %v2910_v43 }
0x5aff   :  { %2124 = vrot.lane.b32.xlu0 %v4070_v44, %s3468_s7  ;;  %v2912_v44 = vmul.f32 %v3429_v27, %v2911_v25 }
0x5b01   :  { %v2913_v33 = vadd.f32 %v3429_v27, %v2912_v44 }
0x5b07   :  { %2313 = vrot.lane.b32.xlu0 %v4103_v14, %s3468_s7  ;;  %v2920_v14 = vand.u32 2147483648, %v2908_v22 }
0x5b09   :  { %v2921_v24 = vor.u32 1.1754944e-38, %v2920_v14 }
0x5b0f   :  { %2502 = vrot.lane.b32.xlu0 %v4136_v62, %s3468_s7  ;;  %v2917_v62 = vsel %vm2916_vm15, %v3429_v27, %v2913_v33 }
0x5b10   :  { %v2922_v41 = vsel %vm2919_vm1, %v2921_v24, %v2917_v62 }
0x5b17   :  { %2691 = vrot.lane.b32.xlu0 %v4166_v31, %s3468_s7 }
0x5b1f   :  { %2880 = vrot.lane.b32.xlu0 %v2878_v9, %s3468_s7 }
0x5b59   :  { %v2928_v31 = vpop.permute.xlu0 %2927 }
0x5b5a   :  { %v2930_v48 = vmul.f32 %v2928_v31, %v2922_v41 }
0x5b5c   :  { %2932 = vrot.lane.b32.xlu1 %v2930_v48, %s3466_s6 }
0x5b61   :  { %v1747_v17 = vpop.permute.xlu0 %1746 }
0x5b62   :  { %3036 = vst.msk [vmem:[%s4338_s11 + $0x98] sm:$0xff] %vm87_vm0, %v1747_v17 }
0x5b64   :  { %1809 = vrot.lane.b32.xlu1 %v4015_v35, %s3468_s7 }
0x5b69   :  { %v1936_v37 = vpop.permute.xlu0 %1935 }
0x5b6a   :  { %3045 = vst.msk [vmem:[%s4338_s11 + $0x80] sm:$0xff] %vm87_vm0, %v1936_v37 }
0x5b6c   :  { %1998 = vrot.lane.b32.xlu1 %v4048_v63, %s3468_s7 }
0x5b71   :  { %v2125_v39 = vpop.permute.xlu0 %2124 }
0x5b72   :  { %3054 = vst.msk [vmem:[%s4338_s11 + $0x68] sm:$0xff] %vm87_vm0, %v2125_v39 }
0x5b74   :  { %2187 = vrot.lane.b32.xlu1 %v4081_v15, %s3468_s7 }
0x5b79   :  { %v2314_v49 = vpop.permute.xlu0 %2313 }
0x5b7a   :  { %3063 = vst.msk [vmem:[%s4338_s11 + $0x50] sm:$0xff] %vm87_vm0, %v2314_v49 }
0x5b7c   :  { %2376 = vrot.lane.b32.xlu1 %v4114_v58, %s3468_s7  ;;  %v2925_v58 = vmul.f32 %v2922_v41, %v4195_v7 }
0x5b81   :  { %v2503_v35 = vpop.permute.xlu0 %2502 }
0x5b82   :  { %3072 = vst.msk [vmem:[%s4338_s11 + $0x38] sm:$0xff] %vm87_vm0, %v2503_v35 }
0x5b84   :  { %2565 = vrot.lane.b32.xlu1 %v4146_v23, %s3468_s7 }
0x5b89   :  { %v2692_v63 = vpop.permute.xlu0 %2691 }
0x5b8a   :  { %3081 = vst.msk [vmem:[%s4338_s11 + $0x20] sm:$0xff] %vm87_vm0, %v2692_v63 }
0x5b8c   :  { %2754 = vrot.lane.b32.xlu1 %v4176_v4, %s3468_s7 }
0x5b91   :  { %v2881_v15 = vpop.permute.xlu0 %2880 }
0x5b92   :  { %3090 = vst.msk [vmem:[%s4338_s11 + $0x8] sm:$0xff] %vm87_vm0, %v2881_v15 }
0x5bce   :  { %v2933_v46 = vpop.permute.xlu1 %2932 }
0x5bcf   :  { %v2935_v21 = vadd.f32 %v2933_v46, %v2925_v58 }
0x5bd1   :  { %3430 = vtanh.f32 %v2935_v21 }
0x5bd6   :  { %v1810_v23 = vpop.permute.xlu1 %1809 }
0x5bd7   :  { %v3431_v50 = vpop.eup %3430  ;;  %3039 = vst.msk [vmem:[%s4338_s11 + $0x90] sm:$0xff] %vm87_vm0, %v1810_v23 }
0x5bd8   :  { %2938 = vrot.lane.b32.xlu2 %v3431_v50, %s3465_s18 }
0x5bde   :  { %v1999_v4 = vpop.permute.xlu1 %1998 }
0x5bdf   :  { %3048 = vst.msk [vmem:[%s4338_s11 + $0x78] sm:$0xff] %vm87_vm0, %v1999_v4 }
0x5be0   :  { %1872 = vrot.lane.b32.xlu2 %v4026_v30, %s3468_s7 }
0x5be6   :  { %v2188_v51 = vpop.permute.xlu1 %2187 }
0x5be7   :  { %3057 = vst.msk [vmem:[%s4338_s11 + $0x60] sm:$0xff] %vm87_vm0, %v2188_v51 }
0x5be8   :  { %2061 = vrot.lane.b32.xlu2 %v4059_v19, %s3468_s7 }
0x5bee   :  { %v2377_v52 = vpop.permute.xlu1 %2376 }
0x5bef   :  { %3066 = vst.msk [vmem:[%s4338_s11 + $0x48] sm:$0xff] %vm87_vm0, %v2377_v52 }
0x5bf0   :  { %2250 = vrot.lane.b32.xlu2 %v4092_v57, %s3468_s7 }
0x5bf6   :  { %v2566_v53 = vpop.permute.xlu1 %2565 }
0x5bf7   :  { %3075 = vst.msk [vmem:[%s4338_s11 + $0x30] sm:$0xff] %vm87_vm0, %v2566_v53 }
0x5bf8   :  { %2439 = vrot.lane.b32.xlu2 %v4125_v18, %s3468_s7 }
0x5bfe   :  { %v2755_v30 = vpop.permute.xlu1 %2754 }
0x5bff   :  { %3084 = vst.msk [vmem:[%s4338_s11 + $0x18] sm:$0xff] %vm87_vm0, %v2755_v30 }
0x5c00   :  { %2628 = vrot.lane.b32.xlu2 %v4156_v3, %s3468_s7 }
0x5c08   :  { %2817 = vrot.lane.b32.xlu2 %v4186_v11, %s3468_s7 }
0x5c32   :  { %v2939_v19 = vpop.permute.xlu2 %2938 }
0x5c33   :  { %v2941_v57 = vmul.f32 %v2939_v19, %v2922_v41 }
0x5c35   :  { %2943 = vrot.lane.b32.xlu1 %v2941_v57, %s3468_s7 }
0x5c3a   :  { %v1873_v18 = vpop.permute.xlu2 %1872 }
0x5c3b   :  { %3042 = vst.msk [vmem:[%s4338_s11 + $0x88] sm:$0xff] %vm87_vm0, %v1873_v18 }
0x5c42   :  { %v2062_v3 = vpop.permute.xlu2 %2061 }
0x5c43   :  { %3051 = vst.msk [vmem:[%s4338_s11 + $0x70] sm:$0xff] %vm87_vm0, %v2062_v3 }
0x5c4a   :  { %v2251_v11 = vpop.permute.xlu2 %2250 }
0x5c4b   :  { %3060 = vst.msk [vmem:[%s4338_s11 + $0x58] sm:$0xff] %vm87_vm0, %v2251_v11 }
0x5c52   :  { %v2440_v54 = vpop.permute.xlu2 %2439 }
0x5c53   :  { %3069 = vst.msk [vmem:[%s4338_s11 + $0x40] sm:$0xff] %vm87_vm0, %v2440_v54 }
0x5c5a   :  { %v2629_v55 = vpop.permute.xlu2 %2628 }
0x5c5b   :  { %3078 = vst.msk [vmem:[%s4338_s11 + $0x28] sm:$0xff] %vm87_vm0, %v2629_v55 }
0x5c62   :  { %v2818_v28 = vpop.permute.xlu2 %2817 }
0x5c63   :  { %3087 = vst.msk [vmem:[%s4338_s11 + $0x10] sm:$0xff] %vm87_vm0, %v2818_v28 }
0x5ca7   :  { %v2944_v56 = vpop.permute.xlu1 %2943 }
0x5ca8   :  { %2946 = vst.msk [vmem:[%s4338_s11] sm:$0xff] %vm87_vm0, %v2944_v56 }
0x5ca9   :  { %3461 = dma.done.wait [#allocation4], 128  }
0x5caa   :  { %3462 = vsyncadd [#allocation4], 4294967168 }
0x5cab   :  { %2966 = vsyncpa [#allocation4], 1 }

</bundles_post_ra>
